<compile_context>
chip_gen: v7x
topology: tpu7x:2x2x1
jax: 0.10.0
libtpu: 0.0.40
codegen_flags: <defaults>
</compile_context>

<pallas_src>
import functools
import math

import jax
import jax.numpy as jnp
import numpy as np
from jax import lax
from jax.experimental import pallas as pl
from jax.experimental.pallas import tpu as pltpu

D_MODEL = 32
NUM_HEADS = 4
HEAD_DIM = D_MODEL // NUM_HEADS
FF_DIM = 2048          # PyTorch TransformerEncoderLayer default dim_feedforward
INPUT_DIM = 1
LN_EPS = 1e-5

PARAM_ORDER = ("wp", "bp", "wqkv", "bqkv", "wo", "bo", "ln1g", "ln1b",
               "w1", "b1", "w2", "b2", "ln2g", "ln2b", "wh", "bh")


def _layernorm(x, gamma, beta):
    mu = jnp.mean(x, axis=-1, keepdims=True)
    var = jnp.mean((x - mu) ** 2, axis=-1, keepdims=True)
    return (x - mu) * lax.rsqrt(var + LN_EPS) * gamma + beta


def informer_kernel(x_ref, wp_ref, bp_ref, wqkv_ref, bqkv_ref, wo_ref, bo_ref,
                    ln1g_ref, ln1b_ref, w1_ref, b1_ref, w2_ref, b2_ref,
                    ln2g_ref, ln2b_ref, wh_ref, bh_ref, out_ref,
                    *, num_heads, seq_len, b_tile):
    BS, IN = x_ref.shape                 # BS = b_tile * seq_len stacked rows
    D = wp_ref.shape[1]
    hd = D // num_heads
    scale = 1.0 / math.sqrt(hd)

    x = x_ref[...]                                                  # (BS, IN) f32

    # ---- input projection (IN is tiny -> broadcast mul-adds, not a K=1 matmul)
    h = jnp.broadcast_to(bp_ref[...], (BS, D))
    for i in range(IN):
        h = h + x[:, i:i + 1] * wp_ref[i:i + 1, :]                  # (BS, D) f32

    # ---- QKV projection for all b_tile sequences at once (bf16 in, f32 acc)
    qkv = jnp.dot(h.astype(wqkv_ref.dtype), wqkv_ref[...],
                  preferred_element_type=jnp.float32) + bqkv_ref[...]   # (BS, 3D)
    qkv3 = qkv.reshape(b_tile, seq_len, 3 * D)

    # ---- per-sequence multi-head self-attention (no cross-sequence mask needed)
    ctx = []
    for head in range(num_heads):
        lo = head * hd
        q = qkv3[:, :, lo:lo + hd].astype(jnp.bfloat16)             # (bt, S, hd)
        k = qkv3[:, :, D + lo:D + lo + hd].astype(jnp.bfloat16)
        v = qkv3[:, :, 2 * D + lo:2 * D + lo + hd].astype(jnp.bfloat16)
        s = jnp.einsum("bqd,bkd->bqk", q, k,
                       preferred_element_type=jnp.float32) * scale  # (bt, S, S) f32
        m = jnp.max(s, axis=-1, keepdims=True)
        e = jnp.exp(s - m)
        denom = jnp.sum(e, axis=-1, keepdims=True)
        p = e * pl.reciprocal(denom, approx=True)                   # softmax (f32)
        o_h = jnp.einsum("bqk,bkd->bqd", p.astype(jnp.bfloat16), v,
                         preferred_element_type=jnp.float32)        # (bt, S, hd)
        ctx.append(o_h.reshape(BS, hd))

    # single (BS,32)@(32,32) output projection (heads concatenated along lanes)
    o = jnp.concatenate(ctx, axis=-1)                               # (BS, D) f32
    attn = jnp.dot(o.astype(wo_ref.dtype), wo_ref[...],
                   preferred_element_type=jnp.float32) + bo_ref[...]

    h = _layernorm(h + attn, ln1g_ref[...], ln1b_ref[...])

    # ---- feed-forward block (ReLU); bf16 operands, f32 accumulation
    f = jnp.dot(h.astype(w1_ref.dtype), w1_ref[...],
                preferred_element_type=jnp.float32) + b1_ref[...]
    f = jnp.maximum(f, 0.0)
    f = jnp.dot(f.astype(w2_ref.dtype), w2_ref[...],
                preferred_element_type=jnp.float32) + b2_ref[...]
    h = _layernorm(h + f, ln2g_ref[...], ln2b_ref[...])

    # ---- last time step of every sequence, then the [mu, log_sigma] heads.
    last = h.reshape(b_tile, seq_len, D)[:, seq_len - 1, :]         # (bt, D)
    out_ref[...] = jnp.dot(last, wh_ref[...],
                           preferred_element_type=jnp.float32) + bh_ref[...]


def _round_up(x, m):
    return ((x + m - 1) // m) * m


def _choose_b_tile(B, S, target_rows=256):
    # b_tile is always a multiple of 8 so the (b_tile*S, IN) input block and
    # the (b_tile, 2) output block satisfy the (8, 128) sublane constraint for
    # any S -- no bt=B fallback (which could allocate O((B*S)^2) VMEM).
    bt = max(8, 8 * (target_rows // (8 * max(S, 1))))   # ~256 MXU rows/program
    bt = min(bt, _round_up(B, 8))                       # don't out-tile the batch
    # v7x megacore: keep >= 2 parallel programs when the batch allows it.
    if _round_up(B, bt) // bt < 2 and bt > 8:
        bt = max(8, 8 * ((bt // 2) // 8))
    return bt


def informer_gaussian_forward(x, params, b_tile=None):
    B, S, IN = x.shape
    if b_tile is None:
        b_tile = _choose_b_tile(B, S)
    B_pad = _round_up(B, b_tile)
    if B_pad != B:
        x = jnp.concatenate([x, jnp.zeros((B_pad - B, S, IN), x.dtype)], axis=0)
    x_rows = x.reshape(B_pad * S, IN)           # stacked (rows, feature) layout

    # bf16 only for the matmul weights (attention path + FFN); biases,
    # LayerNorm params and the output heads stay f32.
    kparams = dict(params)
    for name in ("wqkv", "wo", "w1", "w2"):
        kparams[name] = params[name].astype(jnp.bfloat16)
    weights = [kparams[k] for k in PARAM_ORDER]

    BS = b_tile * S
    grid = (B_pad // b_tile,)

    def full_spec(a):
        nd = a.ndim
        return pl.BlockSpec(a.shape, lambda b, _nd=nd: (0,) * _nd)

    grid_spec = pltpu.PrefetchScalarGridSpec(
        num_scalar_prefetch=0,
        grid=grid,
        in_specs=[pl.BlockSpec((BS, IN), lambda b: (b, 0))]
                 + [full_spec(w) for w in weights],
        out_specs=pl.BlockSpec((b_tile, 2), lambda b: (b, 0)),
    )
    out = pl.pallas_call(
        functools.partial(informer_kernel, num_heads=NUM_HEADS, seq_len=S,
                          b_tile=b_tile),
        out_shape=jax.ShapeDtypeStruct((B_pad, 2), jnp.float32),
        grid_spec=grid_spec,
        compiler_params=pltpu.CompilerParams(
            dimension_semantics=("parallel",),
            vmem_limit_bytes=32 * 1024 * 1024),
    )(x_rows, *weights)

    out = out[:B]             # drop padded batch rows
    mu = out[:, 0]            # == mu_head(last).squeeze()        -> shape (B,)
    log_sigma = out[:, 1]     # == log_sigma_head(last).squeeze() -> shape (B,)
    return mu, log_sigma


def make_params(key):
    ks = jax.random.split(key, 12)

    def w(k, shape, scale=0.05):
        return (scale * jax.random.normal(k, shape)).astype(jnp.float32)

    # Weights are stored already transposed for x @ W use inside the kernel.
    return dict(
        wp=w(ks[0], (INPUT_DIM, D_MODEL)),        # input_proj.weight.T
        bp=w(ks[1], (1, D_MODEL)),                # input_proj.bias
        wqkv=w(ks[2], (D_MODEL, 3 * D_MODEL)),    # MHA in_proj_weight.T ([q|k|v] columns)
        bqkv=w(ks[3], (1, 3 * D_MODEL)),          # MHA in_proj_bias
        wo=w(ks[4], (D_MODEL, D_MODEL)),          # MHA out_proj.weight.T
        bo=w(ks[5], (1, D_MODEL)),                # MHA out_proj.bias
        ln1g=jnp.ones((1, D_MODEL), jnp.float32),
        ln1b=jnp.zeros((1, D_MODEL), jnp.float32),
        w1=w(ks[6], (D_MODEL, FF_DIM)),           # linear1.weight.T
        b1=w(ks[7], (1, FF_DIM)),                 # linear1.bias
        w2=w(ks[8], (FF_DIM, D_MODEL)),           # linear2.weight.T
        b2=w(ks[9], (1, D_MODEL)),                # linear2.bias
        ln2g=jnp.ones((1, D_MODEL), jnp.float32),
        ln2b=jnp.zeros((1, D_MODEL), jnp.float32),
        wh=w(ks[10], (D_MODEL, 2)),               # [mu_head.weight.T | log_sigma_head.weight.T]
        bh=w(ks[11], (1, 2)),                     # [mu_head.bias, log_sigma_head.bias]
    )


def informer_gaussian_reference(x, params):
    """Pure-JAX f32 reference mirroring the PyTorch forward (eval mode)."""
    B, S, IN = x.shape
    h = x.reshape(B * S, IN) @ params["wp"] + params["bp"]
    h = h.reshape(B, S, D_MODEL)
    qkv = h @ params["wqkv"] + params["bqkv"]
    q, k, v = jnp.split(qkv, 3, axis=-1)

    def heads(t):
        return t.reshape(B, S, NUM_HEADS, HEAD_DIM).transpose(0, 2, 1, 3)

    qh = heads(q) / math.sqrt(HEAD_DIM)
    kh, vh = heads(k), heads(v)
    scores = jnp.einsum("bhsd,bhtd->bhst", qh, kh)
    p = jax.nn.softmax(scores, axis=-1)
    attn = jnp.einsum("bhst,bhtd->bhsd", p, vh).transpose(0, 2, 1, 3).reshape(B, S, D_MODEL)
    attn = attn @ params["wo"] + params["bo"]

    def ln(t, g, bb):
        mu = t.mean(-1, keepdims=True)
        var = ((t - mu) ** 2).mean(-1, keepdims=True)
        return (t - mu) / jnp.sqrt(var + LN_EPS) * g + bb

    h = ln(h + attn, params["ln1g"], params["ln1b"])
    f = jnp.maximum(h @ params["w1"] + params["b1"], 0.0) @ params["w2"] + params["b2"]
    h = ln(h + f, params["ln2g"], params["ln2b"])
    last = h[:, -1, :]
    out = last @ params["wh"] + params["bh"]
    return out[:, 0], out[:, 1]


if __name__ == "__main__":
    key = jax.random.PRNGKey(0)
    pkey, xkey1, xkey2 = jax.random.split(key, 3)
    params = make_params(pkey)

    # Small demo shape: batch=2, seq=8, input_dim=1 (single-program grid, b_tile=8).
    B, S = 2, 8
    x = jax.random.normal(xkey1, (B, S, INPUT_DIM), dtype=jnp.float32)
    mu, log_sigma = jax.block_until_ready(informer_gaussian_forward(x, params))
    mu_ref, ls_ref = informer_gaussian_reference(x, params)
    np.testing.assert_allclose(np.asarray(mu), np.asarray(mu_ref), atol=5e-2, rtol=5e-2)
    np.testing.assert_allclose(np.asarray(log_sigma), np.asarray(ls_ref), atol=5e-2, rtol=5e-2)
    assert mu.shape == (B,) and log_sigma.shape == (B,)

    # Larger batch exercising the padded, multi-program parallel grid path
    # (B=20 -> B_pad=24, b_tile=8 -> 3 parallel programs).
    B2 = 20
    x2 = jax.random.normal(xkey2, (B2, S, INPUT_DIM), dtype=jnp.float32)
    mu2, ls2 = jax.block_until_ready(informer_gaussian_forward(x2, params))
    mu2_ref, ls2_ref = informer_gaussian_reference(x2, params)
    np.testing.assert_allclose(np.asarray(mu2), np.asarray(mu2_ref), atol=5e-2, rtol=5e-2)
    np.testing.assert_allclose(np.asarray(ls2), np.asarray(ls2_ref), atol=5e-2, rtol=5e-2)
    assert mu2.shape == (B2,) and ls2.shape == (B2,)

    print("KERNEL_OK")
</pallas_src>

<mosaic_0001>
module attributes {stable_mosaic.version = 11 : i64} {
  func.func @informer_kernel(%arg0: i32, %arg1: memref<64x1xf32, #tpu.memory_space<vmem>>, %arg2: memref<1x32xf32, #tpu.memory_space<vmem>>, %arg3: memref<1x32xf32, #tpu.memory_space<vmem>>, %arg4: memref<32x96xbf16, #tpu.memory_space<vmem>>, %arg5: memref<1x96xf32, #tpu.memory_space<vmem>>, %arg6: memref<32x32xbf16, #tpu.memory_space<vmem>>, %arg7: memref<1x32xf32, #tpu.memory_space<vmem>>, %arg8: memref<1x32xf32, #tpu.memory_space<vmem>>, %arg9: memref<1x32xf32, #tpu.memory_space<vmem>>, %arg10: memref<32x2048xbf16, #tpu.memory_space<vmem>>, %arg11: memref<1x2048xf32, #tpu.memory_space<vmem>>, %arg12: memref<2048x32xbf16, #tpu.memory_space<vmem>>, %arg13: memref<1x32xf32, #tpu.memory_space<vmem>>, %arg14: memref<1x32xf32, #tpu.memory_space<vmem>>, %arg15: memref<1x32xf32, #tpu.memory_space<vmem>>, %arg16: memref<32x2xf32, #tpu.memory_space<vmem>>, %arg17: memref<1x2xf32, #tpu.memory_space<vmem>>, %arg18: memref<8x2xf32, #tpu.memory_space<vmem>>) attributes {dimension_semantics = [#tpu.dimension_semantics<parallel>], iteration_bounds = array<i64: 1>, scalar_prefetch = 0 : i64, scratch_operands = 0 : i64, tpu.core_type = #tpu.core_type<tc>, window_params = [{transform_indices = @transform_0, window_bounds = array<i64: 64, 1>}, {pipeline_mode = #tpu.pipeline_mode<synchronous>, transform_indices = @transform_1, window_bounds = array<i64: 1, 32>}, {pipeline_mode = #tpu.pipeline_mode<synchronous>, transform_indices = @transform_2, window_bounds = array<i64: 1, 32>}, {pipeline_mode = #tpu.pipeline_mode<synchronous>, transform_indices = @transform_3, window_bounds = array<i64: 32, 96>}, {pipeline_mode = #tpu.pipeline_mode<synchronous>, transform_indices = @transform_4, window_bounds = array<i64: 1, 96>}, {pipeline_mode = #tpu.pipeline_mode<synchronous>, transform_indices = @transform_5, window_bounds = array<i64: 32, 32>}, {pipeline_mode = #tpu.pipeline_mode<synchronous>, transform_indices = @transform_6, window_bounds = array<i64: 1, 32>}, {pipeline_mode = #tpu.pipeline_mode<synchronous>, transform_indices = @transform_7, window_bounds = array<i64: 1, 32>}, {pipeline_mode = #tpu.pipeline_mode<synchronous>, transform_indices = @transform_8, window_bounds = array<i64: 1, 32>}, {pipeline_mode = #tpu.pipeline_mode<synchronous>, transform_indices = @transform_9, window_bounds = array<i64: 32, 2048>}, {pipeline_mode = #tpu.pipeline_mode<synchronous>, transform_indices = @transform_10, window_bounds = array<i64: 1, 2048>}, {pipeline_mode = #tpu.pipeline_mode<synchronous>, transform_indices = @transform_11, window_bounds = array<i64: 2048, 32>}, {pipeline_mode = #tpu.pipeline_mode<synchronous>, transform_indices = @transform_12, window_bounds = array<i64: 1, 32>}, {pipeline_mode = #tpu.pipeline_mode<synchronous>, transform_indices = @transform_13, window_bounds = array<i64: 1, 32>}, {pipeline_mode = #tpu.pipeline_mode<synchronous>, transform_indices = @transform_14, window_bounds = array<i64: 1, 32>}, {pipeline_mode = #tpu.pipeline_mode<synchronous>, transform_indices = @transform_15, window_bounds = array<i64: 32, 2>}, {pipeline_mode = #tpu.pipeline_mode<synchronous>, transform_indices = @transform_16, window_bounds = array<i64: 1, 2>}, {transform_indices = @transform_17, window_bounds = array<i64: 8, 2>}]} {
    %c0 = arith.constant 0 : index
    %c0_0 = arith.constant 0 : index
    %0 = vector.load %arg1[%c0, %c0_0] : memref<64x1xf32, #tpu.memory_space<vmem>>, vector<64x1xf32>
    %c0_1 = arith.constant 0 : index
    %c0_2 = arith.constant 0 : index
    %1 = vector.load %arg3[%c0_1, %c0_2] : memref<1x32xf32, #tpu.memory_space<vmem>>, vector<1x32xf32>
    %2 = vector.shape_cast %1 : vector<1x32xf32> to vector<1x32xf32>
    %3 = vector.broadcast %2 : vector<1x32xf32> to vector<64x32xf32>
    %c0_3 = arith.constant 0 : index
    %c0_4 = arith.constant 0 : index
    %4 = vector.load %arg2[%c0_3, %c0_4] : memref<1x32xf32, #tpu.memory_space<vmem>>, vector<1x32xf32>
    %5 = vector.broadcast %0 : vector<64x1xf32> to vector<64x32xf32>
    %6 = vector.broadcast %4 : vector<1x32xf32> to vector<64x32xf32>
    %7 = arith.mulf %5, %6 : vector<64x32xf32>
    %8 = arith.addf %3, %7 : vector<64x32xf32>
    %9 = arith.truncf %8 : vector<64x32xf32> to vector<64x32xbf16>
    %c0_5 = arith.constant 0 : index
    %c0_6 = arith.constant 0 : index
    %10 = vector.load %arg4[%c0_5, %c0_6] : memref<32x96xbf16, #tpu.memory_space<vmem>>, vector<32x96xbf16>
    %cst = arith.constant dense<0.000000e+00> : vector<64x96xf32>
    %11 = tpu.matmul %9, %10, %cst {dimension_numbers = #tpu.dot_dimension_numbers<[1], [0], [0], [1], [0, 0, 1, 1], [], []>} : vector<64x32xbf16>, vector<32x96xbf16>, vector<64x96xf32> -> vector<64x96xf32>
    %c0_7 = arith.constant 0 : index
    %c0_8 = arith.constant 0 : index
    %12 = vector.load %arg5[%c0_7, %c0_8] : memref<1x96xf32, #tpu.memory_space<vmem>>, vector<1x96xf32>
    %13 = vector.broadcast %12 : vector<1x96xf32> to vector<64x96xf32>
    %14 = arith.addf %11, %13 : vector<64x96xf32>
    %15 = vector.shape_cast %14 : vector<64x96xf32> to vector<8x8x96xf32>
    %16 = vector.extract_strided_slice %15 {offsets = [0, 0, 0], sizes = [8, 8, 8], strides = [1, 1, 1]} : vector<8x8x96xf32> to vector<8x8x8xf32>
    %17 = arith.truncf %16 : vector<8x8x8xf32> to vector<8x8x8xbf16>
    %18 = vector.extract_strided_slice %15 {offsets = [0, 0, 32], sizes = [8, 8, 8], strides = [1, 1, 1]} : vector<8x8x96xf32> to vector<8x8x8xf32>
    %19 = arith.truncf %18 : vector<8x8x8xf32> to vector<8x8x8xbf16>
    %20 = vector.extract_strided_slice %15 {offsets = [0, 0, 64], sizes = [8, 8, 8], strides = [1, 1, 1]} : vector<8x8x96xf32> to vector<8x8x8xf32>
    %21 = arith.truncf %20 : vector<8x8x8xf32> to vector<8x8x8xbf16>
    "tpu.trace_start"() <{level = 10 : i32, message = "bqd,bkd->bqk"}> : () -> ()
    %cst_9 = arith.constant dense<0.000000e+00> : vector<8x8x8xf32>
    %22 = tpu.matmul %17, %19, %cst_9 {dimension_numbers = #tpu.dot_dimension_numbers<[2], [2], [1], [1], [0, 0, 0, 1, 1, 1], [0], [0]>} : vector<8x8x8xbf16>, vector<8x8x8xbf16>, vector<8x8x8xf32> -> vector<8x8x8xf32>
    "tpu.trace_stop"() : () -> ()
    %cst_10 = arith.constant 0.353553385 : f32
    %23 = vector.broadcast %cst_10 : f32 to vector<8x8x8xf32>
    %24 = arith.mulf %22, %23 : vector<8x8x8xf32>
    %cst_11 = arith.constant dense<0xFF800000> : vector<8x8xf32>
    %25 = vector.multi_reduction <maximumf>, %24, %cst_11 [2] : vector<8x8x8xf32> to vector<8x8xf32>
    %26 = vector.shape_cast %25 : vector<8x8xf32> to vector<8x8x1xf32>
    %27 = vector.broadcast %26 : vector<8x8x1xf32> to vector<8x8x8xf32>
    %28 = arith.subf %24, %27 : vector<8x8x8xf32>
    %29 = math.exp %28 : vector<8x8x8xf32>
    %cst_12 = arith.constant dense<0.000000e+00> : vector<8x8xf32>
    %30 = vector.multi_reduction <add>, %29, %cst_12 [2] : vector<8x8x8xf32> to vector<8x8xf32>
    %31 = vector.shape_cast %30 : vector<8x8xf32> to vector<8x8x1xf32>
    %32 = tpu.reciprocal %31 {approx = true} : vector<8x8x1xf32> -> vector<8x8x1xf32>
    %33 = vector.broadcast %32 : vector<8x8x1xf32> to vector<8x8x8xf32>
    %34 = arith.mulf %29, %33 : vector<8x8x8xf32>
    %35 = arith.truncf %34 : vector<8x8x8xf32> to vector<8x8x8xbf16>
    "tpu.trace_start"() <{level = 10 : i32, message = "bqk,bkd->bqd"}> : () -> ()
    %cst_13 = arith.constant dense<0.000000e+00> : vector<8x8x8xf32>
    %36 = tpu.matmul %35, %21, %cst_13 {dimension_numbers = #tpu.dot_dimension_numbers<[2], [1], [1], [2], [0, 0, 0, 1, 1, 2], [0], [0]>} : vector<8x8x8xbf16>, vector<8x8x8xbf16>, vector<8x8x8xf32> -> vector<8x8x8xf32>
    "tpu.trace_stop"() : () -> ()
    %37 = vector.shape_cast %36 : vector<8x8x8xf32> to vector<64x8xf32>
    %38 = vector.extract_strided_slice %15 {offsets = [0, 0, 8], sizes = [8, 8, 8], strides = [1, 1, 1]} : vector<8x8x96xf32> to vector<8x8x8xf32>
    %39 = arith.truncf %38 : vector<8x8x8xf32> to vector<8x8x8xbf16>
    %40 = vector.extract_strided_slice %15 {offsets = [0, 0, 40], sizes = [8, 8, 8], strides = [1, 1, 1]} : vector<8x8x96xf32> to vector<8x8x8xf32>
    %41 = arith.truncf %40 : vector<8x8x8xf32> to vector<8x8x8xbf16>
    %42 = vector.extract_strided_slice %15 {offsets = [0, 0, 72], sizes = [8, 8, 8], strides = [1, 1, 1]} : vector<8x8x96xf32> to vector<8x8x8xf32>
    %43 = arith.truncf %42 : vector<8x8x8xf32> to vector<8x8x8xbf16>
    "tpu.trace_start"() <{level = 10 : i32, message = "bqd,bkd->bqk"}> : () -> ()
    %cst_14 = arith.constant dense<0.000000e+00> : vector<8x8x8xf32>
    %44 = tpu.matmul %39, %41, %cst_14 {dimension_numbers = #tpu.dot_dimension_numbers<[2], [2], [1], [1], [0, 0, 0, 1, 1, 1], [0], [0]>} : vector<8x8x8xbf16>, vector<8x8x8xbf16>, vector<8x8x8xf32> -> vector<8x8x8xf32>
    "tpu.trace_stop"() : () -> ()
    %cst_15 = arith.constant 0.353553385 : f32
    %45 = vector.broadcast %cst_15 : f32 to vector<8x8x8xf32>
    %46 = arith.mulf %44, %45 : vector<8x8x8xf32>
    %cst_16 = arith.constant dense<0xFF800000> : vector<8x8xf32>
    %47 = vector.multi_reduction <maximumf>, %46, %cst_16 [2] : vector<8x8x8xf32> to vector<8x8xf32>
    %48 = vector.shape_cast %47 : vector<8x8xf32> to vector<8x8x1xf32>
    %49 = vector.broadcast %48 : vector<8x8x1xf32> to vector<8x8x8xf32>
    %50 = arith.subf %46, %49 : vector<8x8x8xf32>
    %51 = math.exp %50 : vector<8x8x8xf32>
    %cst_17 = arith.constant dense<0.000000e+00> : vector<8x8xf32>
    %52 = vector.multi_reduction <add>, %51, %cst_17 [2] : vector<8x8x8xf32> to vector<8x8xf32>
    %53 = vector.shape_cast %52 : vector<8x8xf32> to vector<8x8x1xf32>
    %54 = tpu.reciprocal %53 {approx = true} : vector<8x8x1xf32> -> vector<8x8x1xf32>
    %55 = vector.broadcast %54 : vector<8x8x1xf32> to vector<8x8x8xf32>
    %56 = arith.mulf %51, %55 : vector<8x8x8xf32>
    %57 = arith.truncf %56 : vector<8x8x8xf32> to vector<8x8x8xbf16>
    "tpu.trace_start"() <{level = 10 : i32, message = "bqk,bkd->bqd"}> : () -> ()
    %cst_18 = arith.constant dense<0.000000e+00> : vector<8x8x8xf32>
    %58 = tpu.matmul %57, %43, %cst_18 {dimension_numbers = #tpu.dot_dimension_numbers<[2], [1], [1], [2], [0, 0, 0, 1, 1, 2], [0], [0]>} : vector<8x8x8xbf16>, vector<8x8x8xbf16>, vector<8x8x8xf32> -> vector<8x8x8xf32>
    "tpu.trace_stop"() : () -> ()
    %59 = vector.shape_cast %58 : vector<8x8x8xf32> to vector<64x8xf32>
    %60 = vector.extract_strided_slice %15 {offsets = [0, 0, 16], sizes = [8, 8, 8], strides = [1, 1, 1]} : vector<8x8x96xf32> to vector<8x8x8xf32>
    %61 = arith.truncf %60 : vector<8x8x8xf32> to vector<8x8x8xbf16>
    %62 = vector.extract_strided_slice %15 {offsets = [0, 0, 48], sizes = [8, 8, 8], strides = [1, 1, 1]} : vector<8x8x96xf32> to vector<8x8x8xf32>
    %63 = arith.truncf %62 : vector<8x8x8xf32> to vector<8x8x8xbf16>
    %64 = vector.extract_strided_slice %15 {offsets = [0, 0, 80], sizes = [8, 8, 8], strides = [1, 1, 1]} : vector<8x8x96xf32> to vector<8x8x8xf32>
    %65 = arith.truncf %64 : vector<8x8x8xf32> to vector<8x8x8xbf16>
    "tpu.trace_start"() <{level = 10 : i32, message = "bqd,bkd->bqk"}> : () -> ()
    %cst_19 = arith.constant dense<0.000000e+00> : vector<8x8x8xf32>
    %66 = tpu.matmul %61, %63, %cst_19 {dimension_numbers = #tpu.dot_dimension_numbers<[2], [2], [1], [1], [0, 0, 0, 1, 1, 1], [0], [0]>} : vector<8x8x8xbf16>, vector<8x8x8xbf16>, vector<8x8x8xf32> -> vector<8x8x8xf32>
    "tpu.trace_stop"() : () -> ()
    %cst_20 = arith.constant 0.353553385 : f32
    %67 = vector.broadcast %cst_20 : f32 to vector<8x8x8xf32>
    %68 = arith.mulf %66, %67 : vector<8x8x8xf32>
    %cst_21 = arith.constant dense<0xFF800000> : vector<8x8xf32>
    %69 = vector.multi_reduction <maximumf>, %68, %cst_21 [2] : vector<8x8x8xf32> to vector<8x8xf32>
    %70 = vector.shape_cast %69 : vector<8x8xf32> to vector<8x8x1xf32>
    %71 = vector.broadcast %70 : vector<8x8x1xf32> to vector<8x8x8xf32>
    %72 = arith.subf %68, %71 : vector<8x8x8xf32>
    %73 = math.exp %72 : vector<8x8x8xf32>
    %cst_22 = arith.constant dense<0.000000e+00> : vector<8x8xf32>
    %74 = vector.multi_reduction <add>, %73, %cst_22 [2] : vector<8x8x8xf32> to vector<8x8xf32>
    %75 = vector.shape_cast %74 : vector<8x8xf32> to vector<8x8x1xf32>
    %76 = tpu.reciprocal %75 {approx = true} : vector<8x8x1xf32> -> vector<8x8x1xf32>
    %77 = vector.broadcast %76 : vector<8x8x1xf32> to vector<8x8x8xf32>
    %78 = arith.mulf %73, %77 : vector<8x8x8xf32>
    %79 = arith.truncf %78 : vector<8x8x8xf32> to vector<8x8x8xbf16>
    "tpu.trace_start"() <{level = 10 : i32, message = "bqk,bkd->bqd"}> : () -> ()
    %cst_23 = arith.constant dense<0.000000e+00> : vector<8x8x8xf32>
    %80 = tpu.matmul %79, %65, %cst_23 {dimension_numbers = #tpu.dot_dimension_numbers<[2], [1], [1], [2], [0, 0, 0, 1, 1, 2], [0], [0]>} : vector<8x8x8xbf16>, vector<8x8x8xbf16>, vector<8x8x8xf32> -> vector<8x8x8xf32>
    "tpu.trace_stop"() : () -> ()
    %81 = vector.shape_cast %80 : vector<8x8x8xf32> to vector<64x8xf32>
    %82 = vector.extract_strided_slice %15 {offsets = [0, 0, 24], sizes = [8, 8, 8], strides = [1, 1, 1]} : vector<8x8x96xf32> to vector<8x8x8xf32>
    %83 = arith.truncf %82 : vector<8x8x8xf32> to vector<8x8x8xbf16>
    %84 = vector.extract_strided_slice %15 {offsets = [0, 0, 56], sizes = [8, 8, 8], strides = [1, 1, 1]} : vector<8x8x96xf32> to vector<8x8x8xf32>
    %85 = arith.truncf %84 : vector<8x8x8xf32> to vector<8x8x8xbf16>
    %86 = vector.extract_strided_slice %15 {offsets = [0, 0, 88], sizes = [8, 8, 8], strides = [1, 1, 1]} : vector<8x8x96xf32> to vector<8x8x8xf32>
    %87 = arith.truncf %86 : vector<8x8x8xf32> to vector<8x8x8xbf16>
    "tpu.trace_start"() <{level = 10 : i32, message = "bqd,bkd->bqk"}> : () -> ()
    %cst_24 = arith.constant dense<0.000000e+00> : vector<8x8x8xf32>
    %88 = tpu.matmul %83, %85, %cst_24 {dimension_numbers = #tpu.dot_dimension_numbers<[2], [2], [1], [1], [0, 0, 0, 1, 1, 1], [0], [0]>} : vector<8x8x8xbf16>, vector<8x8x8xbf16>, vector<8x8x8xf32> -> vector<8x8x8xf32>
    "tpu.trace_stop"() : () -> ()
    %cst_25 = arith.constant 0.353553385 : f32
    %89 = vector.broadcast %cst_25 : f32 to vector<8x8x8xf32>
    %90 = arith.mulf %88, %89 : vector<8x8x8xf32>
    %cst_26 = arith.constant dense<0xFF800000> : vector<8x8xf32>
    %91 = vector.multi_reduction <maximumf>, %90, %cst_26 [2] : vector<8x8x8xf32> to vector<8x8xf32>
    %92 = vector.shape_cast %91 : vector<8x8xf32> to vector<8x8x1xf32>
    %93 = vector.broadcast %92 : vector<8x8x1xf32> to vector<8x8x8xf32>
    %94 = arith.subf %90, %93 : vector<8x8x8xf32>
    %95 = math.exp %94 : vector<8x8x8xf32>
    %cst_27 = arith.constant dense<0.000000e+00> : vector<8x8xf32>
    %96 = vector.multi_reduction <add>, %95, %cst_27 [2] : vector<8x8x8xf32> to vector<8x8xf32>
    %97 = vector.shape_cast %96 : vector<8x8xf32> to vector<8x8x1xf32>
    %98 = tpu.reciprocal %97 {approx = true} : vector<8x8x1xf32> -> vector<8x8x1xf32>
    %99 = vector.broadcast %98 : vector<8x8x1xf32> to vector<8x8x8xf32>
    %100 = arith.mulf %95, %99 : vector<8x8x8xf32>
    %101 = arith.truncf %100 : vector<8x8x8xf32> to vector<8x8x8xbf16>
    "tpu.trace_start"() <{level = 10 : i32, message = "bqk,bkd->bqd"}> : () -> ()
    %cst_28 = arith.constant dense<0.000000e+00> : vector<8x8x8xf32>
    %102 = tpu.matmul %101, %87, %cst_28 {dimension_numbers = #tpu.dot_dimension_numbers<[2], [1], [1], [2], [0, 0, 0, 1, 1, 2], [0], [0]>} : vector<8x8x8xbf16>, vector<8x8x8xbf16>, vector<8x8x8xf32> -> vector<8x8x8xf32>
    "tpu.trace_stop"() : () -> ()
    %103 = vector.shape_cast %102 : vector<8x8x8xf32> to vector<64x8xf32>
    %104 = tpu.concatenate %37, %59, %81, %103 in 1 : vector<64x8xf32>, vector<64x8xf32>, vector<64x8xf32>, vector<64x8xf32> -> vector<64x32xf32>
    %105 = arith.truncf %104 : vector<64x32xf32> to vector<64x32xbf16>
    %c0_29 = arith.constant 0 : index
    %c0_30 = arith.constant 0 : index
    %106 = vector.load %arg6[%c0_29, %c0_30] : memref<32x32xbf16, #tpu.memory_space<vmem>>, vector<32x32xbf16>
    %cst_31 = arith.constant dense<0.000000e+00> : vector<64x32xf32>
    %107 = tpu.matmul %105, %106, %cst_31 {dimension_numbers = #tpu.dot_dimension_numbers<[1], [0], [0], [1], [0, 0, 1, 1], [], []>} : vector<64x32xbf16>, vector<32x32xbf16>, vector<64x32xf32> -> vector<64x32xf32>
    %c0_32 = arith.constant 0 : index
    %c0_33 = arith.constant 0 : index
    %108 = vector.load %arg7[%c0_32, %c0_33] : memref<1x32xf32, #tpu.memory_space<vmem>>, vector<1x32xf32>
    %109 = vector.broadcast %108 : vector<1x32xf32> to vector<64x32xf32>
    %110 = arith.addf %107, %109 : vector<64x32xf32>
    %111 = arith.addf %8, %110 : vector<64x32xf32>
    %c0_34 = arith.constant 0 : index
    %c0_35 = arith.constant 0 : index
    %112 = vector.load %arg8[%c0_34, %c0_35] : memref<1x32xf32, #tpu.memory_space<vmem>>, vector<1x32xf32>
    %c0_36 = arith.constant 0 : index
    %c0_37 = arith.constant 0 : index
    %113 = vector.load %arg9[%c0_36, %c0_37] : memref<1x32xf32, #tpu.memory_space<vmem>>, vector<1x32xf32>
    %cst_38 = arith.constant dense<0.000000e+00> : vector<64xf32>
    %114 = vector.multi_reduction <add>, %111, %cst_38 [1] : vector<64x32xf32> to vector<64xf32>
    %115 = vector.shape_cast %114 : vector<64xf32> to vector<64x1xf32>
    %cst_39 = arith.constant 3.200000e+01 : f32
    %116 = vector.broadcast %cst_39 : f32 to vector<64x1xf32>
    %117 = arith.divf %115, %116 : vector<64x1xf32>
    %118 = vector.broadcast %117 : vector<64x1xf32> to vector<64x32xf32>
    %119 = arith.subf %111, %118 : vector<64x32xf32>
    %120 = arith.mulf %119, %119 : vector<64x32xf32>
    %cst_40 = arith.constant dense<0.000000e+00> : vector<64xf32>
    %121 = vector.multi_reduction <add>, %120, %cst_40 [1] : vector<64x32xf32> to vector<64xf32>
    %122 = vector.shape_cast %121 : vector<64xf32> to vector<64x1xf32>
    %cst_41 = arith.constant 3.200000e+01 : f32
    %123 = vector.broadcast %cst_41 : f32 to vector<64x1xf32>
    %124 = arith.divf %122, %123 : vector<64x1xf32>
    %125 = vector.broadcast %117 : vector<64x1xf32> to vector<64x32xf32>
    %126 = arith.subf %111, %125 : vector<64x32xf32>
    %cst_42 = arith.constant 9.99999974E-6 : f32
    %127 = vector.broadcast %cst_42 : f32 to vector<64x1xf32>
    %128 = arith.addf %124, %127 : vector<64x1xf32>
    %129 = math.rsqrt %128 : vector<64x1xf32>
    %130 = vector.broadcast %129 : vector<64x1xf32> to vector<64x32xf32>
    %131 = arith.mulf %126, %130 : vector<64x32xf32>
    %132 = vector.broadcast %112 : vector<1x32xf32> to vector<64x32xf32>
    %133 = arith.mulf %131, %132 : vector<64x32xf32>
    %134 = vector.broadcast %113 : vector<1x32xf32> to vector<64x32xf32>
    %135 = arith.addf %133, %134 : vector<64x32xf32>
    %136 = arith.truncf %135 : vector<64x32xf32> to vector<64x32xbf16>
    %c0_43 = arith.constant 0 : index
    %c0_44 = arith.constant 0 : index
    %137 = vector.load %arg10[%c0_43, %c0_44] : memref<32x2048xbf16, #tpu.memory_space<vmem>>, vector<32x2048xbf16>
    %cst_45 = arith.constant dense<0.000000e+00> : vector<64x2048xf32>
    %138 = tpu.matmul %136, %137, %cst_45 {dimension_numbers = #tpu.dot_dimension_numbers<[1], [0], [0], [1], [0, 0, 1, 1], [], []>} : vector<64x32xbf16>, vector<32x2048xbf16>, vector<64x2048xf32> -> vector<64x2048xf32>
    %c0_46 = arith.constant 0 : index
    %c0_47 = arith.constant 0 : index
    %139 = vector.load %arg11[%c0_46, %c0_47] : memref<1x2048xf32, #tpu.memory_space<vmem>>, vector<1x2048xf32>
    %140 = vector.broadcast %139 : vector<1x2048xf32> to vector<64x2048xf32>
    %141 = arith.addf %138, %140 : vector<64x2048xf32>
    %cst_48 = arith.constant 0.000000e+00 : f32
    %142 = vector.broadcast %cst_48 : f32 to vector<64x2048xf32>
    %143 = arith.maximumf %141, %142 : vector<64x2048xf32>
    %144 = arith.truncf %143 : vector<64x2048xf32> to vector<64x2048xbf16>
    %c0_49 = arith.constant 0 : index
    %c0_50 = arith.constant 0 : index
    %145 = vector.load %arg12[%c0_49, %c0_50] : memref<2048x32xbf16, #tpu.memory_space<vmem>>, vector<2048x32xbf16>
    %cst_51 = arith.constant dense<0.000000e+00> : vector<64x32xf32>
    %146 = tpu.matmul %144, %145, %cst_51 {dimension_numbers = #tpu.dot_dimension_numbers<[1], [0], [0], [1], [0, 0, 1, 1], [], []>} : vector<64x2048xbf16>, vector<2048x32xbf16>, vector<64x32xf32> -> vector<64x32xf32>
    %c0_52 = arith.constant 0 : index
    %c0_53 = arith.constant 0 : index
    %147 = vector.load %arg13[%c0_52, %c0_53] : memref<1x32xf32, #tpu.memory_space<vmem>>, vector<1x32xf32>
    %148 = vector.broadcast %147 : vector<1x32xf32> to vector<64x32xf32>
    %149 = arith.addf %146, %148 : vector<64x32xf32>
    %150 = arith.addf %135, %149 : vector<64x32xf32>
    %c0_54 = arith.constant 0 : index
    %c0_55 = arith.constant 0 : index
    %151 = vector.load %arg14[%c0_54, %c0_55] : memref<1x32xf32, #tpu.memory_space<vmem>>, vector<1x32xf32>
    %c0_56 = arith.constant 0 : index
    %c0_57 = arith.constant 0 : index
    %152 = vector.load %arg15[%c0_56, %c0_57] : memref<1x32xf32, #tpu.memory_space<vmem>>, vector<1x32xf32>
    %cst_58 = arith.constant dense<0.000000e+00> : vector<64xf32>
    %153 = vector.multi_reduction <add>, %150, %cst_58 [1] : vector<64x32xf32> to vector<64xf32>
    %154 = vector.shape_cast %153 : vector<64xf32> to vector<64x1xf32>
    %cst_59 = arith.constant 3.200000e+01 : f32
    %155 = vector.broadcast %cst_59 : f32 to vector<64x1xf32>
    %156 = arith.divf %154, %155 : vector<64x1xf32>
    %157 = vector.broadcast %156 : vector<64x1xf32> to vector<64x32xf32>
    %158 = arith.subf %150, %157 : vector<64x32xf32>
    %159 = arith.mulf %158, %158 : vector<64x32xf32>
    %cst_60 = arith.constant dense<0.000000e+00> : vector<64xf32>
    %160 = vector.multi_reduction <add>, %159, %cst_60 [1] : vector<64x32xf32> to vector<64xf32>
    %161 = vector.shape_cast %160 : vector<64xf32> to vector<64x1xf32>
    %cst_61 = arith.constant 3.200000e+01 : f32
    %162 = vector.broadcast %cst_61 : f32 to vector<64x1xf32>
    %163 = arith.divf %161, %162 : vector<64x1xf32>
    %164 = vector.broadcast %156 : vector<64x1xf32> to vector<64x32xf32>
    %165 = arith.subf %150, %164 : vector<64x32xf32>
    %cst_62 = arith.constant 9.99999974E-6 : f32
    %166 = vector.broadcast %cst_62 : f32 to vector<64x1xf32>
    %167 = arith.addf %163, %166 : vector<64x1xf32>
    %168 = math.rsqrt %167 : vector<64x1xf32>
    %169 = vector.broadcast %168 : vector<64x1xf32> to vector<64x32xf32>
    %170 = arith.mulf %165, %169 : vector<64x32xf32>
    %171 = vector.broadcast %151 : vector<1x32xf32> to vector<64x32xf32>
    %172 = arith.mulf %170, %171 : vector<64x32xf32>
    %173 = vector.broadcast %152 : vector<1x32xf32> to vector<64x32xf32>
    %174 = arith.addf %172, %173 : vector<64x32xf32>
    %175 = vector.shape_cast %174 : vector<64x32xf32> to vector<8x8x32xf32>
    %176 = vector.extract_strided_slice %175 {offsets = [0, 7, 0], sizes = [8, 1, 32], strides = [1, 1, 1]} : vector<8x8x32xf32> to vector<8x1x32xf32>
    %177 = vector.shape_cast %176 : vector<8x1x32xf32> to vector<8x32xf32>
    %c0_63 = arith.constant 0 : index
    %c0_64 = arith.constant 0 : index
    %178 = vector.load %arg16[%c0_63, %c0_64] : memref<32x2xf32, #tpu.memory_space<vmem>>, vector<32x2xf32>
    %cst_65 = arith.constant dense<0.000000e+00> : vector<8x2xf32>
    %179 = tpu.matmul %177, %178, %cst_65 {dimension_numbers = #tpu.dot_dimension_numbers<[1], [0], [0], [1], [0, 0, 1, 1], [], []>} : vector<8x32xf32>, vector<32x2xf32>, vector<8x2xf32> -> vector<8x2xf32>
    %c0_66 = arith.constant 0 : index
    %c0_67 = arith.constant 0 : index
    %180 = vector.load %arg17[%c0_66, %c0_67] : memref<1x2xf32, #tpu.memory_space<vmem>>, vector<1x2xf32>
    %181 = vector.broadcast %180 : vector<1x2xf32> to vector<8x2xf32>
    %182 = arith.addf %179, %181 : vector<8x2xf32>
    %c0_68 = arith.constant 0 : index
    %c0_69 = arith.constant 0 : index
    %183 = vector.load %arg18[%c0_68, %c0_69] : memref<8x2xf32, #tpu.memory_space<vmem>>, vector<8x2xf32>
    tpu.vector_store %arg18[%c0_68, %c0_69], %182 {strides = array<i32>} : memref<8x2xf32, #tpu.memory_space<vmem>>, vector<8x2xf32>,
    return
  }
  func.func @transform_0(%arg0: i32) -> (i32, i32) {
    %c0_i32 = arith.constant 0 : i32
    %c0_i32_0 = arith.constant 0 : i32
    return %arg0, %c0_i32 : i32, i32
  }
  func.func @transform_1(%arg0: i32) -> (i32, i32) {
    %c0_i32 = arith.constant 0 : i32
    %c0_i32_0 = arith.constant 0 : i32
    %c0_i32_1 = arith.constant 0 : i32
    return %c0_i32, %c0_i32_0 : i32, i32
  }
  func.func @transform_2(%arg0: i32) -> (i32, i32) {
    %c0_i32 = arith.constant 0 : i32
    %c0_i32_0 = arith.constant 0 : i32
    %c0_i32_1 = arith.constant 0 : i32
    return %c0_i32, %c0_i32_0 : i32, i32
  }
  func.func @transform_3(%arg0: i32) -> (i32, i32) {
    %c0_i32 = arith.constant 0 : i32
    %c0_i32_0 = arith.constant 0 : i32
    %c0_i32_1 = arith.constant 0 : i32
    return %c0_i32, %c0_i32_0 : i32, i32
  }
  func.func @transform_4(%arg0: i32) -> (i32, i32) {
    %c0_i32 = arith.constant 0 : i32
    %c0_i32_0 = arith.constant 0 : i32
    %c0_i32_1 = arith.constant 0 : i32
    return %c0_i32, %c0_i32_0 : i32, i32
  }
  func.func @transform_5(%arg0: i32) -> (i32, i32) {
    %c0_i32 = arith.constant 0 : i32
    %c0_i32_0 = arith.constant 0 : i32
    %c0_i32_1 = arith.constant 0 : i32
    return %c0_i32, %c0_i32_0 : i32, i32
  }
  func.func @transform_6(%arg0: i32) -> (i32, i32) {
    %c0_i32 = arith.constant 0 : i32
    %c0_i32_0 = arith.constant 0 : i32
    %c0_i32_1 = arith.constant 0 : i32
    return %c0_i32, %c0_i32_0 : i32, i32
  }
  func.func @transform_7(%arg0: i32) -> (i32, i32) {
    %c0_i32 = arith.constant 0 : i32
    %c0_i32_0 = arith.constant 0 : i32
    %c0_i32_1 = arith.constant 0 : i32
    return %c0_i32, %c0_i32_0 : i32, i32
  }
  func.func @transform_8(%arg0: i32) -> (i32, i32) {
    %c0_i32 = arith.constant 0 : i32
    %c0_i32_0 = arith.constant 0 : i32
    %c0_i32_1 = arith.constant 0 : i32
    return %c0_i32, %c0_i32_0 : i32, i32
  }
  func.func @transform_9(%arg0: i32) -> (i32, i32) {
    %c0_i32 = arith.constant 0 : i32
    %c0_i32_0 = arith.constant 0 : i32
    %c0_i32_1 = arith.constant 0 : i32
    return %c0_i32, %c0_i32_0 : i32, i32
  }
  func.func @transform_10(%arg0: i32) -> (i32, i32) {
    %c0_i32 = arith.constant 0 : i32
    %c0_i32_0 = arith.constant 0 : i32
    %c0_i32_1 = arith.constant 0 : i32
    return %c0_i32, %c0_i32_0 : i32, i32
  }
  func.func @transform_11(%arg0: i32) -> (i32, i32) {
    %c0_i32 = arith.constant 0 : i32
    %c0_i32_0 = arith.constant 0 : i32
    %c0_i32_1 = arith.constant 0 : i32
    return %c0_i32, %c0_i32_0 : i32, i32
  }
  func.func @transform_12(%arg0: i32) -> (i32, i32) {
    %c0_i32 = arith.constant 0 : i32
    %c0_i32_0 = arith.constant 0 : i32
    %c0_i32_1 = arith.constant 0 : i32
    return %c0_i32, %c0_i32_0 : i32, i32
  }
  func.func @transform_13(%arg0: i32) -> (i32, i32) {
    %c0_i32 = arith.constant 0 : i32
    %c0_i32_0 = arith.constant 0 : i32
    %c0_i32_1 = arith.constant 0 : i32
    return %c0_i32, %c0_i32_0 : i32, i32
  }
  func.func @transform_14(%arg0: i32) -> (i32, i32) {
    %c0_i32 = arith.constant 0 : i32
    %c0_i32_0 = arith.constant 0 : i32
    %c0_i32_1 = arith.constant 0 : i32
    return %c0_i32, %c0_i32_0 : i32, i32
  }
  func.func @transform_15(%arg0: i32) -> (i32, i32) {
    %c0_i32 = arith.constant 0 : i32
    %c0_i32_0 = arith.constant 0 : i32
    %c0_i32_1 = arith.constant 0 : i32
    return %c0_i32, %c0_i32_0 : i32, i32
  }
  func.func @transform_16(%arg0: i32) -> (i32, i32) {
    %c0_i32 = arith.constant 0 : i32
    %c0_i32_0 = arith.constant 0 : i32
    %c0_i32_1 = arith.constant 0 : i32
    return %c0_i32, %c0_i32_0 : i32, i32
  }
  func.func @transform_17(%arg0: i32) -> (i32, i32) {
    %c0_i32 = arith.constant 0 : i32
    %c0_i32_0 = arith.constant 0 : i32
    return %arg0, %c0_i32 : i32, i32
  }
}

</mosaic_0001>

<bundles_post_ra>
// kernel: tpu_custom_call.1
= control target key start
LH: loop header
LB: loop body
LE: loop exit
PB: predicated region body
PF: predicated region fallthrough
CT: control target
= control target key end

     0   :  { %v10760_v0 = vmov 0   ;;  %vm162_vm0 = vcmask 261120   ;;  %v8588_v41 = vmov 0.0   ;;  %vm8589_vm1 = vmmov 0   ;;  %s8592_s21 = smov 88   ;;  %s8593_s22 = smov 120   ;;  %s10740_s0 = inlined_call_operand.vmem [shape: f32[64,1], index: 0, kind: input, shape index: {}]   ;;  %s10741_s3 = inlined_call_operand.vmem [shape: bf16[32,96], index: 3, kind: input, shape index: {}]   ;;  %s10742_s1 = inlined_call_operand.vmem [shape: f32[1,32], index: 1, kind: input, shape index: {}]   ;;  %s10743_s2 = inlined_call_operand.vmem [shape: f32[1,32], index: 2, kind: input, shape index: {}]   ;;  %s10744_s4 = inlined_call_operand.vmem [shape: f32[1,96], index: 4, kind: input, shape index: {}]   ;;  %s10745_s5 = inlined_call_operand.vmem [shape: bf16[32,32], index: 5, kind: input, shape index: {}]   ;;  %s10746_s6 = inlined_call_operand.vmem [shape: f32[1,32], index: 6, kind: input, shape index: {}]   ;;  %s10747_s9 = inlined_call_operand.vmem [shape: bf16[32,2048], index: 9, kind: input, shape index: {}]   ;;  %s10748_s7 = inlined_call_operand.vmem [shape: f32[1,32], index: 7, kind: input, shape index: {}]   ;;  %s10749_s8 = inlined_call_operand.vmem [shape: f32[1,32], index: 8, kind: input, shape index: {}]   ;;  %s10750_s11 = inlined_call_operand.vmem [shape: bf16[2048,32], index: 11, kind: input, shape index: {}]   ;;  %s10751_s10 = inlined_call_operand.vmem [shape: f32[1,2048], index: 10, kind: input, shape index: {}]   ;;  %s10752_s12 = inlined_call_operand.vmem [shape: f32[1,32], index: 12, kind: input, shape index: {}]   ;;  %s10753_s15 = inlined_call_operand.vmem [shape: f32[32,2], index: 15, kind: input, shape index: {}]   ;;  %s10754_s13 = inlined_call_operand.vmem [shape: f32[1,32], index: 13, kind: input, shape index: {}]   ;;  %s10755_s14 = inlined_call_operand.vmem [shape: f32[1,32], index: 14, kind: input, shape index: {}]   ;;  %s10756_s16 = inlined_call_operand.vmem [shape: f32[1,2], index: 16, kind: input, shape index: {}]   ;;  %s10757_s17 = inlined_call_operand.vmem [shape: f32[8,2], index: 17, kind: output, shape index: {}]  }
   0x1   :  { %10762 = sst [smem:[#allocation2_spill]] %s10740_s0  ;;  %8234 = vset.pattern.permute.xlu1 %v10760_v0  ;;  %8233 = vset.pattern.permute.xlu0 %v10760_v0  ;;  %v7043_v11 = vld [vmem:[%s10742_s1] ss:$0 sm:$0xff]  ;;  %vm251_vm2 = vcmask 64512   ;;  %vm750_vm3 = vcmask 1043456   ;;  %s8594_s23 = smov 56  }
   0x2   :  { %10763 = sst [smem:[#allocation3_spill]] %s10741_s3  ;;  %s10764_s26 = sld [smem:[#allocation2_spill]]  ;;  %v7042_v16 = vld [vmem:[%s10743_s2] ss:$0 sm:$0xff]  ;;  %vm3898_vm4 = vcmask 130048   ;;  %vm3907_vm5 = vcmask 195584  }
   0x3   :  { %s10765_s20 = sld [smem:[#allocation3_spill]]  ;;  %v7044_v42 = vld [vmem:[%s10744_s4] ss:$0 sm:$0xff]  ;;  %s8590_s4 = smov 96   ;;  %vm6945_vm6 = vcmask 1041409   ;;  %vm6948_vm7 = vcmask 1042434  }
   0x4   :  { %s8595_s24 = smov 80   ;;  %s8596_s25 = smov 112   ;;  %vm6951_vm8 = vcmask 1043459   ;;  %vm6954_vm9 = vcmask 1044484   ;;  %vm6957_vm10 = vcmask 1045509   ;;  %vm6960_vm11 = vcmask 1046534  }
   0x5   :  { %s8597_s27 = smov 48   ;;  %s8598_s28 = smov 72   ;;  %vm6962_vm12 = vcmask 1047559   ;;  %vm7036_vm13 = vcmask 15360  }
   0x6   :  { %s8599_s29 = smov 104   ;;  %s8600_s0 = smov 40  }
   0x7   :  { %s8601_s30 = smov 8   ;;  %s8602_s18 = smov 16  }
   0x8   :  { %v59_v1 = vld [vmem:[%s10764_s26 + $0x10] sm:$0xff]  ;;  %v57_v2 = vld [vmem:[%s10764_s26] sm:$0xff]  ;;  %v60_v3 = vld [vmem:[%s10764_s26 + $0x18] sm:$0xff]  ;;  %s8603_s2 = smov 24  }
   0x9   :  { %85 = vperm.xlu1 %8234, %v59_v1   ;;  %75 = vperm.xlu0 %8233, %v57_v2   ;;  %v58_v4 = vld [vmem:[%s10764_s26 + $0x8] sm:$0xff]  ;;  %v8295_v5 = vld [vmem:[%s10765_s20] sm:$0xff]   ;;  %v64_v9 = vld [vmem:[%s10764_s26 + $0x38] sm:$0xff] }
   0xa   :  { %v62_v6 = vld [vmem:[%s10764_s26 + $0x28] sm:$0xff]  ;;  %v61_v7 = vld [vmem:[%s10764_s26 + $0x20] sm:$0xff]  ;;  %7786 = vmatprep.subr.bf16.mxu0 %v8295_v5  ;;  %8211 = vmatprep.subr.bf16.mxu1 %v8295_v5  ;;  %v63_v10 = vld [vmem:[%s10764_s26 + $0x30] sm:$0xff]  ;;  %s8591_s26 = smov 64  }
   0xb   :  { %v8296_v8 = vld [vmem:[%s10765_s20 + $0x8] sm:$0xff]   ;;  %7787 = vmatpush3.bf16.msra.mxu0 %v8295_v5  ;;  %8213 = vmatpush3.bf16.msra.mxu1 %v8295_v5 }
   0xc   :  { %7788 = vmatprep.subr.bf16.mxu0 %v8296_v8  ;;  %8212 = vmatprep.subr.bf16.mxu1 %v8296_v8 }
   0xd   :  { %90 = vperm.xlu1 %8234, %v60_v3   ;;  %80 = vperm.xlu0 %8233, %v58_v4  }
   0xf   :  { %7789 = vmatpush3.bf16.msra.mxu0 %v8296_v8  ;;  %8214 = vmatpush3.bf16.msra.mxu1 %v8296_v8 }
  0x10   :  { %7798 = vmatprep.subr.bf16.mxu1 %v8588_v41  ;;  %7810 = vmatprep.subr.bf16.mxu0 %v8588_v41 }
  0x11   :  { %100 = vperm.xlu1 %8234, %v62_v6   ;;  %95 = vperm.xlu0 %8233, %v61_v7  }
  0x15   :  { %110 = vperm.xlu1 %8234, %v64_v9   ;;  %105 = vperm.xlu0 %8233, %v63_v10  }
  0x88   :  { %v86_v12 = vpop.permute.xlu1 %85  ;;  %v76_v13 = vpop.permute.xlu0 %75 }
  0x89   :  { %v121_v14 = vmul.f32 %v7043_v11, %v86_v12  ;;  %v119_v15 = vmul.f32 %v7043_v11, %v76_v13 }
  0x8b   :  { %v8733_v21 = vadd.f32 %v7042_v16, %v121_v14  ;;  %v8737_v23 = vadd.f32 %v7042_v16, %v119_v15 }
  0x8c   :  { %v91_v17 = vpop.permute.xlu1 %90  ;;  %v81_v18 = vpop.permute.xlu0 %80 }
  0x8d   :  { %v122_v19 = vmul.f32 %v7043_v11, %v91_v17  ;;  %v120_v20 = vmul.f32 %v7043_v11, %v81_v18 }
  0x8f   :  { %v8735_v22 = vadd.f32 %v7042_v16, %v122_v19  ;;  %v8739_v24 = vadd.f32 %v7042_v16, %v120_v20 }
  0x90   :  { %v101_v25 = vpop.permute.xlu1 %100  ;;  %v96_v26 = vpop.permute.xlu0 %95 }
  0x91   :  { %v136_v27 = vpack.c.bf16 %v8735_v22, %v8733_v21  ;;  %v124_v28 = vmul.f32 %v7043_v11, %v101_v25  ;;  %v123_v29 = vmul.f32 %v7043_v11, %v96_v26  ;;  %v135_v30 = vpack.c.bf16 %v8739_v24, %v8737_v23 }
  0x93   :  { %7790 = vmatprep.mubr.msk.bf16.mxu0 %vm162_vm0, %v135_v30  ;;  %v8746_v31 = vadd.f32 %v7042_v16, %v123_v29  ;;  %v8748_v32 = vadd.f32 %v7042_v16, %v124_v28 }
  0x94   :  { %v111_v33 = vpop.permute.xlu1 %110  ;;  %7791 = vmatmul.mubr.msk.bf16.vlgmr.msra.gmra.mrb[0].mxu0 %vm162_vm0, %v136_v27  ;;  %v106_v34 = vpop.permute.xlu0 %105 }
  0x95   :  { %v126_v35 = vmul.f32 %v7043_v11, %v111_v33  ;;  %v125_v36 = vmul.f32 %v7043_v11, %v106_v34  ;;  %v137_v37 = vpack.c.bf16 %v8748_v32, %v8746_v31  ;;  %7812 = vmatprep.mubr.msk.bf16.mxu0 %vm8589_vm1, %v8588_v41 }
  0x97   :  { %v8753_v38 = vadd.f32 %v7042_v16, %v126_v35  ;;  %v8755_v39 = vadd.f32 %v7042_v16, %v125_v36  ;;  %7794 = vmatprep.mubr.msk.bf16.mxu1 %vm162_vm0, %v137_v37 }
  0x99   :  { %v138_v40 = vpack.c.bf16 %v8753_v38, %v8755_v39 }
  0x9b   :  { %7795 = vmatmul.mubr.msk.bf16.vlgmr.msra.gmra.mrb[0].mxu1 %vm162_vm0, %v138_v40 }
  0x9c   :  { %7800 = vmatprep.mubr.msk.bf16.mxu1 %vm8589_vm1, %v8588_v41 }
 0x167   :  { %v7792_v43 = vpop.f32.mrb[0].mxu0 }
 0x168   :  { %v209_v44 = vpop.f32.mrb[1].mxu0  ;;  %v218_v48 = vadd.f32 %v7792_v43, %v7044_v42 }
 0x169   :  { %v210_v45 = vadd.f32 %v7044_v42, %v209_v44  ;;  %v7793_v46 = vpop.f32.mrb[2].mxu0 }
 0x16a   :  { %v212_v47 = vpop.f32.mrb[3].mxu0  ;;  %v221_v51 = vadd.f32 %v7793_v46, %v7044_v42  ;;  %v8775_v54 = vpack.c.bf16 %v218_v48, %v218_v48 }
 0x16b   :  { %v8770_v49 = vpack.c.bf16 %v210_v45, %v210_v45  ;;  %v213_v50 = vadd.f32 %v7044_v42, %v212_v47 }
 0x16c   :  { %v8778_v58 = vpack.c.bf16 %v221_v51, %v221_v51 }
 0x16d   :  { %v8772_v52 = vpack.c.bf16 %v213_v50, %v213_v50  ;;  %249 = vrot.lane.b32.xlu0 %v8770_v49, %s8590_s4 }
 0x16e   :  { %v7796_v53 = vpop.f32.mrb[0].mxu1 }
 0x16f   :  { %299 = vrot.lane.b32.xlu1 %v8772_v52, %s8590_s4  ;;  %v225_v55 = vpop.f32.mrb[1].mxu1  ;;  %v234_v62 = vadd.f32 %v7796_v53, %v7044_v42 }
 0x170   :  { %v226_v56 = vadd.f32 %v7044_v42, %v225_v55  ;;  %v7797_v57 = vpop.f32.mrb[2].mxu1 }
 0x171   :  { %348 = vrot.lane.b32.xlu0 %v8775_v54, %s8590_s4  ;;  %v228_v59 = vpop.f32.mrb[3].mxu1  ;;  %v237_v1 = vadd.f32 %v7797_v57, %v7044_v42  ;;  %v8787_v2 = vpack.c.bf16 %v234_v62, %v234_v62 }
 0x172   :  { %v8781_v60 = vpack.c.bf16 %v226_v56, %v226_v56  ;;  %v229_v61 = vadd.f32 %v7044_v42, %v228_v59 }
 0x173   :  { %397 = vrot.lane.b32.xlu1 %v8778_v58, %s8590_s4  ;;  %v8790_v3 = vpack.c.bf16 %v237_v1, %v237_v1 }
 0x174   :  { %v8784_v63 = vpack.c.bf16 %v229_v61, %v229_v61 }
 0x175   :  { %446 = vrot.lane.b32.xlu0 %v8781_v60, %s8590_s4 }
 0x177   :  { %495 = vrot.lane.b32.xlu1 %v8784_v63, %s8590_s4 }
 0x179   :  { %544 = vrot.lane.b32.xlu0 %v8787_v2, %s8590_s4 }
 0x17b   :  { %593 = vrot.lane.b32.xlu1 %v8790_v3, %s8590_s4 }
 0x1df   :  { %v250_v4 = vpop.permute.xlu0 %249 }
 0x1e0   :  { %v256_v5 = vsel %vm251_vm2, %v250_v4, 0 }
 0x1e1   :  { %7799 = vmatpush3.bf16.xpose.msra.mxu1 %v256_v5  ;;  %v300_v8 = vpop.permute.xlu1 %299 }
 0x1e2   :  { %7804 = vmatprep.subr.bf16.mxu1 %v8588_v41  ;;  %v305_v9 = vsel %vm251_vm2, %v300_v8, 0 }
 0x1e3   :  { %v349_v6 = vpop.permute.xlu0 %348 }
 0x1e4   :  { %v354_v7 = vsel %vm251_vm2, %v349_v6, 0 }
 0x1e5   :  { %7811 = vmatpush3.bf16.xpose.msra.mxu0 %v354_v7  ;;  %v398_v12 = vpop.permute.xlu1 %397 }
 0x1e6   :  { %7822 = vmatprep.subr.bf16.mxu0 %v8588_v41  ;;  %v403_v13 = vsel %vm251_vm2, %v398_v12, 0 }
 0x1e7   :  { %v447_v10 = vpop.permute.xlu0 %446 }
 0x1e8   :  { %7801 = vmatmul.mubr.msk.bf16.vlgmr.msra.gmra.mrb[4].mxu1 %vm251_vm2, %v8770_v49  ;;  %v452_v11 = vsel %vm251_vm2, %v447_v10, 0 }
 0x1e9   :  { %7805 = vmatpush3.bf16.xpose.msra.mxu1 %v305_v9  ;;  %7806 = vmatprep.mubr.msk.bf16.mxu1 %vm8589_vm1, %v8588_v41  ;;  %v496_v16 = vpop.permute.xlu1 %495 }
 0x1ea   :  { %7816 = vmatprep.subr.bf16.mxu1 %v8588_v41  ;;  %v501_v17 = vsel %vm251_vm2, %v496_v16, 0 }
 0x1eb   :  { %v545_v14 = vpop.permute.xlu0 %544 }
 0x1ec   :  { %7813 = vmatmul.mubr.msk.bf16.vlgmr.msra.gmra.mrb[4].mxu0 %vm251_vm2, %v8775_v54  ;;  %v550_v15 = vsel %vm251_vm2, %v545_v14, 0 }
 0x1ed   :  { %7823 = vmatpush3.bf16.xpose.msra.mxu0 %v452_v11  ;;  %7824 = vmatprep.mubr.msk.bf16.mxu0 %vm8589_vm1, %v8588_v41  ;;  %v594_v18 = vpop.permute.xlu1 %593 }
 0x1ee   :  { %7834 = vmatprep.subr.bf16.mxu0 %v8588_v41  ;;  %v599_v19 = vsel %vm251_vm2, %v594_v18, 0 }
 0x1f0   :  { %7807 = vmatmul.mubr.msk.bf16.vlgmr.msra.gmra.mrb[8].mxu1 %vm251_vm2, %v8772_v52 }
 0x1f1   :  { %7817 = vmatpush3.bf16.xpose.msra.mxu1 %v403_v13  ;;  %7818 = vmatprep.mubr.msk.bf16.mxu1 %vm8589_vm1, %v8588_v41 }
 0x1f2   :  { %7828 = vmatprep.subr.bf16.mxu1 %v8588_v41 }
 0x1f4   :  { %7825 = vmatmul.mubr.msk.bf16.vlgmr.msra.gmra.mrb[8].mxu0 %vm251_vm2, %v8781_v60 }
 0x1f5   :  { %7835 = vmatpush3.bf16.xpose.msra.mxu0 %v550_v15  ;;  %7836 = vmatprep.mubr.msk.bf16.mxu0 %vm8589_vm1, %v8588_v41 }
 0x1f6   :  { %7846 = vmatprep.subr.bf16.mxu0 %v8588_v41 }
 0x1f8   :  { %7819 = vmatmul.mubr.msk.bf16.vlgmr.msra.gmra.mrb[12].mxu1 %vm251_vm2, %v8778_v58 }
 0x1f9   :  { %7829 = vmatpush3.bf16.xpose.msra.mxu1 %v501_v17  ;;  %7830 = vmatprep.mubr.msk.bf16.mxu1 %vm8589_vm1, %v8588_v41 }
 0x1fa   :  { %7840 = vmatprep.subr.bf16.mxu1 %v8588_v41 }
 0x1fc   :  { %7837 = vmatmul.mubr.msk.bf16.vlgmr.msra.gmra.mrb[12].mxu0 %vm251_vm2, %v8787_v2 }
 0x1fd   :  { %7848 = vmatprep.mubr.msk.bf16.mxu0 %vm8589_vm1, %v8588_v41 }
 0x200   :  { %7831 = vmatmul.mubr.msk.bf16.vlgmr.msra.gmra.mrb[16].mxu1 %vm251_vm2, %v8784_v63 }
 0x201   :  { %7841 = vmatpush3.bf16.xpose.msra.mxu1 %v599_v19  ;;  %7842 = vmatprep.mubr.msk.bf16.mxu1 %vm8589_vm1, %v8588_v41 }
 0x202   :  { %7852 = vmatprep.subr.bf16.mxu1 %v8588_v41 }
 0x208   :  { %7843 = vmatmul.mubr.msk.bf16.vlgmr.msra.gmra.mrb[20].mxu1 %vm251_vm2, %v8790_v3 }
 0x209   :  { %7854 = vmatprep.mubr.msk.bf16.mxu1 %vm8589_vm1, %v8588_v41 }
 0x2bb   :  { %v292_v20 = vpop.f32.mrb[4].mxu1 }
 0x2bc   :  { %v7802_v25 = vpop.f32.mrb[5].mxu1  ;;  %v641_v36 = vmul.f32 0.35355338, %v292_v20 }
 0x2bd   :  { %v295_v26 = vpop.f32.mrb[6].mxu1 }
 0x2be   :  { %v7803_v27 = vpop.f32.mrb[7].mxu1  ;;  %v649_v44 = vsel %vm251_vm2, %v641_v36, -inf }
 0x2bf   :  { %v390_v28 = vpop.f32.mrb[4].mxu0 }
 0x2c0   :  { %v7814_v29 = vpop.f32.mrb[5].mxu0  ;;  %v643_v30 = vmul.f32 0.35355338, %v390_v28 }
 0x2c1   :  { %v393_v33 = vpop.f32.mrb[6].mxu0 }
 0x2c2   :  { %v7815_v34 = vpop.f32.mrb[7].mxu0  ;;  %v655_v35 = vsel %vm251_vm2, %v643_v30, -inf }
 0x2c3   :  { %v341_v37 = vpop.f32.mrb[8].mxu1  ;;  %656 = vmax.xlane.f32.xlu0 %v655_v35 }
 0x2c4   :  { %v7808_v40 = vpop.f32.mrb[9].mxu1  ;;  %v642_v53 = vmul.f32 0.35355338, %v341_v37 }
 0x2c5   :  { %v344_v42 = vpop.f32.mrb[10].mxu1 }
 0x2c6   :  { %v7809_v43 = vpop.f32.mrb[11].mxu1  ;;  %v652_v61 = vsel %vm251_vm2, %v642_v53, -inf }
 0x2c7   :  { %650 = vmax.xlane.f32.xlu0 %v649_v44  ;;  %v488_v45 = vpop.f32.mrb[8].mxu0 }
 0x2c8   :  { %v645_v46 = vmul.f32 0.35355338, %v488_v45  ;;  %v7826_v47 = vpop.f32.mrb[9].mxu0 }
 0x2c9   :  { %v491_v48 = vpop.f32.mrb[10].mxu0 }
 0x2ca   :  { %v7827_v50 = vpop.f32.mrb[11].mxu0  ;;  %v661_v51 = vsel %vm251_vm2, %v645_v46, -inf }
 0x2cb   :  { %v439_v55 = vpop.f32.mrb[12].mxu1  ;;  %662 = vmax.xlane.f32.xlu1 %v661_v51 }
 0x2cc   :  { %v7820_v56 = vpop.f32.mrb[13].mxu1  ;;  %v644_v14 = vmul.f32 0.35355338, %v439_v55 }
 0x2cd   :  { %v442_v57 = vpop.f32.mrb[14].mxu1 }
 0x2ce   :  { %v7821_v59 = vpop.f32.mrb[15].mxu1  ;;  %v658_v16 = vsel %vm251_vm2, %v644_v14, -inf }
 0x2cf   :  { %653 = vmax.xlane.f32.xlu1 %v652_v61  ;;  %v586_v62 = vpop.f32.mrb[12].mxu0 }
 0x2d0   :  { %v7838_v1 = vpop.f32.mrb[13].mxu0  ;;  %v647_v17 = vmul.f32 0.35355338, %v586_v62 }
 0x2d1   :  { %v589_v4 = vpop.f32.mrb[14].mxu0 }
 0x2d2   :  { %v7839_v5 = vpop.f32.mrb[15].mxu0  ;;  %v667_v25 = vsel %vm251_vm2, %v647_v17, -inf }
 0x2d3   :  { %v537_v6 = vpop.f32.mrb[16].mxu1 }
 0x2d4   :  { %v7832_v7 = vpop.f32.mrb[17].mxu1  ;;  %v646_v15 = vmul.f32 0.35355338, %v537_v6 }
 0x2d5   :  { %v540_v8 = vpop.f32.mrb[18].mxu1 }
 0x2d6   :  { %v7833_v9 = vpop.f32.mrb[19].mxu1  ;;  %v664_v19 = vsel %vm251_vm2, %v646_v15, -inf }
 0x2db   :  { %v635_v10 = vpop.f32.mrb[20].mxu1 }
 0x2dc   :  { %v7844_v11 = vpop.f32.mrb[21].mxu1  ;;  %v8851_v18 = vmul.f32 0.35355338, %v635_v10 }
 0x2dd   :  { %v638_v12 = vpop.f32.mrb[22].mxu1  ;;  %794 = vrot.lane.b32.xlu0 %v8772_v52, %s8591_s26 }
 0x2de   :  { %v7845_v13 = vpop.f32.mrb[23].mxu1  ;;  %v670_v20 = vsel %vm251_vm2, %v8851_v18, -inf }
 0x2e0   :  { %745 = vrot.lane.b32.xlu1 %v8770_v49, %s8591_s26 }
 0x2fc   :  { %659 = vmax.xlane.f32.xlu0 %v658_v16 }
 0x300   :  { %665 = vmax.xlane.f32.xlu0 %v664_v19 }
 0x304   :  { %671 = vmax.xlane.f32.xlu0 %v670_v20  ;;  %668 = vmax.xlane.f32.xlu1 %v667_v25 }
 0x315   :  { %842 = vrot.lane.b32.xlu1 %v8775_v54, %s8591_s26 }
 0x319   :  { %890 = vrot.lane.b32.xlu1 %v8778_v58, %s8591_s26 }
 0x31a   :  { %938 = vrot.lane.b32.xlu0 %v8781_v60, %s8591_s26 }
 0x31d   :  { %986 = vrot.lane.b32.xlu1 %v8784_v63, %s8591_s26 }
 0x350   :  { %v657_v26 = vpop.xlane.xlu0 %656 }
 0x351   :  { %v675_v27 = vsub.f32 %v643_v30, %v657_v26 }
 0x353   :  { %v685_v28 = vmul.f32 1.442695, %v675_v27 }
 0x354   :  { %v651_v29 = vpop.xlane.xlu0 %650 }
 0x355   :  { %8427 = vpow2.f32 %v685_v28  ;;  %v673_v33 = vsub.f32 %v641_v36, %v651_v29 }
 0x357   :  { %v681_v34 = vmul.f32 1.442695, %v673_v33 }
 0x358   :  { %v663_v35 = vpop.xlane.xlu1 %662  ;;  %v795_v37 = vpop.permute.xlu0 %794 }
 0x359   :  { %8429 = vpow2.f32 %v681_v34  ;;  %v677_v40 = vsub.f32 %v645_v46, %v663_v35  ;;  %v800_v42 = vsel %vm750_vm3, %v795_v37, 0 }
 0x35a   :  { %7853 = vmatpush3.bf16.msra.mxu1 %v800_v42 }
 0x35b   :  { %v689_v43 = vmul.f32 1.442695, %v677_v40  ;;  %7864 = vmatprep.subr.bf16.mxu1 %v8588_v41 }
 0x35c   :  { %v654_v44 = vpop.xlane.xlu1 %653 }
 0x35d   :  { %8431 = vpow2.f32 %v689_v43  ;;  %v674_v45 = vsub.f32 %v642_v53, %v654_v44 }
 0x35f   :  { %v8867_v30 = vpop.eup %8427  ;;  %v683_v47 = vmul.f32 1.442695, %v674_v45 }
 0x360   :  { %v746_v48 = vpop.permute.xlu1 %745  ;;  %v703_v36 = vsel %vm251_vm2, %v8867_v30, 0.0 }
 0x361   :  { %8433 = vpow2.f32 %v683_v47  ;;  %v752_v50 = vsel %vm750_vm3, %v746_v48, 0  ;;  %704 = vadd.xlane.f32.xlu1 %v703_v36 }
 0x362   :  { %7847 = vmatpush3.bf16.msra.mxu0 %v752_v50 }
 0x363   :  { %v8872_v46 = vpop.eup %8429  ;;  %7858 = vmatprep.subr.bf16.mxu0 %v8588_v41 }
 0x364   :  { %v697_v51 = vsel %vm251_vm2, %v8872_v46, 0.0 }
 0x365   :  { %698 = vadd.xlane.f32.xlu1 %v697_v51 }
 0x367   :  { %v8877_v53 = vpop.eup %8431 }
 0x368   :  { %v709_v55 = vsel %vm251_vm2, %v8877_v53, 0.0 }
 0x369   :  { %710 = vadd.xlane.f32.xlu1 %v709_v55 }
 0x36b   :  { %v8881_v56 = vpop.eup %8433 }
 0x36c   :  { %v700_v57 = vsel %vm251_vm2, %v8881_v56, 0.0 }
 0x36d   :  { %701 = vadd.xlane.f32.xlu0 %v700_v57 }
 0x389   :  { %v660_v59 = vpop.xlane.xlu0 %659 }
 0x38a   :  { %v676_v61 = vsub.f32 %v644_v14, %v660_v59 }
 0x38c   :  { %v687_v62 = vmul.f32 1.442695, %v676_v61 }
 0x38d   :  { %v666_v1 = vpop.xlane.xlu0 %665 }
 0x38e   :  { %8435 = vpow2.f32 %v687_v62  ;;  %v678_v4 = vsub.f32 %v646_v15, %v666_v1 }
 0x390   :  { %v691_v5 = vmul.f32 1.442695, %v678_v4 }
 0x391   :  { %v669_v6 = vpop.xlane.xlu1 %668  ;;  %v672_v15 = vpop.xlane.xlu0 %671 }
 0x392   :  { %8437 = vpow2.f32 %v691_v5  ;;  %v679_v7 = vsub.f32 %v647_v17, %v669_v6  ;;  %v680_v16 = vsub.f32 %v8851_v18, %v672_v15 }
 0x394   :  { %v693_v8 = vmul.f32 1.442695, %v679_v7  ;;  %v695_v17 = vmul.f32 1.442695, %v680_v16 }
 0x395   :  { %v843_v20 = vpop.permute.xlu1 %842  ;;  %v939_v29 = vpop.permute.xlu0 %938 }
 0x396   :  { %8439 = vpow2.f32 %v693_v8  ;;  %v848_v43 = vsel %vm750_vm3, %v843_v20, 0 }
 0x397   :  { %8441 = vpow2.f32 %v695_v17 }
 0x398   :  { %v8885_v9 = vpop.eup %8435 }
 0x399   :  { %v706_v10 = vsel %vm251_vm2, %v8885_v9, 0.0  ;;  %v891_v25 = vpop.permute.xlu1 %890 }
 0x39a   :  { %707 = vadd.xlane.f32.xlu0 %v706_v10  ;;  %v896_v51 = vsel %vm750_vm3, %v891_v25, 0 }
 0x39c   :  { %v8889_v11 = vpop.eup %8437 }
 0x39d   :  { %v712_v12 = vsel %vm251_vm2, %v8889_v11, 0.0  ;;  %v987_v26 = vpop.permute.xlu1 %986 }
 0x39e   :  { %713 = vadd.xlane.f32.xlu0 %v712_v12  ;;  %v992_v6 = vsel %vm750_vm3, %v987_v26, 0 }
 0x3a0   :  { %v8893_v13 = vpop.eup %8439 }
 0x3a1   :  { %v715_v14 = vsel %vm251_vm2, %v8893_v13, 0.0  ;;  %v8914_v19 = vpop.eup %8441 }
 0x3a2   :  { %716 = vadd.xlane.f32.xlu1 %v715_v14  ;;  %v718_v18 = vsel %vm251_vm2, %v8914_v19, 0.0 }
 0x3b3   :  { %1082 = vrot.lane.b32.xlu1 %v8790_v3, %s8591_s26 }
 0x3b4   :  { %1034 = vrot.lane.b32.xlu0 %v8787_v2, %s8591_s26 }
 0x3b7   :  { %1182 = vrot.lane.b32.xlu1 %v8772_v52, %s8592_s21 }
 0x3bb   :  { %1180 = vrot.lane.b32.xlu1 %v8772_v52, %s8593_s22 }
 0x3bf   :  { %1282 = vrot.lane.b32.xlu1 %v8778_v58, %s8592_s21 }
 0x3c3   :  { %1280 = vrot.lane.b32.xlu1 %v8778_v58, %s8593_s22 }
 0x3c7   :  { %1382 = vrot.lane.b32.xlu1 %v8784_v63, %s8592_s21 }
 0x3cb   :  { %1380 = vrot.lane.b32.xlu1 %v8784_v63, %s8593_s22 }
 0x3cf   :  { %1482 = vrot.lane.b32.xlu1 %v8790_v3, %s8592_s21 }
 0x3d3   :  { %1480 = vrot.lane.b32.xlu1 %v8790_v3, %s8593_s22  ;;  %719 = vadd.xlane.f32.xlu0 %v718_v18 }
 0x3d7   :  { %1634 = vrot.lane.b32.xlu1 %v8770_v49, %s8594_s23 }
 0x3db   :  { %1730 = vrot.lane.b32.xlu1 %v8775_v54, %s8594_s23 }
 0x3df   :  { %1778 = vrot.lane.b32.xlu1 %v8778_v58, %s8594_s23 }
 0x3e9   :  { %1132 = vrot.lane.b32.xlu0 %v8770_v49, %s8592_s21 }
 0x3ed   :  { %1130 = vrot.lane.b32.xlu0 %v8770_v49, %s8593_s22 }
 0x3ee   :  { %v705_v27 = vpop.xlane.xlu1 %704 }
 0x3f1   :  { %1232 = vrot.lane.b32.xlu0 %v8775_v54, %s8592_s21 }
 0x3f2   :  { %v699_v28 = vpop.xlane.xlu1 %698 }
 0x3f3   :  { %8443 = vrcp.f32 %v699_v28 }
 0x3f4   :  { %8445 = vrcp.f32 %v705_v27 }
 0x3f5   :  { %1230 = vrot.lane.b32.xlu0 %v8775_v54, %s8593_s22 }
 0x3f6   :  { %v711_v34 = vpop.xlane.xlu1 %710 }
 0x3f9   :  { %1332 = vrot.lane.b32.xlu0 %v8781_v60, %s8592_s21 }
 0x3fa   :  { %v702_v33 = vpop.xlane.xlu0 %701 }
 0x3fb   :  { %8447 = vrcp.f32 %v702_v33 }
 0x3fc   :  { %8449 = vrcp.f32 %v711_v34 }
 0x3fd   :  { %v8444_v35 = vpop.eup %8443  ;;  %1330 = vrot.lane.b32.xlu0 %v8781_v60, %s8593_s22 }
 0x3fe   :  { %v729_v37 = vmul.f32 %v8444_v35, %v8872_v46  ;;  %v8446_v42 = vpop.eup %8445  ;;  %v944_v46 = vsel %vm750_vm3, %v939_v29, 0 }
 0x3ff   :  { %v731_v44 = vmul.f32 %v8446_v42, %v8867_v30 }
 0x400   :  { %v737_v40 = vpack.c.bf16 %v729_v37, %v729_v37 }
 0x401   :  { %1432 = vrot.lane.b32.xlu0 %v8787_v2, %s8592_s21  ;;  %v739_v36 = vpack.c.bf16 %v731_v44, %v731_v44 }
 0x402   :  { %7849 = vmatmul.mubr.msk.bf16.vlgmr.msra.gmra.mrb[16].mxu0 %vm251_vm2, %v737_v40 }
 0x403   :  { %7859 = vmatpush3.bf16.msra.mxu0 %v848_v43  ;;  %7860 = vmatprep.mubr.msk.bf16.mxu0 %vm8589_vm1, %v8588_v41 }
 0x404   :  { %7870 = vmatprep.subr.bf16.mxu0 %v8588_v41 }
 0x405   :  { %v8448_v45 = vpop.eup %8447  ;;  %1430 = vrot.lane.b32.xlu0 %v8787_v2, %s8593_s22 }
 0x406   :  { %v730_v47 = vmul.f32 %v8448_v45, %v8881_v56  ;;  %v8450_v50 = vpop.eup %8449 }
 0x407   :  { %v733_v30 = vmul.f32 %v8450_v50, %v8877_v53 }
 0x408   :  { %v738_v48 = vpack.c.bf16 %v730_v47, %v730_v47 }
 0x409   :  { %1682 = vrot.lane.b32.xlu0 %v8772_v52, %s8594_s23  ;;  %v741_v55 = vpack.c.bf16 %v733_v30, %v733_v30 }
 0x40a   :  { %7855 = vmatmul.mubr.msk.bf16.vlgmr.msra.gmra.mrb[24].mxu1 %vm251_vm2, %v738_v48  ;;  %7861 = vmatmul.mubr.msk.bf16.vlgmr.msra.gmra.mrb[20].mxu0 %vm251_vm2, %v739_v36 }
 0x40b   :  { %7865 = vmatpush3.bf16.msra.mxu1 %v896_v51  ;;  %7871 = vmatpush3.bf16.msra.mxu0 %v944_v46 }
 0x40c   :  { %7872 = vmatprep.mubr.msk.bf16.mxu0 %vm8589_vm1, %v8588_v41  ;;  %7882 = vmatprep.subr.bf16.mxu0 %v8588_v41 }
 0x40d   :  { %7866 = vmatprep.mubr.msk.bf16.mxu1 %vm8589_vm1, %v8588_v41  ;;  %7876 = vmatprep.subr.bf16.mxu1 %v8588_v41 }
 0x412   :  { %7873 = vmatmul.mubr.msk.bf16.vlgmr.msra.gmra.mrb[24].mxu0 %vm251_vm2, %v741_v55 }
 0x413   :  { %7884 = vmatprep.mubr.msk.bf16.mxu0 %vm8589_vm1, %v8588_v41 }
 0x427   :  { %v708_v56 = vpop.xlane.xlu0 %707 }
 0x428   :  { %8451 = vrcp.f32 %v708_v56 }
 0x42b   :  { %v714_v57 = vpop.xlane.xlu0 %713 }
 0x42c   :  { %8453 = vrcp.f32 %v714_v57 }
 0x42f   :  { %v717_v59 = vpop.xlane.xlu1 %716  ;;  %v1035_v61 = vpop.permute.xlu0 %1034 }
 0x430   :  { %8455 = vrcp.f32 %v717_v59  ;;  %v1040_v53 = vsel %vm750_vm3, %v1035_v61, 0 }
 0x431   :  { %7883 = vmatpush3.bf16.msra.mxu0 %v1040_v53 }
 0x432   :  { %v8452_v62 = vpop.eup %8451  ;;  %7894 = vmatprep.subr.bf16.mxu0 %v8588_v41 }
 0x433   :  { %v732_v1 = vmul.f32 %v8452_v62, %v8885_v9  ;;  %v1083_v12 = vpop.permute.xlu1 %1082 }
 0x434   :  { %v1088_v15 = vsel %vm750_vm3, %v1083_v12, 0 }
 0x435   :  { %v740_v4 = vpack.c.bf16 %v732_v1, %v732_v1 }
 0x436   :  { %v8454_v5 = vpop.eup %8453 }
 0x437   :  { %7867 = vmatmul.mubr.msk.bf16.vlgmr.msra.gmra.mrb[28].mxu1 %vm251_vm2, %v740_v4  ;;  %v734_v7 = vmul.f32 %v8454_v5, %v8889_v11  ;;  %v1183_v11 = vpop.permute.xlu1 %1182 }
 0x438   :  { %7877 = vmatpush3.bf16.msra.mxu1 %v992_v6  ;;  %7878 = vmatprep.mubr.msk.bf16.mxu1 %vm8589_vm1, %v8588_v41  ;;  %v1188_v37 = vsel %vm251_vm2, %v1183_v11, 0 }
 0x439   :  { %7888 = vmatprep.subr.bf16.mxu1 %v8588_v41  ;;  %v742_v14 = vpack.c.bf16 %v734_v7, %v734_v7 }
 0x43a   :  { %v8456_v8 = vpop.eup %8455 }
 0x43b   :  { %v735_v10 = vmul.f32 %v8456_v8, %v8893_v13  ;;  %v1181_v13 = vpop.permute.xlu1 %1180 }
 0x43d   :  { %v743_v9 = vpack.c.bf16 %v735_v10, %v735_v10 }
 0x43f   :  { %7879 = vmatmul.mubr.msk.bf16.vlgmr.msra.gmra.mrb[32].mxu1 %vm251_vm2, %v742_v14  ;;  %7885 = vmatmul.mubr.msk.bf16.vlgmr.msra.gmra.mrb[28].mxu0 %vm251_vm2, %v743_v9  ;;  %v1283_v16 = vpop.permute.xlu1 %1282 }
 0x440   :  { %7889 = vmatpush3.bf16.msra.mxu1 %v1088_v15  ;;  %7896 = vmatprep.mubr.msk.bf16.mxu0 %vm8589_vm1, %v8588_v41  ;;  %v1288_v45 = vsel %vm251_vm2, %v1283_v16, 0 }
 0x441   :  { %7890 = vmatprep.mubr.msk.bf16.mxu1 %vm8589_vm1, %v8588_v41  ;;  %7900 = vmatprep.subr.bf16.mxu1 %v8588_v41 }
 0x443   :  { %v1281_v18 = vpop.permute.xlu1 %1280 }
 0x447   :  { %v1383_v27 = vpop.permute.xlu1 %1382 }
 0x448   :  { %v1388_v46 = vsel %vm251_vm2, %v1383_v27, 0 }
 0x44b   :  { %v1381_v40 = vpop.permute.xlu1 %1380 }
 0x44f   :  { %v1483_v44 = vpop.permute.xlu1 %1482 }
 0x450   :  { %v1488_v56 = vsel %vm251_vm2, %v1483_v44, 0 }
 0x453   :  { %v1481_v48 = vpop.permute.xlu1 %1480 }
 0x457   :  { %v1635_v51 = vpop.permute.xlu1 %1634 }
 0x458   :  { %v1640_v55 = vsel %vm750_vm3, %v1635_v51, 0 }
 0x460   :  { %v720_v17 = vpop.xlane.xlu0 %719 }
 0x461   :  { %8457 = vrcp.f32 %v720_v17 }
 0x464   :  { %v1133_v20 = vpop.permute.xlu0 %1132 }
 0x465   :  { %v1138_v25 = vsel %vm251_vm2, %v1133_v20, 0 }
 0x466   :  { %7895 = vmatpush3.bf16.xpose.msra.mxu0 %v1138_v25 }
 0x467   :  { %7906 = vmatprep.subr.bf16.mxu0 %v8588_v41 }
 0x468   :  { %v1131_v26 = vpop.permute.xlu0 %1130 }
 0x46b   :  { %v8458_v28 = vpop.eup %8457 }
 0x46c   :  { %v1233_v29 = vpop.permute.xlu0 %1232  ;;  %v736_v33 = vmul.f32 %v8458_v28, %v8914_v19 }
 0x46d   :  { %v1238_v34 = vsel %vm251_vm2, %v1233_v29, 0  ;;  %7897 = vmatmul.mubr.msk.bf16.vlgmr.msra.gmra.mrb[32].mxu0 %vm251_vm2, %v1131_v26 }
 0x46e   :  { %7907 = vmatpush3.bf16.xpose.msra.mxu0 %v1238_v34  ;;  %v744_v35 = vpack.c.bf16 %v736_v33, %v736_v33  ;;  %7908 = vmatprep.mubr.msk.bf16.mxu0 %vm8589_vm1, %v8588_v41 }
 0x46f   :  { %7918 = vmatprep.subr.bf16.mxu0 %v8588_v41 }
 0x470   :  { %7891 = vmatmul.mubr.msk.bf16.vlgmr.msra.gmra.mrb[36].mxu1 %vm251_vm2, %v744_v35  ;;  %v1231_v42 = vpop.permute.xlu0 %1230 }
 0x471   :  { %7901 = vmatpush3.bf16.xpose.msra.mxu1 %v1188_v37  ;;  %7902 = vmatprep.mubr.msk.bf16.mxu1 %vm8589_vm1, %v8588_v41 }
 0x472   :  { %7912 = vmatprep.subr.bf16.mxu1 %v8588_v41 }
 0x474   :  { %v1333_v19 = vpop.permute.xlu0 %1332 }
 0x475   :  { %v1338_v43 = vsel %vm251_vm2, %v1333_v19, 0  ;;  %7909 = vmatmul.mubr.msk.bf16.vlgmr.msra.gmra.mrb[36].mxu0 %vm251_vm2, %v1231_v42 }
 0x476   :  { %7919 = vmatpush3.bf16.xpose.msra.mxu0 %v1338_v43  ;;  %7920 = vmatprep.mubr.msk.bf16.mxu0 %vm8589_vm1, %v8588_v41 }
 0x477   :  { %7930 = vmatprep.subr.bf16.mxu0 %v8588_v41 }
 0x478   :  { %7903 = vmatmul.mubr.msk.bf16.vlgmr.msra.gmra.mrb[40].mxu1 %vm251_vm2, %v1181_v13  ;;  %v1331_v47 = vpop.permute.xlu0 %1330 }
 0x479   :  { %7913 = vmatpush3.bf16.xpose.msra.mxu1 %v1288_v45  ;;  %7914 = vmatprep.mubr.msk.bf16.mxu1 %vm8589_vm1, %v8588_v41 }
 0x47a   :  { %7924 = vmatprep.subr.bf16.mxu1 %v8588_v41 }
 0x47c   :  { %v1433_v36 = vpop.permute.xlu0 %1432 }
 0x47d   :  { %v1438_v50 = vsel %vm251_vm2, %v1433_v36, 0  ;;  %7921 = vmatmul.mubr.msk.bf16.vlgmr.msra.gmra.mrb[40].mxu0 %vm251_vm2, %v1331_v47 }
 0x47e   :  { %7931 = vmatpush3.bf16.xpose.msra.mxu0 %v1438_v50  ;;  %7932 = vmatprep.mubr.msk.bf16.mxu0 %vm8589_vm1, %v8588_v41 }
 0x47f   :  { %7942 = vmatprep.subr.bf16.mxu0 %v8588_v41 }
 0x480   :  { %7915 = vmatmul.mubr.msk.bf16.vlgmr.msra.gmra.mrb[44].mxu1 %vm251_vm2, %v1281_v18  ;;  %v1431_v30 = vpop.permute.xlu0 %1430 }
 0x481   :  { %7925 = vmatpush3.bf16.xpose.msra.mxu1 %v1388_v46  ;;  %7926 = vmatprep.mubr.msk.bf16.mxu1 %vm8589_vm1, %v8588_v41 }
 0x482   :  { %7936 = vmatprep.subr.bf16.mxu1 %v8588_v41 }
 0x484   :  { %v1683_v57 = vpop.permute.xlu0 %1682 }
 0x485   :  { %7933 = vmatmul.mubr.msk.bf16.vlgmr.msra.gmra.mrb[44].mxu0 %vm251_vm2, %v1431_v30  ;;  %v1688_v59 = vsel %vm750_vm3, %v1683_v57, 0 }
 0x486   :  { %7943 = vmatpush3.bf16.msra.mxu0 %v1640_v55  ;;  %7944 = vmatprep.mubr.msk.bf16.mxu0 %vm8589_vm1, %v8588_v41 }
 0x487   :  { %7954 = vmatprep.subr.bf16.mxu0 %v8588_v41 }
 0x488   :  { %7927 = vmatmul.mubr.msk.bf16.vlgmr.msra.gmra.mrb[48].mxu1 %vm251_vm2, %v1381_v40 }
 0x489   :  { %7937 = vmatpush3.bf16.xpose.msra.mxu1 %v1488_v56  ;;  %7938 = vmatprep.mubr.msk.bf16.mxu1 %vm8589_vm1, %v8588_v41 }
 0x48a   :  { %7948 = vmatprep.subr.bf16.mxu1 %v8588_v41 }
 0x490   :  { %7939 = vmatmul.mubr.msk.bf16.vlgmr.msra.gmra.mrb[52].mxu1 %vm251_vm2, %v1481_v48 }
 0x491   :  { %7949 = vmatpush3.bf16.msra.mxu1 %v1688_v59  ;;  %7950 = vmatprep.mubr.msk.bf16.mxu1 %vm8589_vm1, %v8588_v41 }
 0x492   :  { %7960 = vmatprep.subr.bf16.mxu1 %v8588_v41 }
 0x4d5   :  { %v9034_v61 = vpop.f32.mrb[16].mxu0 }
 0x4d6   :  { %v7850_v53 = vpop.f32.mrb[17].mxu0 }
 0x4d7   :  { %v791_v62 = vpop.f32.mrb[18].mxu0 }
 0x4d8   :  { %v7851_v1 = vpop.f32.mrb[19].mxu0 }
 0x4dd   :  { %v9036_v4 = vpop.f32.mrb[24].mxu1  ;;  %v9038_v5 = vpop.f32.mrb[20].mxu0 }
 0x4de   :  { %v7856_v6 = vpop.f32.mrb[25].mxu1  ;;  %v7862_v7 = vpop.f32.mrb[21].mxu0 }
 0x4df   :  { %v839_v8 = vpop.f32.mrb[26].mxu1  ;;  %v887_v10 = vpop.f32.mrb[22].mxu0 }
 0x4e0   :  { %v7857_v12 = vpop.f32.mrb[27].mxu1  ;;  %v7863_v14 = vpop.f32.mrb[23].mxu0 }
 0x4e5   :  { %v9040_v9 = vpop.f32.mrb[24].mxu0 }
 0x4e6   :  { %v7874_v15 = vpop.f32.mrb[25].mxu0 }
 0x4e7   :  { %v983_v11 = vpop.f32.mrb[26].mxu0 }
 0x4e8   :  { %v7875_v13 = vpop.f32.mrb[27].mxu0 }
 0x50a   :  { %v9042_v16 = vpop.f32.mrb[28].mxu1 }
 0x50b   :  { %v7868_v17 = vpop.f32.mrb[29].mxu1 }
 0x50c   :  { %v935_v18 = vpop.f32.mrb[30].mxu1 }
 0x50d   :  { %v7869_v20 = vpop.f32.mrb[31].mxu1 }
 0x512   :  { %v9044_v25 = vpop.f32.mrb[32].mxu1  ;;  %v9046_v26 = vpop.f32.mrb[28].mxu0 }
 0x513   :  { %v7880_v27 = vpop.f32.mrb[33].mxu1  ;;  %v7886_v28 = vpop.f32.mrb[29].mxu0 }
 0x514   :  { %v1031_v29 = vpop.f32.mrb[34].mxu1  ;;  %v1079_v33 = vpop.f32.mrb[30].mxu0 }
 0x515   :  { %v7881_v34 = vpop.f32.mrb[35].mxu1  ;;  %v7887_v35 = vpop.f32.mrb[31].mxu0 }
 0x540   :  { %v1174_v37 = vpop.f32.mrb[32].mxu0 }
 0x541   :  { %v9048_v40 = vmul.f32 0.35355338, %v1174_v37  ;;  %v7898_v42 = vpop.f32.mrb[33].mxu0 }
 0x542   :  { %v1177_v19 = vpop.f32.mrb[34].mxu0 }
 0x543   :  { %v9050_v43 = vpop.f32.mrb[36].mxu1  ;;  %v7899_v44 = vpop.f32.mrb[35].mxu0  ;;  %v1538_v45 = vsel %vm251_vm2, %v9048_v40, -inf }
 0x544   :  { %v7892_v47 = vpop.f32.mrb[37].mxu1  ;;  %1539 = vmax.xlane.f32.xlu0 %v1538_v45 }
 0x545   :  { %v1127_v48 = vpop.f32.mrb[38].mxu1 }
 0x546   :  { %v7893_v36 = vpop.f32.mrb[39].mxu1 }
 0x548   :  { %v1274_v50 = vpop.f32.mrb[36].mxu0 }
 0x549   :  { %v1532_v46 = vmul.f32 0.35355338, %v1274_v50  ;;  %v7910_v51 = vpop.f32.mrb[37].mxu0 }
 0x54a   :  { %v1277_v30 = vpop.f32.mrb[38].mxu0 }
 0x54b   :  { %v1224_v55 = vpop.f32.mrb[40].mxu1  ;;  %v7911_v56 = vpop.f32.mrb[39].mxu0  ;;  %v1544_v57 = vsel %vm251_vm2, %v1532_v46, -inf }
 0x54c   :  { %v1531_v59 = vmul.f32 0.35355338, %v1224_v55  ;;  %v7904_v53 = vpop.f32.mrb[41].mxu1  ;;  %1545 = vmax.xlane.f32.xlu0 %v1544_v57 }
 0x54d   :  { %v1227_v62 = vpop.f32.mrb[42].mxu1  ;;  %v9068_v53 = vpop.permute.xlu1 %1730 }
 0x54e   :  { %v7905_v1 = vpop.f32.mrb[43].mxu1  ;;  %v1541_v6 = vsel %vm251_vm2, %v1531_v59, -inf }
 0x54f   :  { %1542 = vmax.xlane.f32.xlu1 %v1541_v6 }
 0x550   :  { %v1374_v7 = vpop.f32.mrb[40].mxu0 }
 0x551   :  { %v1534_v8 = vmul.f32 0.35355338, %v1374_v7  ;;  %v7922_v10 = vpop.f32.mrb[41].mxu0  ;;  %v9071_v6 = vpop.permute.xlu1 %1778 }
 0x552   :  { %v1377_v12 = vpop.f32.mrb[42].mxu0 }
 0x553   :  { %v1324_v14 = vpop.f32.mrb[44].mxu1  ;;  %v7923_v15 = vpop.f32.mrb[43].mxu0  ;;  %v1550_v11 = vsel %vm251_vm2, %v1534_v8, -inf }
 0x554   :  { %v1533_v13 = vmul.f32 0.35355338, %v1324_v14  ;;  %v7916_v17 = vpop.f32.mrb[45].mxu1  ;;  %1551 = vmax.xlane.f32.xlu1 %v1550_v11 }
 0x555   :  { %v1327_v18 = vpop.f32.mrb[46].mxu1 }
 0x556   :  { %v7917_v20 = vpop.f32.mrb[47].mxu1  ;;  %v1547_v27 = vsel %vm251_vm2, %v1533_v13, -inf }
 0x557   :  { %1548 = vmax.xlane.f32.xlu0 %v1547_v27 }
 0x558   :  { %v1474_v28 = vpop.f32.mrb[44].mxu0 }
 0x559   :  { %v9058_v29 = vmul.f32 0.35355338, %v1474_v28  ;;  %v7934_v33 = vpop.f32.mrb[45].mxu0 }
 0x55a   :  { %v1477_v34 = vpop.f32.mrb[46].mxu0 }
 0x55b   :  { %v1424_v35 = vpop.f32.mrb[48].mxu1  ;;  %v7935_v37 = vpop.f32.mrb[47].mxu0  ;;  %v1556_v42 = vsel %vm251_vm2, %v9058_v29, -inf }
 0x55c   :  { %v1535_v19 = vmul.f32 0.35355338, %v1424_v35  ;;  %v7928_v44 = vpop.f32.mrb[49].mxu1  ;;  %1557 = vmax.xlane.f32.xlu1 %v1556_v42 }
 0x55d   :  { %v1427_v45 = vpop.f32.mrb[50].mxu1 }
 0x55e   :  { %v7929_v47 = vpop.f32.mrb[51].mxu1  ;;  %v1553_v48 = vsel %vm251_vm2, %v1535_v19, -inf }
 0x55f   :  { %1554 = vmax.xlane.f32.xlu0 %v1553_v48 }
 0x563   :  { %v1524_v36 = vpop.f32.mrb[52].mxu1 }
 0x564   :  { %v1537_v50 = vmul.f32 0.35355338, %v1524_v36  ;;  %v7940_v51 = vpop.f32.mrb[53].mxu1 }
 0x565   :  { %v1527_v30 = vpop.f32.mrb[54].mxu1 }
 0x566   :  { %v7941_v55 = vpop.f32.mrb[55].mxu1  ;;  %v1559_v56 = vsel %vm251_vm2, %v1537_v50, -inf }
 0x567   :  { %1560 = vmax.xlane.f32.xlu0 %v1559_v56 }
 0x56d   :  { %1874 = vrot.lane.b32.xlu1 %v8784_v63, %s8594_s23 }
 0x57d   :  { %1826 = vrot.lane.b32.xlu0 %v8781_v60, %s8594_s23 }
 0x5d1   :  { %v1540_v57 = vpop.xlane.xlu0 %1539 }
 0x5d2   :  { %v1562_v62 = vsub.f32 %v9048_v40, %v1540_v57 }
 0x5d4   :  { %v1570_v1 = vmul.f32 1.442695, %v1562_v62 }
 0x5d6   :  { %8459 = vpow2.f32 %v1570_v1 }
 0x5d9   :  { %v1546_v7 = vpop.xlane.xlu0 %1545 }
 0x5da   :  { %v1564_v10 = vsub.f32 %v1532_v46, %v1546_v7 }
 0x5dc   :  { %v1574_v12 = vmul.f32 1.442695, %v1564_v10  ;;  %v1543_v14 = vpop.xlane.xlu1 %1542 }
 0x5dd   :  { %v1563_v15 = vsub.f32 %v1531_v59, %v1543_v14 }
 0x5de   :  { %8461 = vpow2.f32 %v1574_v12 }
 0x5df   :  { %v1572_v11 = vmul.f32 1.442695, %v1563_v15 }
 0x5e0   :  { %v9073_v17 = vpop.eup %8459 }
 0x5e1   :  { %8463 = vpow2.f32 %v1572_v11  ;;  %v1552_v18 = vpop.xlane.xlu1 %1551  ;;  %v1586_v20 = vsel %vm251_vm2, %v9073_v17, 0.0 }
 0x5e2   :  { %v1566_v27 = vsub.f32 %v1534_v8, %v1552_v18  ;;  %1587 = vadd.xlane.f32.xlu1 %v1586_v20 }
 0x5e4   :  { %v1578_v40 = vmul.f32 1.442695, %v1566_v27  ;;  %v1549_v28 = vpop.xlane.xlu0 %1548 }
 0x5e5   :  { %v1565_v33 = vsub.f32 %v1533_v13, %v1549_v28 }
 0x5e6   :  { %8465 = vpow2.f32 %v1578_v40  ;;  %v1736_v40 = vsel %vm750_vm3, %v9068_v53, 0 }
 0x5e7   :  { %v1576_v34 = vmul.f32 1.442695, %v1565_v33 }
 0x5e8   :  { %v9077_v46 = vpop.eup %8461 }
 0x5e9   :  { %8467 = vpow2.f32 %v1576_v34  ;;  %v1592_v59 = vsel %vm251_vm2, %v9077_v46, 0.0  ;;  %v1558_v51 = vpop.xlane.xlu1 %1557 }
 0x5ea   :  { %1593 = vadd.xlane.f32.xlu1 %v1592_v59  ;;  %v1568_v30 = vsub.f32 %v9058_v29, %v1558_v51 }
 0x5eb   :  { %v9081_v35 = vpop.eup %8463 }
 0x5ec   :  { %v1555_v37 = vpop.xlane.xlu0 %1554  ;;  %v1589_v42 = vsel %vm251_vm2, %v9081_v35, 0.0  ;;  %v1582_v55 = vmul.f32 1.442695, %v1568_v30 }
 0x5ed   :  { %v1567_v8 = vsub.f32 %v1535_v19, %v1555_v37  ;;  %1590 = vadd.xlane.f32.xlu0 %v1589_v42 }
 0x5ef   :  { %v1580_v44 = vmul.f32 1.442695, %v1567_v8 }
 0x5f0   :  { %v9085_v45 = vpop.eup %8465 }
 0x5f1   :  { %8469 = vpow2.f32 %v1580_v44  ;;  %v1598_v13 = vsel %vm251_vm2, %v9085_v45, 0.0 }
 0x5f2   :  { %1599 = vadd.xlane.f32.xlu1 %v1598_v13  ;;  %8471 = vpow2.f32 %v1582_v55  ;;  %v1784_v13 = vsel %vm750_vm3, %v9071_v6, 0 }
 0x5f3   :  { %v9089_v47 = vpop.eup %8467 }
 0x5f4   :  { %v1595_v48 = vsel %vm251_vm2, %v9089_v47, 0.0  ;;  %v1561_v56 = vpop.xlane.xlu0 %1560 }
 0x5f5   :  { %1596 = vadd.xlane.f32.xlu0 %v1595_v48  ;;  %v1569_v57 = vsub.f32 %v1537_v50, %v1561_v56  ;;  %v1875_v50 = vpop.permute.xlu1 %1874 }
 0x5f7   :  { %v1584_v62 = vmul.f32 1.442695, %v1569_v57 }
 0x5f8   :  { %v1827_v14 = vpop.permute.xlu0 %1826 }
 0x5f9   :  { %8473 = vpow2.f32 %v1584_v62  ;;  %v1832_v53 = vsel %vm750_vm3, %v1827_v14, 0 }
 0x5fb   :  { %v9093_v36 = vpop.eup %8469 }
 0x5fc   :  { %v1601_v19 = vsel %vm251_vm2, %v9093_v36, 0.0  ;;  %v9102_v1 = vpop.eup %8471 }
 0x5fd   :  { %1602 = vadd.xlane.f32.xlu0 %v1601_v19  ;;  %v1604_v7 = vsel %vm251_vm2, %v9102_v1, 0.0 }
 0x603   :  { %1970 = vrot.lane.b32.xlu1 %v8790_v3, %s8594_s23  ;;  %v9106_v10 = vpop.eup %8473 }
 0x604   :  { %v1607_v29 = vsel %vm251_vm2, %v9106_v10, 0.0 }
 0x613   :  { %1922 = vrot.lane.b32.xlu0 %v8787_v2, %s8594_s23 }
 0x627   :  { %1605 = vadd.xlane.f32.xlu1 %v1604_v7 }
 0x632   :  { %1608 = vadd.xlane.f32.xlu0 %v1607_v29 }
 0x638   :  { %2070 = vrot.lane.b32.xlu1 %v8772_v52, %s8595_s24 }
 0x63c   :  { %2068 = vrot.lane.b32.xlu1 %v8772_v52, %s8596_s25 }
 0x640   :  { %2170 = vrot.lane.b32.xlu1 %v8778_v58, %s8595_s24 }
 0x644   :  { %2168 = vrot.lane.b32.xlu1 %v8778_v58, %s8596_s25 }
 0x648   :  { %2270 = vrot.lane.b32.xlu1 %v8784_v63, %s8595_s24  ;;  %2020 = vrot.lane.b32.xlu0 %v8770_v49, %s8595_s24 }
 0x64c   :  { %2268 = vrot.lane.b32.xlu1 %v8784_v63, %s8596_s25  ;;  %2018 = vrot.lane.b32.xlu0 %v8770_v49, %s8596_s25 }
 0x650   :  { %2370 = vrot.lane.b32.xlu1 %v8790_v3, %s8595_s24  ;;  %2120 = vrot.lane.b32.xlu0 %v8775_v54, %s8595_s24 }
 0x654   :  { %2368 = vrot.lane.b32.xlu1 %v8790_v3, %s8596_s25  ;;  %2118 = vrot.lane.b32.xlu0 %v8775_v54, %s8596_s25 }
 0x658   :  { %2522 = vrot.lane.b32.xlu1 %v8770_v49, %s8597_s27  ;;  %2220 = vrot.lane.b32.xlu0 %v8781_v60, %s8595_s24 }
 0x65c   :  { %2618 = vrot.lane.b32.xlu1 %v8775_v54, %s8597_s27  ;;  %2218 = vrot.lane.b32.xlu0 %v8781_v60, %s8596_s25 }
 0x660   :  { %2666 = vrot.lane.b32.xlu1 %v8778_v58, %s8597_s27  ;;  %2320 = vrot.lane.b32.xlu0 %v8787_v2, %s8595_s24 }
 0x664   :  { %2318 = vrot.lane.b32.xlu0 %v8787_v2, %s8596_s25 }
 0x668   :  { %2570 = vrot.lane.b32.xlu0 %v8772_v52, %s8597_s27 }
 0x66f   :  { %v1588_v12 = vpop.xlane.xlu1 %1587 }
 0x670   :  { %8475 = vrcp.f32 %v1588_v12 }
 0x677   :  { %v1594_v15 = vpop.xlane.xlu1 %1593 }
 0x678   :  { %8477 = vrcp.f32 %v1594_v15 }
 0x67a   :  { %v8476_v11 = vpop.eup %8475  ;;  %v1591_v18 = vpop.xlane.xlu0 %1590 }
 0x67b   :  { %8479 = vrcp.f32 %v1591_v18  ;;  %v1618_v20 = vmul.f32 %v8476_v11, %v9073_v17 }
 0x67d   :  { %v1626_v27 = vpack.c.bf16 %v1618_v20, %v1618_v20 }
 0x67f   :  { %7945 = vmatmul.mubr.msk.bf16.vlgmr.msra.gmra.mrb[48].mxu0 %vm251_vm2, %v1626_v27  ;;  %v1600_v28 = vpop.xlane.xlu1 %1599 }
 0x680   :  { %7955 = vmatpush3.bf16.msra.mxu0 %v1736_v40  ;;  %8481 = vrcp.f32 %v1600_v28  ;;  %7956 = vmatprep.mubr.msk.bf16.mxu0 %vm8589_vm1, %v8588_v41 }
 0x681   :  { %7966 = vmatprep.subr.bf16.mxu0 %v8588_v41 }
 0x682   :  { %v8478_v33 = vpop.eup %8477  ;;  %v1597_v34 = vpop.xlane.xlu0 %1596 }
 0x683   :  { %8483 = vrcp.f32 %v1597_v34  ;;  %v1620_v59 = vmul.f32 %v8478_v33, %v9077_v46  ;;  %v1971_v57 = vpop.permute.xlu1 %1970 }
 0x684   :  { %v1976_v7 = vsel %vm750_vm3, %v1971_v57, 0 }
 0x685   :  { %v8480_v17 = vpop.eup %8479  ;;  %v1628_v37 = vpack.c.bf16 %v1620_v59, %v1620_v59 }
 0x686   :  { %v1619_v42 = vmul.f32 %v8480_v17, %v9081_v35 }
 0x687   :  { %7957 = vmatmul.mubr.msk.bf16.vlgmr.msra.gmra.mrb[52].mxu0 %vm251_vm2, %v1628_v37 }
 0x688   :  { %7967 = vmatpush3.bf16.msra.mxu0 %v1832_v53  ;;  %v1627_v8 = vpack.c.bf16 %v1619_v42, %v1619_v42  ;;  %7968 = vmatprep.mubr.msk.bf16.mxu0 %vm8589_vm1, %v8588_v41 }
 0x689   :  { %7978 = vmatprep.subr.bf16.mxu0 %v8588_v41 }
 0x68a   :  { %v8482_v44 = vpop.eup %8481  ;;  %7951 = vmatmul.mubr.msk.bf16.vlgmr.msra.gmra.mrb[56].mxu1 %vm251_vm2, %v1627_v8  ;;  %v1603_v46 = vpop.xlane.xlu0 %1602 }
 0x68b   :  { %7961 = vmatpush3.bf16.msra.mxu1 %v1784_v13  ;;  %8485 = vrcp.f32 %v1603_v46  ;;  %v1622_v35 = vmul.f32 %v8482_v44, %v9085_v45  ;;  %7962 = vmatprep.mubr.msk.bf16.mxu1 %vm8589_vm1, %v8588_v41  ;;  %v1880_v45 = vsel %vm750_vm3, %v1875_v50, 0 }
 0x68c   :  { %7972 = vmatprep.subr.bf16.mxu1 %v8588_v41 }
 0x68d   :  { %v8484_v48 = vpop.eup %8483  ;;  %v1630_v19 = vpack.c.bf16 %v1622_v35, %v1622_v35 }
 0x68e   :  { %v1923_v51 = vpop.permute.xlu0 %1922  ;;  %v1621_v30 = vmul.f32 %v8484_v48, %v9089_v47 }
 0x68f   :  { %v1928_v55 = vsel %vm750_vm3, %v1923_v51, 0  ;;  %7969 = vmatmul.mubr.msk.bf16.vlgmr.msra.gmra.mrb[56].mxu0 %vm251_vm2, %v1630_v19 }
 0x690   :  { %7979 = vmatpush3.bf16.msra.mxu0 %v1928_v55  ;;  %v1629_v6 = vpack.c.bf16 %v1621_v30, %v1621_v30  ;;  %7980 = vmatprep.mubr.msk.bf16.mxu0 %vm8589_vm1, %v8588_v41 }
 0x691   :  { %7990 = vmatprep.subr.bf16.mxu0 %v8588_v41 }
 0x692   :  { %7963 = vmatmul.mubr.msk.bf16.vlgmr.msra.gmra.mrb[60].mxu1 %vm251_vm2, %v1629_v6 }
 0x693   :  { %7973 = vmatpush3.bf16.msra.mxu1 %v1880_v45  ;;  %7974 = vmatprep.mubr.msk.bf16.mxu1 %vm8589_vm1, %v8588_v41 }
 0x694   :  { %7984 = vmatprep.subr.bf16.mxu1 %v8588_v41 }
 0x695   :  { %v8486_v47 = vpop.eup %8485 }
 0x696   :  { %v1623_v56 = vmul.f32 %v8486_v47, %v9093_v36 }
 0x698   :  { %v1631_v62 = vpack.c.bf16 %v1623_v56, %v1623_v56 }
 0x69a   :  { %7975 = vmatmul.mubr.msk.bf16.vlgmr.msra.gmra.mrb[64].mxu1 %vm251_vm2, %v1631_v62 }
 0x69b   :  { %7985 = vmatpush3.bf16.msra.mxu1 %v1976_v7  ;;  %7986 = vmatprep.mubr.msk.bf16.mxu1 %vm8589_vm1, %v8588_v41 }
 0x69c   :  { %7996 = vmatprep.subr.bf16.mxu1 %v8588_v41 }
 0x6b4   :  { %v1606_v29 = vpop.xlane.xlu1 %1605 }
 0x6b5   :  { %8487 = vrcp.f32 %v1606_v29 }
 0x6b8   :  { %v2071_v50 = vpop.permute.xlu1 %2070 }
 0x6b9   :  { %v2076_v42 = vsel %vm251_vm2, %v2071_v50, 0 }
 0x6bc   :  { %v2069_v12 = vpop.permute.xlu1 %2068 }
 0x6bf   :  { %v8488_v14 = vpop.eup %8487  ;;  %v1609_v15 = vpop.xlane.xlu0 %1608 }
 0x6c0   :  { %8489 = vrcp.f32 %v1609_v15  ;;  %v2171_v36 = vpop.permute.xlu1 %2170  ;;  %v1624_v11 = vmul.f32 %v8488_v14, %v9102_v1 }
 0x6c1   :  { %v2176_v46 = vsel %vm251_vm2, %v2171_v36, 0 }
 0x6c2   :  { %v1632_v18 = vpack.c.bf16 %v1624_v11, %v1624_v11 }
 0x6c3   :  { %v2021_v20 = vpop.permute.xlu0 %2020 }
 0x6c4   :  { %v2026_v27 = vsel %vm251_vm2, %v2021_v20, 0  ;;  %v2169_v40 = vpop.permute.xlu1 %2168  ;;  %7981 = vmatmul.mubr.msk.bf16.vlgmr.msra.gmra.mrb[60].mxu0 %vm251_vm2, %v1632_v18 }
 0x6c5   :  { %7991 = vmatpush3.bf16.xpose.msra.mxu0 %v2026_v27  ;;  %7992 = vmatprep.mubr.msk.bf16.mxu0 %vm8589_vm1, %v8588_v41 }
 0x6c6   :  { %8002 = vmatprep.subr.bf16.mxu0 %v8588_v41 }
 0x6c7   :  { %v2019_v28 = vpop.permute.xlu0 %2018 }
 0x6c8   :  { %v2271_v33 = vpop.permute.xlu1 %2270 }
 0x6c9   :  { %v2276_v30 = vsel %vm251_vm2, %v2271_v33, 0 }
 0x6ca   :  { %v8490_v34 = vpop.eup %8489 }
 0x6cb   :  { %v2121_v59 = vpop.permute.xlu0 %2120  ;;  %v1625_v17 = vmul.f32 %v8490_v34, %v9106_v10 }
 0x6cc   :  { %v2126_v1 = vsel %vm251_vm2, %v2121_v59, 0  ;;  %7993 = vmatmul.mubr.msk.bf16.vlgmr.msra.gmra.mrb[64].mxu0 %vm251_vm2, %v2019_v28  ;;  %v2269_v53 = vpop.permute.xlu1 %2268 }
 0x6cd   :  { %8003 = vmatpush3.bf16.xpose.msra.mxu0 %v2126_v1  ;;  %v1633_v37 = vpack.c.bf16 %v1625_v17, %v1625_v17  ;;  %8004 = vmatprep.mubr.msk.bf16.mxu0 %vm8589_vm1, %v8588_v41 }
 0x6ce   :  { %8014 = vmatprep.subr.bf16.mxu0 %v8588_v41 }
 0x6cf   :  { %7987 = vmatmul.mubr.msk.bf16.vlgmr.msra.gmra.mrb[68].mxu1 %vm251_vm2, %v1633_v37  ;;  %v2119_v8 = vpop.permute.xlu0 %2118 }
 0x6d0   :  { %7997 = vmatpush3.bf16.xpose.msra.mxu1 %v2076_v42  ;;  %7998 = vmatprep.mubr.msk.bf16.mxu1 %vm8589_vm1, %v8588_v41  ;;  %v2371_v13 = vpop.permute.xlu1 %2370 }
 0x6d1   :  { %8008 = vmatprep.subr.bf16.mxu1 %v8588_v41  ;;  %v2376_v47 = vsel %vm251_vm2, %v2371_v13, 0 }
 0x6d3   :  { %v2221_v10 = vpop.permute.xlu0 %2220 }
 0x6d4   :  { %v2226_v44 = vsel %vm251_vm2, %v2221_v10, 0  ;;  %8005 = vmatmul.mubr.msk.bf16.vlgmr.msra.gmra.mrb[68].mxu0 %vm251_vm2, %v2119_v8  ;;  %v2369_v48 = vpop.permute.xlu1 %2368 }
 0x6d5   :  { %8015 = vmatpush3.bf16.xpose.msra.mxu0 %v2226_v44  ;;  %8016 = vmatprep.mubr.msk.bf16.mxu0 %vm8589_vm1, %v8588_v41 }
 0x6d6   :  { %8026 = vmatprep.subr.bf16.mxu0 %v8588_v41 }
 0x6d7   :  { %7999 = vmatmul.mubr.msk.bf16.vlgmr.msra.gmra.mrb[72].mxu1 %vm251_vm2, %v2069_v12  ;;  %v2219_v35 = vpop.permute.xlu0 %2218 }
 0x6d8   :  { %8009 = vmatpush3.bf16.xpose.msra.mxu1 %v2176_v46  ;;  %8010 = vmatprep.mubr.msk.bf16.mxu1 %vm8589_vm1, %v8588_v41  ;;  %v2523_v55 = vpop.permute.xlu1 %2522 }
 0x6d9   :  { %8020 = vmatprep.subr.bf16.mxu1 %v8588_v41  ;;  %v2528_v45 = vsel %vm750_vm3, %v2523_v55, 0 }
 0x6db   :  { %v2321_v19 = vpop.permute.xlu0 %2320 }
 0x6dc   :  { %v2326_v51 = vsel %vm251_vm2, %v2321_v19, 0  ;;  %8017 = vmatmul.mubr.msk.bf16.vlgmr.msra.gmra.mrb[72].mxu0 %vm251_vm2, %v2219_v35 }
 0x6dd   :  { %8027 = vmatpush3.bf16.xpose.msra.mxu0 %v2326_v51  ;;  %8028 = vmatprep.mubr.msk.bf16.mxu0 %vm8589_vm1, %v8588_v41 }
 0x6de   :  { %8038 = vmatprep.subr.bf16.mxu0 %v8588_v41 }
 0x6df   :  { %8011 = vmatmul.mubr.msk.bf16.vlgmr.msra.gmra.mrb[76].mxu1 %vm251_vm2, %v2169_v40  ;;  %v2319_v6 = vpop.permute.xlu0 %2318 }
 0x6e0   :  { %8021 = vmatpush3.bf16.xpose.msra.mxu1 %v2276_v30  ;;  %8022 = vmatprep.mubr.msk.bf16.mxu1 %vm8589_vm1, %v8588_v41 }
 0x6e1   :  { %8032 = vmatprep.subr.bf16.mxu1 %v8588_v41 }
 0x6e3   :  { %v2571_v56 = vpop.permute.xlu0 %2570 }
 0x6e4   :  { %8029 = vmatmul.mubr.msk.bf16.vlgmr.msra.gmra.mrb[76].mxu0 %vm251_vm2, %v2319_v6  ;;  %v2576_v57 = vsel %vm750_vm3, %v2571_v56, 0 }
 0x6e5   :  { %8039 = vmatpush3.bf16.msra.mxu0 %v2528_v45  ;;  %8040 = vmatprep.mubr.msk.bf16.mxu0 %vm8589_vm1, %v8588_v41 }
 0x6e6   :  { %8050 = vmatprep.subr.bf16.mxu0 %v8588_v41 }
 0x6e7   :  { %8023 = vmatmul.mubr.msk.bf16.vlgmr.msra.gmra.mrb[80].mxu1 %vm251_vm2, %v2269_v53 }
 0x6e8   :  { %8033 = vmatpush3.bf16.xpose.msra.mxu1 %v2376_v47  ;;  %8034 = vmatprep.mubr.msk.bf16.mxu1 %vm8589_vm1, %v8588_v41 }
 0x6e9   :  { %8044 = vmatprep.subr.bf16.mxu1 %v8588_v41 }
 0x6ef   :  { %8035 = vmatmul.mubr.msk.bf16.vlgmr.msra.gmra.mrb[84].mxu1 %vm251_vm2, %v2369_v48 }
 0x6f0   :  { %8045 = vmatpush3.bf16.msra.mxu1 %v2576_v57  ;;  %8046 = vmatprep.mubr.msk.bf16.mxu1 %vm8589_vm1, %v8588_v41 }
 0x6f1   :  { %8056 = vmatprep.subr.bf16.mxu1 %v8588_v41 }
 0x752   :  { %v9224_v62 = vpop.f32.mrb[48].mxu0 }
 0x753   :  { %v7946_v7 = vpop.f32.mrb[49].mxu0 }
 0x754   :  { %v1679_v29 = vpop.f32.mrb[50].mxu0 }
 0x755   :  { %v7947_v50 = vpop.f32.mrb[51].mxu0 }
 0x75a   :  { %v9226_v12 = vpop.f32.mrb[52].mxu0 }
 0x75b   :  { %v7958_v14 = vpop.f32.mrb[53].mxu0 }
 0x75c   :  { %v1775_v15 = vpop.f32.mrb[54].mxu0 }
 0x75d   :  { %v9228_v36 = vpop.f32.mrb[56].mxu1  ;;  %v7959_v11 = vpop.f32.mrb[55].mxu0 }
 0x75e   :  { %v8235_v18 = vpack.i.bf16 %v9228_v36, %v9224_v62  ;;  %v7952_v20 = vpop.f32.mrb[57].mxu1 }
 0x75f   :  { %v1727_v27 = vpop.f32.mrb[58].mxu1 }
 0x760   :  { %v7953_v40 = vpop.f32.mrb[59].mxu1 }
 0x762   :  { %v9232_v28 = vpop.f32.mrb[56].mxu0 }
 0x763   :  { %v7970_v33 = vpop.f32.mrb[57].mxu0 }
 0x764   :  { %v1871_v34 = vpop.f32.mrb[58].mxu0 }
 0x765   :  { %v9234_v59 = vpop.f32.mrb[60].mxu1  ;;  %v7971_v17 = vpop.f32.mrb[59].mxu0 }
 0x766   :  { %v8240_v1 = vpack.i.bf16 %v9234_v59, %v9226_v12  ;;  %v7964_v37 = vpop.f32.mrb[61].mxu1 }
 0x767   :  { %v1823_v42 = vpop.f32.mrb[62].mxu1 }
 0x768   :  { %v7965_v53 = vpop.f32.mrb[63].mxu1 }
 0x76d   :  { %v9238_v8 = vpop.f32.mrb[64].mxu1 }
 0x76e   :  { %v7976_v44 = vpop.f32.mrb[65].mxu1 }
 0x76f   :  { %v1919_v13 = vpop.f32.mrb[66].mxu1 }
 0x770   :  { %v7977_v46 = vpop.f32.mrb[67].mxu1 }
 0x797   :  { %v9242_v35 = vpop.f32.mrb[60].mxu0 }
 0x798   :  { %v7982_v48 = vpop.f32.mrb[61].mxu0 }
 0x799   :  { %v1967_v19 = vpop.f32.mrb[62].mxu0 }
 0x79a   :  { %v7983_v51 = vpop.f32.mrb[63].mxu0 }
 0x79f   :  { %v2062_v30 = vpop.f32.mrb[64].mxu0 }
 0x7a0   :  { %v9244_v55 = vmul.f32 0.35355338, %v2062_v30  ;;  %v7994_v6 = vpop.f32.mrb[65].mxu0 }
 0x7a1   :  { %v2065_v45 = vpop.f32.mrb[66].mxu0 }
 0x7a2   :  { %v9246_v47 = vpop.f32.mrb[68].mxu1  ;;  %v7995_v56 = vpop.f32.mrb[67].mxu0  ;;  %v2426_v57 = vsel %vm251_vm2, %v9244_v55, -inf }
 0x7a3   :  { %v7988_v29 = vpop.f32.mrb[69].mxu1  ;;  %2427 = vmax.xlane.f32.xlu0 %v2426_v57 }
 0x7a4   :  { %v2015_v50 = vpop.f32.mrb[70].mxu1 }
 0x7a5   :  { %v7989_v14 = vpop.f32.mrb[71].mxu1 }
 0x7a7   :  { %v2162_v15 = vpop.f32.mrb[68].mxu0 }
 0x7a8   :  { %v2420_v11 = vmul.f32 0.35355338, %v2162_v15  ;;  %v8006_v20 = vpop.f32.mrb[69].mxu0 }
 0x7a9   :  { %v2165_v27 = vpop.f32.mrb[70].mxu0 }
 0x7aa   :  { %v2112_v40 = vpop.f32.mrb[72].mxu1  ;;  %v8007_v33 = vpop.f32.mrb[71].mxu0  ;;  %v2432_v34 = vsel %vm251_vm2, %v2420_v11, -inf }
 0x7ab   :  { %v2419_v17 = vmul.f32 0.35355338, %v2112_v40  ;;  %v8000_v37 = vpop.f32.mrb[73].mxu1  ;;  %2433 = vmax.xlane.f32.xlu0 %v2432_v34 }
 0x7ac   :  { %v2115_v42 = vpop.f32.mrb[74].mxu1 }
 0x7ad   :  { %v8001_v53 = vpop.f32.mrb[75].mxu1  ;;  %v2429_v44 = vsel %vm251_vm2, %v2419_v17, -inf }
 0x7ae   :  { %2430 = vmax.xlane.f32.xlu1 %v2429_v44 }
 0x7af   :  { %v2262_v13 = vpop.f32.mrb[72].mxu0 }
 0x7b0   :  { %v2422_v46 = vmul.f32 0.35355338, %v2262_v13  ;;  %v8018_v48 = vpop.f32.mrb[73].mxu0 }
 0x7b1   :  { %v2265_v19 = vpop.f32.mrb[74].mxu0 }
 0x7b2   :  { %v2212_v51 = vpop.f32.mrb[76].mxu1  ;;  %v8019_v30 = vpop.f32.mrb[75].mxu0  ;;  %v2438_v6 = vsel %vm251_vm2, %v2422_v46, -inf }
 0x7b3   :  { %v2421_v45 = vmul.f32 0.35355338, %v2212_v51  ;;  %v8012_v56 = vpop.f32.mrb[77].mxu1  ;;  %2439 = vmax.xlane.f32.xlu1 %v2438_v6 }
 0x7b4   :  { %v2215_v57 = vpop.f32.mrb[78].mxu1 }
 0x7b5   :  { %v8013_v29 = vpop.f32.mrb[79].mxu1  ;;  %v2435_v50 = vsel %vm251_vm2, %v2421_v45, -inf }
 0x7b6   :  { %2436 = vmax.xlane.f32.xlu0 %v2435_v50  ;;  %v9266_v29 = vpop.permute.xlu1 %2618 }
 0x7b7   :  { %v2362_v14 = vpop.f32.mrb[76].mxu0 }
 0x7b8   :  { %v9256_v15 = vmul.f32 0.35355338, %v2362_v14  ;;  %v8030_v20 = vpop.f32.mrb[77].mxu0 }
 0x7b9   :  { %v2365_v27 = vpop.f32.mrb[78].mxu0 }
 0x7ba   :  { %v2312_v40 = vpop.f32.mrb[80].mxu1  ;;  %v8031_v33 = vpop.f32.mrb[79].mxu0  ;;  %v2444_v34 = vsel %vm251_vm2, %v9256_v15, -inf }
 0x7bb   :  { %v2423_v37 = vmul.f32 0.35355338, %v2312_v40  ;;  %v8024_v42 = vpop.f32.mrb[81].mxu1  ;;  %2445 = vmax.xlane.f32.xlu1 %v2444_v34  ;;  %v9269_v20 = vpop.permute.xlu1 %2666 }
 0x7bc   :  { %v2315_v53 = vpop.f32.mrb[82].mxu1 }
 0x7bd   :  { %v8025_v44 = vpop.f32.mrb[83].mxu1  ;;  %v2441_v13 = vsel %vm251_vm2, %v2423_v37, -inf }
 0x7be   :  { %2442 = vmax.xlane.f32.xlu0 %v2441_v13 }
 0x7c2   :  { %v2412_v48 = vpop.f32.mrb[84].mxu1 }
 0x7c3   :  { %v2425_v19 = vmul.f32 0.35355338, %v2412_v48  ;;  %v8036_v51 = vpop.f32.mrb[85].mxu1 }
 0x7c4   :  { %v2415_v30 = vpop.f32.mrb[86].mxu1 }
 0x7c5   :  { %v8037_v6 = vpop.f32.mrb[87].mxu1  ;;  %v2447_v56 = vsel %vm251_vm2, %v2425_v19, -inf }
 0x7c6   :  { %2448 = vmax.xlane.f32.xlu0 %v2447_v56 }
 0x7cc   :  { %2762 = vrot.lane.b32.xlu1 %v8784_v63, %s8597_s27 }
 0x7dc   :  { %2714 = vrot.lane.b32.xlu0 %v8781_v60, %s8597_s27 }
 0x830   :  { %v2428_v57 = vpop.xlane.xlu0 %2427 }
 0x831   :  { %v2450_v50 = vsub.f32 %v9244_v55, %v2428_v57 }
 0x833   :  { %v2458_v14 = vmul.f32 1.442695, %v2450_v50 }
 0x835   :  { %8491 = vpow2.f32 %v2458_v14 }
 0x838   :  { %v2434_v27 = vpop.xlane.xlu0 %2433 }
 0x839   :  { %v2452_v40 = vsub.f32 %v2420_v11, %v2434_v27 }
 0x83b   :  { %v2462_v33 = vmul.f32 1.442695, %v2452_v40  ;;  %v2431_v34 = vpop.xlane.xlu1 %2430 }
 0x83c   :  { %v2451_v42 = vsub.f32 %v2419_v17, %v2431_v34 }
 0x83d   :  { %8493 = vpow2.f32 %v2462_v33 }
 0x83e   :  { %v2460_v53 = vmul.f32 1.442695, %v2451_v42 }
 0x83f   :  { %v9271_v44 = vpop.eup %8491 }
 0x840   :  { %8495 = vpow2.f32 %v2460_v53  ;;  %v2440_v13 = vpop.xlane.xlu1 %2439  ;;  %v2474_v48 = vsel %vm251_vm2, %v9271_v44, 0.0 }
 0x841   :  { %v2454_v51 = vsub.f32 %v2422_v46, %v2440_v13  ;;  %2475 = vadd.xlane.f32.xlu1 %v2474_v48 }
 0x843   :  { %v2466_v55 = vmul.f32 1.442695, %v2454_v51  ;;  %v2437_v30 = vpop.xlane.xlu0 %2436 }
 0x844   :  { %v2453_v6 = vsub.f32 %v2421_v45, %v2437_v30 }
 0x845   :  { %8497 = vpow2.f32 %v2466_v55 }
 0x846   :  { %v2464_v56 = vmul.f32 1.442695, %v2453_v6 }
 0x847   :  { %v9275_v11 = vpop.eup %8493 }
 0x848   :  { %8499 = vpow2.f32 %v2464_v56  ;;  %v2480_v17 = vsel %vm251_vm2, %v9275_v11, 0.0  ;;  %v2446_v53 = vpop.xlane.xlu1 %2445 }
 0x849   :  { %2481 = vadd.xlane.f32.xlu1 %v2480_v17  ;;  %v2456_v13 = vsub.f32 %v9256_v15, %v2446_v53 }
 0x84a   :  { %v9279_v57 = vpop.eup %8495 }
 0x84b   :  { %v2443_v50 = vpop.xlane.xlu0 %2442  ;;  %v2477_v14 = vsel %vm251_vm2, %v9279_v57, 0.0  ;;  %v2470_v48 = vmul.f32 1.442695, %v2456_v13 }
 0x84c   :  { %v2455_v46 = vsub.f32 %v2423_v37, %v2443_v50  ;;  %2478 = vadd.xlane.f32.xlu0 %v2477_v14 }
 0x84e   :  { %v2468_v27 = vmul.f32 1.442695, %v2455_v46 }
 0x84f   :  { %v9283_v40 = vpop.eup %8497 }
 0x850   :  { %8501 = vpow2.f32 %v2468_v27  ;;  %v2486_v45 = vsel %vm251_vm2, %v9283_v40, 0.0 }
 0x851   :  { %2487 = vadd.xlane.f32.xlu1 %v2486_v45  ;;  %8503 = vpow2.f32 %v2470_v48 }
 0x852   :  { %v9287_v33 = vpop.eup %8499 }
 0x853   :  { %v2483_v34 = vsel %vm251_vm2, %v9287_v33, 0.0  ;;  %v2449_v51 = vpop.xlane.xlu0 %2448 }
 0x854   :  { %2484 = vadd.xlane.f32.xlu0 %v2483_v34  ;;  %v2457_v55 = vsub.f32 %v2425_v19, %v2449_v51  ;;  %v2763_v19 = vpop.permute.xlu1 %2762 }
 0x856   :  { %v2472_v30 = vmul.f32 1.442695, %v2457_v55 }
 0x857   :  { %v2715_v14 = vpop.permute.xlu0 %2714 }
 0x858   :  { %8505 = vpow2.f32 %v2472_v30 }
 0x85a   :  { %v9291_v42 = vpop.eup %8501 }
 0x85b   :  { %v2489_v37 = vsel %vm251_vm2, %v9291_v42, 0.0  ;;  %v9300_v6 = vpop.eup %8503 }
 0x85c   :  { %2490 = vadd.xlane.f32.xlu0 %v2489_v37  ;;  %v2492_v56 = vsel %vm251_vm2, %v9300_v6, 0.0  ;;  %v2624_v37 = vsel %vm750_vm3, %v9266_v29, 0  ;;  %v2720_v29 = vsel %vm750_vm3, %v2715_v14, 0 }
 0x862   :  { %2858 = vrot.lane.b32.xlu1 %v8790_v3, %s8597_s27  ;;  %v9304_v17 = vpop.eup %8505 }
 0x863   :  { %v2495_v15 = vsel %vm251_vm2, %v9304_v17, 0.0 }
 0x872   :  { %2810 = vrot.lane.b32.xlu0 %v8787_v2, %s8597_s27 }
 0x886   :  { %2493 = vadd.xlane.f32.xlu1 %v2492_v56 }
 0x891   :  { %2496 = vadd.xlane.f32.xlu0 %v2495_v15 }
 0x897   :  { %2958 = vrot.lane.b32.xlu1 %v8772_v52, %s8598_s28 }
 0x89b   :  { %2956 = vrot.lane.b32.xlu1 %v8772_v52, %s8599_s29 }
 0x89f   :  { %3058 = vrot.lane.b32.xlu1 %v8778_v58, %s8598_s28 }
 0x8a3   :  { %3056 = vrot.lane.b32.xlu1 %v8778_v58, %s8599_s29 }
 0x8a7   :  { %3158 = vrot.lane.b32.xlu1 %v8784_v63, %s8598_s28  ;;  %2908 = vrot.lane.b32.xlu0 %v8770_v49, %s8598_s28 }
 0x8ab   :  { %3156 = vrot.lane.b32.xlu1 %v8784_v63, %s8599_s29  ;;  %2906 = vrot.lane.b32.xlu0 %v8770_v49, %s8599_s29 }
 0x8af   :  { %3258 = vrot.lane.b32.xlu1 %v8790_v3, %s8598_s28  ;;  %3008 = vrot.lane.b32.xlu0 %v8775_v54, %s8598_s28 }
 0x8b3   :  { %3256 = vrot.lane.b32.xlu1 %v8790_v3, %s8599_s29  ;;  %3006 = vrot.lane.b32.xlu0 %v8775_v54, %s8599_s29 }
 0x8b7   :  { %3410 = vrot.lane.b32.xlu1 %v8770_v49, %s8600_s0  ;;  %3108 = vrot.lane.b32.xlu0 %v8781_v60, %s8598_s28 }
 0x8bb   :  { %3106 = vrot.lane.b32.xlu0 %v8781_v60, %s8599_s29 }
 0x8bf   :  { %3208 = vrot.lane.b32.xlu0 %v8787_v2, %s8598_s28 }
 0x8c3   :  { %3206 = vrot.lane.b32.xlu0 %v8787_v2, %s8599_s29 }
 0x8ce   :  { %v2476_v50 = vpop.xlane.xlu1 %2475 }
 0x8cf   :  { %8507 = vrcp.f32 %v2476_v50 }
 0x8d6   :  { %v2482_v46 = vpop.xlane.xlu1 %2481 }
 0x8d7   :  { %8509 = vrcp.f32 %v2482_v46 }
 0x8d9   :  { %v8508_v27 = vpop.eup %8507  ;;  %v2479_v45 = vpop.xlane.xlu0 %2478 }
 0x8da   :  { %v2506_v34 = vmul.f32 %v8508_v27, %v9271_v44  ;;  %8511 = vrcp.f32 %v2479_v45 }
 0x8dc   :  { %v2514_v49 = vpack.c.bf16 %v2506_v34, %v2506_v34 }
 0x8de   :  { %8041 = vmatmul.mubr.msk.bf16.vlgmr.msra.gmra.mrb[80].mxu0 %vm251_vm2, %v2514_v49  ;;  %v2488_v53 = vpop.xlane.xlu1 %2487 }
 0x8df   :  { %8051 = vmatpush3.bf16.msra.mxu0 %v2624_v37  ;;  %8513 = vrcp.f32 %v2488_v53  ;;  %8052 = vmatprep.mubr.msk.bf16.mxu0 %vm8589_vm1, %v8588_v41 }
 0x8e0   :  { %8062 = vmatprep.subr.bf16.mxu0 %v8588_v41 }
 0x8e1   :  { %v8510_v13 = vpop.eup %8509  ;;  %v2485_v48 = vpop.xlane.xlu0 %2484 }
 0x8e2   :  { %v2508_v51 = vmul.f32 %v8510_v13, %v9275_v11  ;;  %8515 = vrcp.f32 %v2485_v48  ;;  %v2672_v11 = vsel %vm750_vm3, %v9269_v20, 0  ;;  %v2859_v37 = vpop.permute.xlu1 %2858 }
 0x8e3   :  { %v2864_v13 = vsel %vm750_vm3, %v2859_v37, 0 }
 0x8e4   :  { %v8512_v44 = vpop.eup %8511  ;;  %v2516_v55 = vpack.c.bf16 %v2508_v51, %v2508_v51 }
 0x8e5   :  { %v2507_v30 = vmul.f32 %v8512_v44, %v9279_v57 }
 0x8e6   :  { %8053 = vmatmul.mubr.msk.bf16.vlgmr.msra.gmra.mrb[84].mxu0 %vm251_vm2, %v2516_v55 }
 0x8e7   :  { %8063 = vmatpush3.bf16.msra.mxu0 %v2720_v29  ;;  %v2515_v56 = vpack.c.bf16 %v2507_v30, %v2507_v30  ;;  %8064 = vmatprep.mubr.msk.bf16.mxu0 %vm8589_vm1, %v8588_v41 }
 0x8e8   :  { %8074 = vmatprep.subr.bf16.mxu0 %v8588_v41 }
 0x8e9   :  { %v8514_v15 = vpop.eup %8513  ;;  %8047 = vmatmul.mubr.msk.bf16.vlgmr.msra.gmra.mrb[88].mxu1 %vm251_vm2, %v2515_v56  ;;  %v2491_v50 = vpop.xlane.xlu0 %2490 }
 0x8ea   :  { %v2510_v57 = vmul.f32 %v8514_v15, %v9283_v40  ;;  %8057 = vmatpush3.bf16.msra.mxu1 %v2672_v11  ;;  %8517 = vrcp.f32 %v2491_v50  ;;  %8058 = vmatprep.mubr.msk.bf16.mxu1 %vm8589_vm1, %v8588_v41  ;;  %v2768_v40 = vsel %vm750_vm3, %v2763_v19, 0 }
 0x8eb   :  { %8068 = vmatprep.subr.bf16.mxu1 %v8588_v41 }
 0x8ec   :  { %v8516_v14 = vpop.eup %8515  ;;  %v2518_v46 = vpack.c.bf16 %v2510_v57, %v2510_v57 }
 0x8ed   :  { %v2509_v27 = vmul.f32 %v8516_v14, %v9287_v33  ;;  %v2811_v45 = vpop.permute.xlu0 %2810 }
 0x8ee   :  { %v2816_v34 = vsel %vm750_vm3, %v2811_v45, 0  ;;  %8065 = vmatmul.mubr.msk.bf16.vlgmr.msra.gmra.mrb[88].mxu0 %vm251_vm2, %v2518_v46 }
 0x8ef   :  { %8075 = vmatpush3.bf16.msra.mxu0 %v2816_v34  ;;  %v2517_v20 = vpack.c.bf16 %v2509_v27, %v2509_v27  ;;  %8076 = vmatprep.mubr.msk.bf16.mxu0 %vm8589_vm1, %v8588_v41 }
 0x8f0   :  { %8086 = vmatprep.subr.bf16.mxu0 %v8588_v41 }
 0x8f1   :  { %8059 = vmatmul.mubr.msk.bf16.vlgmr.msra.gmra.mrb[92].mxu1 %vm251_vm2, %v2517_v20 }
 0x8f2   :  { %8069 = vmatpush3.bf16.msra.mxu1 %v2768_v40  ;;  %8070 = vmatprep.mubr.msk.bf16.mxu1 %vm8589_vm1, %v8588_v41 }
 0x8f3   :  { %8080 = vmatprep.subr.bf16.mxu1 %v8588_v41 }
 0x8f4   :  { %v8518_v33 = vpop.eup %8517 }
 0x8f5   :  { %v2511_v49 = vmul.f32 %v8518_v33, %v9291_v42 }
 0x8f7   :  { %v2519_v53 = vpack.c.bf16 %v2511_v49, %v2511_v49 }
 0x8f9   :  { %8071 = vmatmul.mubr.msk.bf16.vlgmr.msra.gmra.mrb[96].mxu1 %vm251_vm2, %v2519_v53 }
 0x8fa   :  { %8081 = vmatpush3.bf16.msra.mxu1 %v2864_v13  ;;  %8082 = vmatprep.mubr.msk.bf16.mxu1 %vm8589_vm1, %v8588_v41 }
 0x8fb   :  { %8092 = vmatprep.subr.bf16.mxu1 %v8588_v41 }
 0x913   :  { %v2494_v19 = vpop.xlane.xlu1 %2493 }
 0x914   :  { %8519 = vrcp.f32 %v2494_v19 }
 0x917   :  { %v2959_v48 = vpop.permute.xlu1 %2958 }
 0x918   :  { %v2964_v34 = vsel %vm251_vm2, %v2959_v48, 0 }
 0x91b   :  { %v2957_v51 = vpop.permute.xlu1 %2956 }
 0x91e   :  { %v8520_v44 = vpop.eup %8519  ;;  %v2497_v55 = vpop.xlane.xlu0 %2496 }
 0x91f   :  { %v2512_v42 = vmul.f32 %v8520_v44, %v9300_v6  ;;  %8521 = vrcp.f32 %v2497_v55  ;;  %v3059_v30 = vpop.permute.xlu1 %3058 }
 0x920   :  { %v3064_v37 = vsel %vm251_vm2, %v3059_v30, 0 }
 0x921   :  { %v2520_v29 = vpack.c.bf16 %v2512_v42, %v2512_v42 }
 0x922   :  { %v2909_v56 = vpop.permute.xlu0 %2908 }
 0x923   :  { %v2914_v15 = vsel %vm251_vm2, %v2909_v56, 0  ;;  %v3057_v11 = vpop.permute.xlu1 %3056  ;;  %8077 = vmatmul.mubr.msk.bf16.vlgmr.msra.gmra.mrb[92].mxu0 %vm251_vm2, %v2520_v29 }
 0x924   :  { %8087 = vmatpush3.bf16.xpose.msra.mxu0 %v2914_v15  ;;  %8088 = vmatprep.mubr.msk.bf16.mxu0 %vm8589_vm1, %v8588_v41 }
 0x925   :  { %8098 = vmatprep.subr.bf16.mxu0 %v8588_v41 }
 0x926   :  { %v2907_v50 = vpop.permute.xlu0 %2906 }
 0x927   :  { %v3159_v57 = vpop.permute.xlu1 %3158 }
 0x929   :  { %v8522_v14 = vpop.eup %8521 }
 0x92a   :  { %v2513_v6 = vmul.f32 %v8522_v14, %v9304_v17  ;;  %v3009_v46 = vpop.permute.xlu0 %3008 }
 0x92b   :  { %v3014_v27 = vsel %vm251_vm2, %v3009_v46, 0  ;;  %8089 = vmatmul.mubr.msk.bf16.vlgmr.msra.gmra.mrb[96].mxu0 %vm251_vm2, %v2907_v50  ;;  %v3157_v20 = vpop.permute.xlu1 %3156 }
 0x92c   :  { %8099 = vmatpush3.bf16.xpose.msra.mxu0 %v3014_v27  ;;  %v2521_v45 = vpack.c.bf16 %v2513_v6, %v2513_v6  ;;  %8100 = vmatprep.mubr.msk.bf16.mxu0 %vm8589_vm1, %v8588_v41 }
 0x92d   :  { %8110 = vmatprep.subr.bf16.mxu0 %v8588_v41 }
 0x92e   :  { %8083 = vmatmul.mubr.msk.bf16.vlgmr.msra.gmra.mrb[100].mxu1 %vm251_vm2, %v2521_v45  ;;  %v3007_v40 = vpop.permute.xlu0 %3006 }
 0x92f   :  { %8093 = vmatpush3.bf16.xpose.msra.mxu1 %v2964_v34  ;;  %8094 = vmatprep.mubr.msk.bf16.mxu1 %vm8589_vm1, %v8588_v41  ;;  %v3259_v49 = vpop.permute.xlu1 %3258 }
 0x930   :  { %8104 = vmatprep.subr.bf16.mxu1 %v8588_v41  ;;  %v3264_v30 = vsel %vm251_vm2, %v3259_v49, 0 }
 0x932   :  { %v3109_v17 = vpop.permute.xlu0 %3108 }
 0x933   :  { %v3114_v33 = vsel %vm251_vm2, %v3109_v17, 0  ;;  %8101 = vmatmul.mubr.msk.bf16.vlgmr.msra.gmra.mrb[100].mxu0 %vm251_vm2, %v3007_v40  ;;  %v3257_v13 = vpop.permute.xlu1 %3256 }
 0x934   :  { %8111 = vmatpush3.bf16.xpose.msra.mxu0 %v3114_v33  ;;  %8112 = vmatprep.mubr.msk.bf16.mxu0 %vm8589_vm1, %v8588_v41 }
 0x935   :  { %8122 = vmatprep.subr.bf16.mxu0 %v8588_v41 }
 0x936   :  { %8095 = vmatmul.mubr.msk.bf16.vlgmr.msra.gmra.mrb[104].mxu1 %vm251_vm2, %v2957_v51  ;;  %v3107_v53 = vpop.permute.xlu0 %3106  ;;  %v3164_v51 = vsel %vm251_vm2, %v3159_v57, 0 }
 0x937   :  { %8105 = vmatpush3.bf16.xpose.msra.mxu1 %v3064_v37  ;;  %8106 = vmatprep.mubr.msk.bf16.mxu1 %vm8589_vm1, %v8588_v41  ;;  %v3411_v44 = vpop.permute.xlu1 %3410 }
 0x938   :  { %8116 = vmatprep.subr.bf16.mxu1 %v8588_v41  ;;  %v3416_v42 = vsel %vm750_vm3, %v3411_v44, 0 }
 0x93a   :  { %v3209_v19 = vpop.permute.xlu0 %3208 }
 0x93b   :  { %v3214_v48 = vsel %vm251_vm2, %v3209_v19, 0  ;;  %8113 = vmatmul.mubr.msk.bf16.vlgmr.msra.gmra.mrb[104].mxu0 %vm251_vm2, %v3107_v53 }
 0x93c   :  { %8123 = vmatpush3.bf16.xpose.msra.mxu0 %v3214_v48  ;;  %8124 = vmatprep.mubr.msk.bf16.mxu0 %vm8589_vm1, %v8588_v41 }
 0x93d   :  { %8134 = vmatprep.subr.bf16.mxu0 %v8588_v41 }
 0x93e   :  { %8107 = vmatmul.mubr.msk.bf16.vlgmr.msra.gmra.mrb[108].mxu1 %vm251_vm2, %v3057_v11  ;;  %v3207_v55 = vpop.permute.xlu0 %3206 }
 0x93f   :  { %8117 = vmatpush3.bf16.xpose.msra.mxu1 %v3164_v51  ;;  %8118 = vmatprep.mubr.msk.bf16.mxu1 %vm8589_vm1, %v8588_v41 }
 0x940   :  { %8128 = vmatprep.subr.bf16.mxu1 %v8588_v41 }
 0x943   :  { %8125 = vmatmul.mubr.msk.bf16.vlgmr.msra.gmra.mrb[108].mxu0 %vm251_vm2, %v3207_v55 }
 0x944   :  { %8135 = vmatpush3.bf16.msra.mxu0 %v3416_v42  ;;  %8136 = vmatprep.mubr.msk.bf16.mxu0 %vm8589_vm1, %v8588_v41 }
 0x945   :  { %8146 = vmatprep.subr.bf16.mxu0 %v8588_v41 }
 0x946   :  { %8119 = vmatmul.mubr.msk.bf16.vlgmr.msra.gmra.mrb[112].mxu1 %vm251_vm2, %v3157_v20 }
 0x947   :  { %8129 = vmatpush3.bf16.xpose.msra.mxu1 %v3264_v30  ;;  %8130 = vmatprep.mubr.msk.bf16.mxu1 %vm8589_vm1, %v8588_v41 }
 0x948   :  { %8140 = vmatprep.subr.bf16.mxu1 %v8588_v41 }
 0x94e   :  { %8131 = vmatmul.mubr.msk.bf16.vlgmr.msra.gmra.mrb[116].mxu1 %vm251_vm2, %v3257_v13 }
 0x94f   :  { %8142 = vmatprep.mubr.msk.bf16.mxu1 %vm8589_vm1, %v8588_v41 }
 0x9b1   :  { %v9414_v29 = vpop.f32.mrb[80].mxu0 }
 0x9b2   :  { %v8042_v56 = vpop.f32.mrb[81].mxu0 }
 0x9b3   :  { %v2567_v15 = vpop.f32.mrb[82].mxu0 }
 0x9b4   :  { %v8043_v11 = vpop.f32.mrb[83].mxu0 }
 0x9b9   :  { %v9416_v50 = vpop.f32.mrb[84].mxu0 }
 0x9ba   :  { %v8054_v57 = vpop.f32.mrb[85].mxu0 }
 0x9bb   :  { %v2663_v14 = vpop.f32.mrb[86].mxu0 }
 0x9bc   :  { %v9418_v6 = vpop.f32.mrb[88].mxu1  ;;  %v8055_v46 = vpop.f32.mrb[87].mxu0 }
 0x9bd   :  { %v8048_v45 = vpop.f32.mrb[89].mxu1 }
 0x9be   :  { %v2615_v34 = vpop.f32.mrb[90].mxu1 }
 0x9bf   :  { %v8049_v20 = vpop.f32.mrb[91].mxu1 }
 0x9c1   :  { %v9422_v40 = vpop.f32.mrb[88].mxu0 }
 0x9c2   :  { %v8066_v17 = vpop.f32.mrb[89].mxu0 }
 0x9c3   :  { %v2759_v33 = vpop.f32.mrb[90].mxu0 }
 0x9c4   :  { %v9424_v49 = vpop.f32.mrb[92].mxu1  ;;  %v8067_v37 = vpop.f32.mrb[91].mxu0 }
 0x9c5   :  { %v8250_v53 = vpack.i.bf16 %v9424_v49, %v9416_v50  ;;  %v8060_v13 = vpop.f32.mrb[93].mxu1 }
 0x9c6   :  { %v2711_v19 = vpop.f32.mrb[94].mxu1 }
 0x9c7   :  { %v8061_v48 = vpop.f32.mrb[95].mxu1 }
 0x9cc   :  { %v9428_v51 = vpop.f32.mrb[96].mxu1 }
 0x9cd   :  { %v8072_v55 = vpop.f32.mrb[97].mxu1 }
 0x9ce   :  { %v2807_v42 = vpop.f32.mrb[98].mxu1 }
 0x9cf   :  { %v8073_v30 = vpop.f32.mrb[99].mxu1 }
 0x9f6   :  { %v9432_v56 = vpop.f32.mrb[92].mxu0 }
 0x9f7   :  { %v8078_v15 = vpop.f32.mrb[93].mxu0 }
 0x9f8   :  { %v2855_v11 = vpop.f32.mrb[94].mxu0 }
 0x9f9   :  { %v8079_v57 = vpop.f32.mrb[95].mxu0 }
 0x9fe   :  { %v2950_v14 = vpop.f32.mrb[96].mxu0 }
 0x9ff   :  { %v9434_v46 = vmul.f32 0.35355338, %v2950_v14  ;;  %v8090_v45 = vpop.f32.mrb[97].mxu0 }
 0xa00   :  { %v2953_v34 = vpop.f32.mrb[98].mxu0 }
 0xa01   :  { %v9436_v20 = vpop.f32.mrb[100].mxu1  ;;  %v8091_v17 = vpop.f32.mrb[99].mxu0  ;;  %v3314_v33 = vsel %vm251_vm2, %v9434_v46, -inf }
 0xa02   :  { %v8084_v13 = vpop.f32.mrb[101].mxu1  ;;  %3315 = vmax.xlane.f32.xlu0 %v3314_v33 }
 0xa03   :  { %v2903_v19 = vpop.f32.mrb[102].mxu1 }
 0xa04   :  { %v8085_v48 = vpop.f32.mrb[103].mxu1 }
 0xa06   :  { %v3050_v55 = vpop.f32.mrb[100].mxu0 }
 0xa07   :  { %v3308_v42 = vmul.f32 0.35355338, %v3050_v55  ;;  %v8102_v30 = vpop.f32.mrb[101].mxu0 }
 0xa08   :  { %v3053_v15 = vpop.f32.mrb[102].mxu0 }
 0xa09   :  { %v3000_v11 = vpop.f32.mrb[104].mxu1  ;;  %v8103_v57 = vpop.f32.mrb[103].mxu0  ;;  %v3320_v14 = vsel %vm251_vm2, %v3308_v42, -inf }
 0xa0a   :  { %v3307_v45 = vmul.f32 0.35355338, %v3000_v11  ;;  %v8096_v34 = vpop.f32.mrb[105].mxu1  ;;  %3321 = vmax.xlane.f32.xlu0 %v3320_v14 }
 0xa0b   :  { %v3003_v17 = vpop.f32.mrb[106].mxu1 }
 0xa0c   :  { %v8097_v7 = vpop.f32.mrb[107].mxu1  ;;  %v3317_v44 = vsel %vm251_vm2, %v3307_v45, -inf }
 0xa0d   :  { %3318 = vmax.xlane.f32.xlu1 %v3317_v44 }
 0xa0e   :  { %v3150_v13 = vpop.f32.mrb[104].mxu0 }
 0xa0f   :  { %v9444_v33 = vmul.f32 0.35355338, %v3150_v13  ;;  %v8114_v19 = vpop.f32.mrb[105].mxu0 }
 0xa10   :  { %v3153_v48 = vpop.f32.mrb[106].mxu0 }
 0xa11   :  { %v3100_v55 = vpop.f32.mrb[108].mxu1  ;;  %v8115_v30 = vpop.f32.mrb[107].mxu0  ;;  %v3326_v15 = vsel %vm251_vm2, %v9444_v33, -inf }
 0xa12   :  { %v3309_v57 = vmul.f32 0.35355338, %v3100_v55  ;;  %v8108_v37 = vpop.f32.mrb[109].mxu1  ;;  %3327 = vmax.xlane.f32.xlu1 %v3326_v15 }
 0xa13   :  { %v3103_v11 = vpop.f32.mrb[110].mxu1 }
 0xa14   :  { %v8109_v14 = vpop.f32.mrb[111].mxu1  ;;  %v3323_v7 = vsel %vm251_vm2, %v3309_v57, -inf }
 0xa15   :  { %3324 = vmax.xlane.f32.xlu0 %v3323_v7 }
 0xa16   :  { %v3250_v34 = vpop.f32.mrb[108].mxu0 }
 0xa17   :  { %v9449_v44 = vmul.f32 0.35355338, %v3250_v34  ;;  %v8126_v17 = vpop.f32.mrb[109].mxu0 }
 0xa18   :  { %v3253_v13 = vpop.f32.mrb[110].mxu0 }
 0xa19   :  { %v3200_v19 = vpop.f32.mrb[112].mxu1  ;;  %v8127_v48 = vpop.f32.mrb[111].mxu0  ;;  %v3332_v30 = vsel %vm251_vm2, %v9449_v44, -inf }
 0xa1a   :  { %v3311_v10 = vmul.f32 0.35355338, %v3200_v19  ;;  %v8120_v0 = vpop.f32.mrb[113].mxu1  ;;  %3333 = vmax.xlane.f32.xlu1 %v3332_v30 }
 0xa1b   :  { %v3203_v37 = vpop.f32.mrb[114].mxu1 }
 0xa1c   :  { %v8121_v55 = vpop.f32.mrb[115].mxu1  ;;  %v3329_v15 = vsel %vm251_vm2, %v3311_v10, -inf }
 0xa1d   :  { %3330 = vmax.xlane.f32.xlu0 %v3329_v15 }
 0xa21   :  { %v3300_v11 = vpop.f32.mrb[116].mxu1 }
 0xa22   :  { %v3313_v14 = vmul.f32 0.35355338, %v3300_v11  ;;  %v8132_v7 = vpop.f32.mrb[117].mxu1 }
 0xa23   :  { %v3303_v34 = vpop.f32.mrb[118].mxu1 }
 0xa24   :  { %v8133_v27 = vpop.f32.mrb[119].mxu1  ;;  %v3335_v17 = vsel %vm251_vm2, %v3313_v14, -inf }
 0xa25   :  { %3336 = vmax.xlane.f32.xlu0 %v3335_v17 }
 0xa2b   :  { %3506 = vrot.lane.b32.xlu1 %v8775_v54, %s8600_s0 }
 0xa2f   :  { %3554 = vrot.lane.b32.xlu1 %v8778_v58, %s8600_s0 }
 0xa3b   :  { %3458 = vrot.lane.b32.xlu0 %v8772_v52, %s8600_s0 }
 0xa8f   :  { %v3316_v0 = vpop.xlane.xlu0 %3315 }
 0xa90   :  { %v3338_v13 = vsub.f32 %v9434_v46, %v3316_v0 }
 0xa92   :  { %v3346_v19 = vmul.f32 1.442695, %v3338_v13 }
 0xa94   :  { %8523 = vpow2.f32 %v3346_v19 }
 0xa97   :  { %v3322_v48 = vpop.xlane.xlu0 %3321 }
 0xa98   :  { %v3340_v30 = vsub.f32 %v3308_v42, %v3322_v48 }
 0xa9a   :  { %v3350_v27 = vmul.f32 1.442695, %v3340_v30  ;;  %v3319_v37 = vpop.xlane.xlu1 %3318 }
 0xa9b   :  { %v3339_v55 = vsub.f32 %v3307_v45, %v3319_v37 }
 0xa9c   :  { %8525 = vpow2.f32 %v3350_v27 }
 0xa9d   :  { %v3348_v15 = vmul.f32 1.442695, %v3339_v55 }
 0xa9e   :  { %v9462_v11 = vpop.eup %8523 }
 0xa9f   :  { %8527 = vpow2.f32 %v3348_v15  ;;  %v3362_v54 = vsel %vm251_vm2, %v9462_v11, 0.0  ;;  %v3328_v30 = vpop.xlane.xlu1 %3327 }
 0xaa0   :  { %3363 = vadd.xlane.f32.xlu1 %v3362_v54  ;;  %v3342_v27 = vsub.f32 %v9444_v33, %v3328_v30 }
 0xaa2   :  { %v3325_v52 = vpop.xlane.xlu0 %3324  ;;  %v3354_v55 = vmul.f32 1.442695, %v3342_v27 }
 0xaa3   :  { %v3341_v58 = vsub.f32 %v3309_v57, %v3325_v52 }
 0xaa5   :  { %v3352_v7 = vmul.f32 1.442695, %v3341_v58 }
 0xaa6   :  { %v9466_v46 = vpop.eup %8525 }
 0xaa7   :  { %8529 = vpow2.f32 %v3352_v7  ;;  %v3368_v42 = vsel %vm251_vm2, %v9466_v46, 0.0  ;;  %v3334_v37 = vpop.xlane.xlu1 %3333 }
 0xaa8   :  { %3369 = vadd.xlane.f32.xlu1 %v3368_v42  ;;  %v3344_v15 = vsub.f32 %v9449_v44, %v3334_v37  ;;  %8531 = vpow2.f32 %v3354_v55 }
 0xaa9   :  { %v9470_v45 = vpop.eup %8527 }
 0xaaa   :  { %v3365_v34 = vsel %vm251_vm2, %v9470_v45, 0.0  ;;  %v3331_v17 = vpop.xlane.xlu0 %3330  ;;  %v3358_v54 = vmul.f32 1.442695, %v3344_v15 }
 0xaab   :  { %3366 = vadd.xlane.f32.xlu0 %v3365_v34  ;;  %v3343_v52 = vsub.f32 %v3311_v10, %v3331_v17  ;;  %v3507_v12 = vpop.permute.xlu1 %3506 }
 0xaac   :  { %8533 = vpow2.f32 %v3358_v54  ;;  %v3512_v62 = vsel %vm750_vm3, %v3507_v12, 0 }
 0xaad   :  { %v3356_v58 = vmul.f32 1.442695, %v3343_v52 }
 0xaaf   :  { %8535 = vpow2.f32 %v3356_v58  ;;  %v3555_v59 = vpop.permute.xlu1 %3554 }
 0xab0   :  { %v3560_v27 = vsel %vm750_vm3, %v3555_v59, 0 }
 0xab1   :  { %v9474_v0 = vpop.eup %8529 }
 0xab2   :  { %v3337_v13 = vpop.xlane.xlu0 %3336  ;;  %v3371_v57 = vsel %vm251_vm2, %v9474_v0, 0.0  ;;  %v9486_v42 = vpop.eup %8531 }
 0xab3   :  { %3372 = vadd.xlane.f32.xlu0 %v3371_v57  ;;  %v3345_v7 = vsub.f32 %v3313_v14, %v3337_v13  ;;  %v3374_v33 = vsel %vm251_vm2, %v9486_v42, 0.0 }
 0xab6   :  { %v3459_v19 = vpop.permute.xlu0 %3458  ;;  %v9490_v34 = vpop.eup %8533 }
 0xab7   :  { %v3464_v48 = vsel %vm750_vm3, %v3459_v19, 0 }
 0xab8   :  { %8141 = vmatpush3.bf16.msra.mxu1 %v3464_v48 }
 0xab9   :  { %3650 = vrot.lane.b32.xlu1 %v8784_v63, %s8600_s0  ;;  %8152 = vmatprep.subr.bf16.mxu1 %v8588_v41  ;;  %v3360_v63 = vmul.f32 1.442695, %v3345_v7  ;;  %v9494_v44 = vpop.eup %8535 }
 0xaba   :  { %v3377_v10 = vsel %vm251_vm2, %v9494_v44, 0.0 }
 0xabb   :  { %8537 = vpow2.f32 %v3360_v63 }
 0xac5   :  { %v9498_v14 = vpop.eup %8537 }
 0xac6   :  { %v3383_v17 = vsel %vm251_vm2, %v9498_v14, 0.0 }
 0xac9   :  { %3602 = vrot.lane.b32.xlu0 %v8781_v60, %s8600_s0  ;;  %v3380_v60 = vsel %vm251_vm2, %v9490_v34, 0.0 }
 0xadd   :  { %3375 = vadd.xlane.f32.xlu1 %v3374_v33 }
 0xae1   :  { %3381 = vadd.xlane.f32.xlu1 %v3380_v60 }
 0xae8   :  { %3378 = vadd.xlane.f32.xlu0 %v3377_v10 }
 0xaec   :  { %3384 = vadd.xlane.f32.xlu0 %v3383_v17 }
 0xaf2   :  { %3746 = vrot.lane.b32.xlu1 %v8790_v3, %s8600_s0  ;;  %v10766_v3 = vpack.i.bf16 %v9418_v6, %v9414_v29 }
 0xaf6   :  { %8241 = vrot.lane.b32.xlu1 %v8240_v1, %s8601_s30 }
 0xafa   :  { %8251 = vrot.lane.b32.xlu1 %v8250_v53, %s8602_s18 }
 0xb02   :  { %3698 = vrot.lane.b32.xlu0 %v8787_v2, %s8600_s0 }
 0xb06   :  { %8236 = vrot.lane.b32.xlu0 %v8235_v18, %s8601_s30 }
 0xb0a   :  { %8246 = vrot.lane.b32.xlu0 %v10766_v3, %s8602_s18 }
 0xb2d   :  { %v3364_v1 = vpop.xlane.xlu1 %3363 }
 0xb2e   :  { %8539 = vrcp.f32 %v3364_v1 }
 0xb35   :  { %v3370_v13 = vpop.xlane.xlu1 %3369 }
 0xb36   :  { %8541 = vrcp.f32 %v3370_v13 }
 0xb38   :  { %v8540_v50 = vpop.eup %8539  ;;  %v3367_v49 = vpop.xlane.xlu0 %3366 }
 0xb39   :  { %v3394_v2 = vmul.f32 %v8540_v50, %v9462_v11  ;;  %8543 = vrcp.f32 %v3367_v49  ;;  %v3651_v37 = vpop.permute.xlu1 %3650 }
 0xb3a   :  { %v3656_v15 = vsel %vm750_vm3, %v3651_v37, 0  ;;  %v10768_v37 = vpack.i.bf16 %v9238_v8, %v9232_v28  ;;  %v10771_v28 = vpack.i.bf16 %v9436_v20, %v9432_v56 }
 0xb3b   :  { %v3402_v53 = vpack.c.bf16 %v3394_v2, %v3394_v2 }
 0xb3d   :  { %8137 = vmatmul.mubr.msk.bf16.vlgmr.msra.gmra.mrb[112].mxu0 %vm251_vm2, %v3402_v53  ;;  %v10767_v53 = vmov 0  }
 0xb3e   :  { %8147 = vmatpush3.bf16.msra.mxu0 %v3512_v62  ;;  %8148 = vmatprep.mubr.msk.bf16.mxu0 %vm8589_vm1, %v8588_v41 }
 0xb3f   :  { %8158 = vmatprep.subr.bf16.mxu0 %v8588_v41 }
 0xb40   :  { %v8542_v36 = vpop.eup %8541  ;;  %v3373_v18 = vpop.xlane.xlu0 %3372 }
 0xb41   :  { %v3396_v29 = vmul.f32 %v8542_v36, %v9466_v46  ;;  %8545 = vrcp.f32 %v3373_v18 }
 0xb43   :  { %v8544_v6 = vpop.eup %8543  ;;  %v3404_v57 = vpack.c.bf16 %v3396_v29, %v3396_v29  ;;  %v8297_v29 = vld [vmem:[%s10745_s5] sm:$0xff]  }
 0xb44   :  { %v3395_v11 = vmul.f32 %v8544_v6, %v9470_v45  ;;  %v3603_v19 = vpop.permute.xlu0 %3602 }
 0xb45   :  { %v3608_v48 = vsel %vm750_vm3, %v3603_v19, 0  ;;  %8149 = vmatmul.mubr.msk.bf16.vlgmr.msra.gmra.mrb[116].mxu0 %vm251_vm2, %v3404_v57 }
 0xb46   :  { %8159 = vmatpush3.bf16.msra.mxu0 %v3608_v48  ;;  %v3403_v30 = vpack.c.bf16 %v3395_v11, %v3395_v11  ;;  %8160 = vmatprep.mubr.msk.bf16.mxu0 %vm8589_vm1, %v8588_v41 }
 0xb47   :  { %8170 = vmatprep.subr.bf16.mxu0 %v8588_v41 }
 0xb48   :  { %8143 = vmatmul.mubr.msk.bf16.vlgmr.msra.gmra.mrb[120].mxu1 %vm251_vm2, %v3403_v30 }
 0xb49   :  { %8153 = vmatpush3.bf16.msra.mxu1 %v3560_v27  ;;  %8154 = vmatprep.mubr.msk.bf16.mxu1 %vm8589_vm1, %v8588_v41 }
 0xb4a   :  { %8164 = vmatprep.subr.bf16.mxu1 %v8588_v41 }
 0xb4b   :  { %v8546_v46 = vpop.eup %8545 }
 0xb4c   :  { %v3397_v45 = vmul.f32 %v8546_v46, %v9474_v0 }
 0xb4e   :  { %v3405_v55 = vpack.c.bf16 %v3397_v45, %v3397_v45 }
 0xb50   :  { %8155 = vmatmul.mubr.msk.bf16.vlgmr.msra.gmra.mrb[124].mxu1 %vm251_vm2, %v3405_v55 }
 0xb51   :  { %8165 = vmatpush3.bf16.msra.mxu1 %v3656_v15  ;;  %8166 = vmatprep.mubr.msk.bf16.mxu1 %vm8589_vm1, %v8588_v41 }
 0xb52   :  { %8176 = vmatprep.subr.bf16.mxu1 %v8588_v41 }
 0xb6a   :  { %v3376_v54 = vpop.xlane.xlu1 %3375 }
 0xb6b   :  { %8547 = vrcp.f32 %v3376_v54 }
 0xb6e   :  { %v3382_v52 = vpop.xlane.xlu1 %3381 }
 0xb6f   :  { %8549 = vrcp.f32 %v3382_v52 }
 0xb72   :  { %v3747_v1 = vpop.permute.xlu1 %3746 }
 0xb73   :  { %v3752_v49 = vsel %vm750_vm3, %v3747_v1, 0 }
 0xb75   :  { %v8548_v58 = vpop.eup %8547  ;;  %v3379_v7 = vpop.xlane.xlu0 %3378 }
 0xb76   :  { %v3398_v0 = vmul.f32 %v8548_v58, %v9486_v42  ;;  %8551 = vrcp.f32 %v3379_v7  ;;  %v10769_v58 = vpack.i.bf16 %v9428_v51, %v9422_v40 }
 0xb78   :  { %v3406_v63 = vpack.c.bf16 %v3398_v0, %v3398_v0  ;;  %v10770_v0 = vpack.i.bf16 %v9246_v47, %v9242_v35 }
 0xb79   :  { %v8550_v33 = vpop.eup %8549  ;;  %v3385_v60 = vpop.xlane.xlu0 %3384 }
 0xb7a   :  { %8553 = vrcp.f32 %v3385_v60  ;;  %8161 = vmatmul.mubr.msk.bf16.vlgmr.msra.gmra.mrb[120].mxu0 %vm251_vm2, %v3406_v63  ;;  %v3400_v10 = vmul.f32 %v8550_v33, %v9490_v34 }
 0xb7b   :  { %8172 = vmatprep.mubr.msk.bf16.mxu0 %vm8589_vm1, %v8588_v41 }
 0xb7c   :  { %v3408_v59 = vpack.c.bf16 %v3400_v10, %v3400_v10 }
 0xb7d   :  { %v3699_v17 = vpop.permute.xlu0 %3698 }
 0xb7e   :  { %v3704_v3 = vsel %vm750_vm3, %v3699_v17, 0 }
 0xb7f   :  { %8171 = vmatpush3.bf16.msra.mxu0 %v3704_v3 }
 0xb80   :  { %v8552_v12 = vpop.eup %8551  ;;  %8182 = vmatprep.subr.bf16.mxu0 %v8297_v29 }
 0xb81   :  { %v3399_v42 = vmul.f32 %v8552_v12, %v9494_v44 }
 0xb82   :  { %8173 = vmatmul.mubr.msk.bf16.vlgmr.msra.gmra.mrb[124].mxu0 %vm251_vm2, %v3408_v59 }
 0xb83   :  { %v3407_v13 = vpack.c.bf16 %v3399_v42, %v3399_v42  ;;  %8183 = vmatpush3.bf16.msra.mxu0 %v8297_v29 }
 0xb84   :  { %v8554_v50 = vpop.eup %8553 }
 0xb85   :  { %8167 = vmatmul.mubr.msk.bf16.vlgmr.msra.gmra.mrb[128].mxu1 %vm251_vm2, %v3407_v13  ;;  %v3401_v34 = vmul.f32 %v8554_v50, %v9498_v14  ;;  %v8298_v14 = vld [vmem:[%s10745_s5 + $0x8] sm:$0xff]   ;;  %v8237_v50 = vpop.permute.xlu0 %8236 }
 0xb86   :  { %8177 = vmatpush3.bf16.msra.mxu1 %v3752_v49  ;;  %8178 = vmatprep.mubr.msk.bf16.mxu1 %vm8589_vm1, %v8588_v41 }
 0xb87   :  { %v3409_v2 = vpack.c.bf16 %v3401_v34, %v3401_v34  ;;  %8184 = vmatprep.subr.bf16.mxu0 %v8298_v14  ;;  %v8242_v34 = vpop.permute.xlu1 %8241 }
 0xb88   :  { %8185 = vmatpush3.bf16.msra.mxu0 %v8298_v14 }
 0xb89   :  { %v8247_v49 = vpop.permute.xlu0 %8246 }
 0xb8d   :  { %8179 = vmatmul.mubr.msk.bf16.vlgmr.msra.gmra.mrb[132].mxu1 %vm251_vm2, %v3409_v2  ;;  %v8239_v2 = vunpack.i.h.bf16 %v8237_v50 }
 0xb8e   :  { %4487 = vmatprep.mubr.bf16.mxu1 %v10767_v53 }
 0xb8f   :  { %v3891_v29 = vsel %vm251_vm2, %v9036_v4, %v8239_v2 }
 0xc10   :  { %v3452_v44 = vpop.f32.mrb[112].mxu0 }
 0xc11   :  { %v8138_v62 = vpop.f32.mrb[113].mxu0 }
 0xc12   :  { %v3455_v36 = vpop.f32.mrb[114].mxu0  ;;  %v8249_v62 = vunpack.i.h.bf16 %v8247_v49 }
 0xc13   :  { %v8139_v18 = vpop.f32.mrb[115].mxu0  ;;  %v8248_v36 = vunpack.i.l.bf16 %v8247_v49 }
 0xc18   :  { %v3548_v6 = vpop.f32.mrb[116].mxu0 }
 0xc19   :  { %v8150_v57 = vpop.f32.mrb[117].mxu0 }
 0xc1a   :  { %v3551_v11 = vpop.f32.mrb[118].mxu0 }
 0xc1b   :  { %v3500_v19 = vpop.f32.mrb[120].mxu1  ;;  %v8151_v48 = vpop.f32.mrb[119].mxu0 }
 0xc1c   :  { %v8255_v30 = vpack.i.bf16 %v3500_v19, %v3452_v44  ;;  %v8144_v27 = vpop.f32.mrb[121].mxu1  ;;  %v8238_v44 = vunpack.i.l.bf16 %v8237_v50  ;;  %v3900_v19 = vsel %vm3898_vm4, %v3891_v29, %v8249_v62  ;;  %v8252_v48 = vpop.permute.xlu1 %8251 }
 0xc1d   :  { %v3503_v46 = vpop.f32.mrb[122].mxu1 }
 0xc1e   :  { %8256 = vrot.lane.b32.xlu0 %v8255_v30, %s8603_s2  ;;  %v8145_v45 = vpop.f32.mrb[123].mxu1 }
 0xc1f   :  { %v8244_v45 = vunpack.i.h.bf16 %v8242_v34 }
 0xc22   :  { %8266 = vrot.lane.b32.xlu0 %v10768_v37, %s8601_s30  ;;  %v8243_v37 = vunpack.i.l.bf16 %v8242_v34 }
 0xc23   :  { %v3596_v55 = vpop.f32.mrb[124].mxu1 }
 0xc24   :  { %v8260_v15 = vpack.i.bf16 %v3596_v55, %v3548_v6  ;;  %v8156_v54 = vpop.f32.mrb[125].mxu1  ;;  %v3890_v6 = vsel %vm251_vm2, %v9034_v61, %v8238_v44  ;;  %v8254_v55 = vunpack.i.h.bf16 %v8252_v48  ;;  %v3893_v61 = vsel %vm251_vm2, %v9042_v16, %v8244_v45 }
 0xc25   :  { %v3599_v52 = vpop.f32.mrb[126].mxu1  ;;  %v3899_v11 = vsel %vm3898_vm4, %v3890_v6, %v8248_v36  ;;  %v3892_v54 = vsel %vm251_vm2, %v9038_v5, %v8243_v37 }
 0xc26   :  { %8276 = vrot.lane.b32.xlu0 %v10769_v58, %s8602_s18  ;;  %8261 = vrot.lane.b32.xlu1 %v8260_v15, %s8603_s2  ;;  %v8157_v7 = vpop.f32.mrb[127].mxu1  ;;  %v8253_v15 = vunpack.i.l.bf16 %v8252_v48 }
 0xc28   :  { %v3901_v7 = vsel %vm3898_vm4, %v3892_v54, %v8253_v15 }
 0xc2a   :  { %8271 = vrot.lane.b32.xlu1 %v10770_v0, %s8601_s30  ;;  %v3902_v0 = vsel %vm3898_vm4, %v3893_v61, %v8254_v55 }
 0xc2e   :  { %8281 = vrot.lane.b32.xlu1 %v10771_v28, %s8602_s18 }
 0xc4d   :  { %v3644_v8 = vpop.f32.mrb[120].mxu0 }
 0xc4e   :  { %v8162_v63 = vpop.f32.mrb[121].mxu0 }
 0xc4f   :  { %v3647_v33 = vpop.f32.mrb[122].mxu0 }
 0xc50   :  { %v8163_v60 = vpop.f32.mrb[123].mxu0 }
 0xc55   :  { %v3740_v10 = vpop.f32.mrb[124].mxu0 }
 0xc56   :  { %v8174_v40 = vpop.f32.mrb[125].mxu0 }
 0xc57   :  { %v3743_v51 = vpop.f32.mrb[126].mxu0 }
 0xc58   :  { %v3692_v17 = vpop.f32.mrb[128].mxu1  ;;  %v8175_v3 = vpop.f32.mrb[127].mxu0 }
 0xc59   :  { %v8285_v12 = vpack.i.bf16 %v3692_v17, %v3644_v8  ;;  %v8168_v59 = vpop.f32.mrb[129].mxu1 }
 0xc5a   :  { %v3695_v42 = vpop.f32.mrb[130].mxu1 }
 0xc5b   :  { %8286 = vrot.lane.b32.xlu0 %v8285_v12, %s8603_s2  ;;  %v8169_v35 = vpop.f32.mrb[131].mxu1 }
 0xc60   :  { %v3788_v47 = vpop.f32.mrb[132].mxu1 }
 0xc61   :  { %v8290_v1 = vpack.i.bf16 %v3788_v47, %v3740_v10  ;;  %v8180_v13 = vpop.f32.mrb[133].mxu1 }
 0xc62   :  { %v3791_v56 = vpop.f32.mrb[134].mxu1 }
 0xc63   :  { %v8181_v20 = vpop.f32.mrb[135].mxu1  ;;  %8291 = vrot.lane.b32.xlu1 %v8290_v1, %s8603_s2 }
 0xc90   :  { %v8257_v18 = vpop.permute.xlu0 %8256 }
 0xc91   :  { %v8259_v57 = vunpack.i.h.bf16 %v8257_v18  ;;  %v8258_v14 = vunpack.i.l.bf16 %v8257_v18 }
 0xc93   :  { %v3908_v30 = vsel %vm3907_vm5, %v3899_v11, %v8258_v14  ;;  %v3909_v27 = vsel %vm3907_vm5, %v3900_v19, %v8259_v57 }
 0xc94   :  { %v3916_v46 = vpack.c.bf16 %v3909_v27, %v3908_v30  ;;  %v8267_v33 = vpop.permute.xlu0 %8266 }
 0xc95   :  { %v8269_v10 = vunpack.i.h.bf16 %v8267_v33  ;;  %v8268_v16 = vunpack.i.l.bf16 %v8267_v33 }
 0xc96   :  { %8186 = vmatprep.mubr.msk.bf16.mxu0 %vm162_vm0, %v3916_v46 }
 0xc97   :  { %v3895_v3 = vsel %vm251_vm2, %v9044_v25, %v8269_v10  ;;  %v3894_v12 = vsel %vm251_vm2, %v9040_v9, %v8268_v16 }
 0xc98   :  { %v8262_v4 = vpop.permute.xlu1 %8261  ;;  %v8277_v60 = vpop.permute.xlu0 %8276 }
 0xc99   :  { %v8264_v52 = vunpack.i.h.bf16 %v8262_v4  ;;  %v8263_v58 = vunpack.i.l.bf16 %v8262_v4  ;;  %v8279_v51 = vunpack.i.h.bf16 %v8277_v60  ;;  %v8278_v5 = vunpack.i.l.bf16 %v8277_v60 }
 0xc9b   :  { %v3911_v28 = vsel %vm3907_vm5, %v3902_v0, %v8264_v52  ;;  %v3910_v8 = vsel %vm3907_vm5, %v3901_v7, %v8263_v58  ;;  %v3903_v35 = vsel %vm3898_vm4, %v3894_v12, %v8278_v5  ;;  %v3904_v47 = vsel %vm3898_vm4, %v3895_v3, %v8279_v51 }
 0xc9c   :  { %v3917_v63 = vpack.c.bf16 %v3911_v28, %v3910_v8  ;;  %v8272_v40 = vpop.permute.xlu1 %8271 }
 0xc9d   :  { %v8274_v50 = vunpack.i.h.bf16 %v8272_v40  ;;  %v8273_v49 = vunpack.i.l.bf16 %v8272_v40 }
 0xc9e   :  { %8187 = vmatmul.mubr.msk.bf16.vlgmr.msra.gmra.mrb[128].mxu0 %vm162_vm0, %v3917_v63 }
 0xc9f   :  { %v3897_v9 = vsel %vm251_vm2, %v9050_v43, %v8274_v50  ;;  %v3896_v44 = vsel %vm251_vm2, %v9046_v26, %v8273_v49  ;;  %v7115_v43 = vld [vmem:[%s10746_s6] ss:$0 sm:$0xff] }
 0xca0   :  { %v8282_v1 = vpop.permute.xlu1 %8281 }
 0xca1   :  { %v8284_v34 = vunpack.i.h.bf16 %v8282_v1  ;;  %v8283_v2 = vunpack.i.l.bf16 %v8282_v1 }
 0xca3   :  { %v3905_v18 = vsel %vm3898_vm4, %v3896_v44, %v8283_v2  ;;  %v3906_v29 = vsel %vm3898_vm4, %v3897_v9, %v8284_v34  ;;  %v4167_v9 = vld [vmem:[%s10747_s9] sm:$0xff] }
 0xca4   :  { %v4175_v44 = vld [vmem:[%s10747_s9 + $0x40] sm:$0xff] }
 0xccd   :  { %v8287_v17 = vpop.permute.xlu0 %8286 }
 0xcce   :  { %v8289_v59 = vunpack.i.h.bf16 %v8287_v17  ;;  %v8288_v42 = vunpack.i.l.bf16 %v8287_v17 }
 0xcd0   :  { %v3912_v13 = vsel %vm3907_vm5, %v3903_v35, %v8288_v42  ;;  %v3913_v56 = vsel %vm3907_vm5, %v3904_v47, %v8289_v59 }
 0xcd1   :  { %v3918_v20 = vpack.c.bf16 %v3913_v56, %v3912_v13 }
 0xcd3   :  { %8190 = vmatprep.mubr.msk.bf16.mxu0 %vm162_vm0, %v3918_v20 }
 0xcd5   :  { %v8292_v25 = vpop.permute.xlu1 %8291 }
 0xcd6   :  { %v8294_v62 = vunpack.i.h.bf16 %v8292_v25  ;;  %v8293_v36 = vunpack.i.l.bf16 %v8292_v25 }
 0xcd8   :  { %v3915_v6 = vsel %vm3907_vm5, %v3906_v29, %v8294_v62  ;;  %v3914_v57 = vsel %vm3907_vm5, %v3905_v18, %v8293_v36  ;;  %v4168_v62 = vld [vmem:[%s10747_s9 + $0x8] sm:$0xff]  ;;  %v7125_v36 = vcombine.high %v4167_v9, %v4175_v44  ;;  %v7124_v29 = vcombine.low %v4167_v9, %v4175_v44 }
 0xcd9   :  { %v3919_v14 = vpack.c.bf16 %v3915_v6, %v3914_v57  ;;  %v4176_v18 = vld [vmem:[%s10747_s9 + $0x48] sm:$0xff] }
 0xcda   :  { %v7126_v6 = vcombine.low %v4168_v62, %v4176_v18  ;;  %v7127_v57 = vcombine.high %v4168_v62, %v4176_v18  ;;  %4455 = vmatprep.subr.bf16.mxu1 %v7125_v36  ;;  %v9762_v18 = vld [vmem:[%s10748_s7] ss:$0 sm:$0xff] }
 0xcdb   :  { %8191 = vmatmul.mubr.msk.bf16.gmra.mrb[132].mxu0 %vm162_vm0, %v3919_v14  ;;  %4456 = vmatpush1.bf16.msra.mxu1 %v7124_v29  ;;  %v4183_v14 = vld [vmem:[%s10747_s9 + $0x80] sm:$0xff] }
 0xcdc   :  { %4560 = vmatprep.mubr.bf16.mxu0 %v10767_v53  ;;  %4528 = vmatprep.subr.bf16.mxu0 %v7127_v57 }
 0xcdd   :  { %4529 = vmatpush1.bf16.msra.mxu0 %v7126_v6 }
 0xd71   :  { %v8188_v26 = vpop.f32.mrb[128].mxu0 }
 0xd72   :  { %v3989_v11 = vpop.f32.mrb[129].mxu0  ;;  %v3998_v19 = vadd.f32 %v8188_v26, %v7115_v43  ;;  %v4184_v26 = vld [vmem:[%s10747_s9 + $0x88] sm:$0xff] }
 0xd73   :  { %v3990_v48 = vadd.f32 %v7115_v43, %v3989_v11  ;;  %v8189_v30 = vpop.f32.mrb[130].mxu0 }
 0xd74   :  { %v3992_v27 = vpop.f32.mrb[131].mxu0  ;;  %v4022_v37 = vadd.f32 %v3998_v19, %v8733_v21  ;;  %v4001_v55 = vadd.f32 %v8189_v30, %v7115_v43  ;;  %v4192_v19 = vld [vmem:[%s10747_s9 + $0xc8] sm:$0xff] }
 0xd75   :  { %v4020_v46 = vadd.f32 %v3990_v48, %v8737_v23  ;;  %v3993_v45 = vadd.f32 %v7115_v43, %v3992_v27  ;;  %v7142_v30 = vcombine.low %v4184_v26, %v4192_v19  ;;  %v7143_v27 = vcombine.high %v4184_v26, %v4192_v19  ;;  %v9770_v26 = vld [vmem:[%s10749_s8] ss:$0 sm:$0xff]  ;;  %v4185_v19 = vld [vmem:[%s10747_s9 + $0x90] sm:$0xff] }
 0xd76   :  { %v4023_v54 = vadd.f32 %v4001_v55, %v8735_v22  ;;  %v4036_v52 = vsel %vm162_vm0, %v4022_v37, 0.0 }
 0xd77   :  { %v4021_v15 = vadd.f32 %v3993_v45, %v8739_v24  ;;  %v4030_v4 = vsel %vm162_vm0, %v4020_v46, 0.0  ;;  %4530 = vmatprep.subr.bf16.mxu0 %v7143_v27  ;;  %v4186_v27 = vld [vmem:[%s10747_s9 + $0x98] sm:$0xff] }
 0xd78   :  { %4031 = vadd.xlane.f32.xlu0 %v4030_v4  ;;  %v4039_v58 = vsel %vm162_vm0, %v4023_v54, 0.0  ;;  %4531 = vmatpush1.bf16.msra.mxu0 %v7142_v30  ;;  %v4193_v30 = vld [vmem:[%s10747_s9 + $0xd0] sm:$0xff] }
 0xd79   :  { %v4033_v61 = vsel %vm162_vm0, %v4021_v15, 0.0 }
 0xd7a   :  { %4034 = vadd.xlane.f32.xlu1 %v4033_v61 }
 0xd7c   :  { %4037 = vadd.xlane.f32.xlu0 %v4036_v52 }
 0xd80   :  { %4040 = vadd.xlane.f32.xlu0 %v4039_v58 }
 0xdae   :  { %v8192_v23 = vpop.f32.mrb[132].mxu0 }
 0xdaf   :  { %v4014_v7 = vadd.f32 %v8192_v23, %v7115_v43  ;;  %v4005_v21 = vpop.f32.mrb[133].mxu0 }
 0xdb0   :  { %v4006_v0 = vadd.f32 %v7115_v43, %v4005_v21  ;;  %v8193_v28 = vpop.f32.mrb[134].mxu0 }
 0xdb1   :  { %v4017_v24 = vadd.f32 %v8193_v28, %v7115_v43  ;;  %v4008_v8 = vpop.f32.mrb[135].mxu0  ;;  %v9639_v60 = vadd.f32 %v4014_v7, %v8755_v39 }
 0xdb2   :  { %v9636_v63 = vadd.f32 %v4006_v0, %v8746_v31  ;;  %v4009_v33 = vadd.f32 %v7115_v43, %v4008_v8  ;;  %v4191_v43 = vld [vmem:[%s10747_s9 + $0xc0] sm:$0xff] }
 0xdb3   :  { %v9647_v16 = vadd.f32 %v4017_v24, %v8753_v38  ;;  %v4048_v31 = vsel %vm162_vm0, %v9639_v60, 0.0  ;;  %v7141_v11 = vcombine.high %v4183_v14, %v4191_v43  ;;  %v7140_v48 = vcombine.low %v4183_v14, %v4191_v43 }
 0xdb4   :  { %v9642_v22 = vadd.f32 %v4009_v33, %v8748_v32  ;;  %v4042_v10 = vsel %vm162_vm0, %v9636_v63, 0.0 }
 0xdb5   :  { %4043 = vadd.xlane.f32.xlu1 %v4042_v10  ;;  %v4051_v39 = vsel %vm162_vm0, %v9647_v16, 0.0  ;;  %4457 = vmatprep.subr.bf16.mxu1 %v7141_v11  ;;  %v4177_v10 = vld [vmem:[%s10747_s9 + $0x50] sm:$0xff] }
 0xdb6   :  { %v4045_v40 = vsel %vm162_vm0, %v9642_v22, 0.0  ;;  %4458 = vmatpush1.bf16.msra.mxu1 %v7140_v48 }
 0xdb7   :  { %4046 = vadd.xlane.f32.xlu0 %v4045_v40 }
 0xdb9   :  { %4049 = vadd.xlane.f32.xlu1 %v4048_v31 }
 0xdbb   :  { %4052 = vadd.xlane.f32.xlu0 %v4051_v39  ;;  %v4178_v39 = vld [vmem:[%s10747_s9 + $0x58] sm:$0xff] }
 0xe05   :  { %v4032_v32 = vpop.xlane.xlu0 %4031 }
 0xe06   :  { %v4055_v51 = vmul.f32 0.03125, %v4032_v32 }
 0xe07   :  { %v4035_v5 = vpop.xlane.xlu1 %4034 }
 0xe08   :  { %v9655_v17 = vsub.f32 %v4020_v46, %v4055_v51  ;;  %v4056_v3 = vmul.f32 0.03125, %v4035_v5  ;;  %v9738_v51 = vld [vmem:[%s10747_s9 + $0x20] sm:$0xff] }
 0xe09   :  { %v4038_v38 = vpop.xlane.xlu0 %4037  ;;  %v9743_v5 = vld [vmem:[%s10747_s9 + $0x60] sm:$0xff] }
 0xe0a   :  { %v9657_v12 = vsub.f32 %v4021_v15, %v4056_v3  ;;  %v4057_v59 = vmul.f32 0.03125, %v4038_v38  ;;  %v4071_v42 = vmul.f32 %v9655_v17, %v9655_v17  ;;  %v7132_v3 = vcombine.low %v9738_v51, %v9743_v5  ;;  %v9750_v38 = vld [vmem:[%s10747_s9 + $0x28] sm:$0xff] }
 0xe0c   :  { %v9661_v35 = vsub.f32 %v4022_v37, %v4057_v59  ;;  %v4079_v47 = vsel %vm162_vm0, %v4071_v42, 0.0  ;;  %v4072_v1 = vmul.f32 %v9657_v12, %v9657_v12  ;;  %v9755_v59 = vld [vmem:[%s10747_s9 + $0x68] sm:$0xff] }
 0xe0d   :  { %4080 = vadd.xlane.f32.xlu1 %v4079_v47  ;;  %v4041_v13 = vpop.xlane.xlu0 %4040  ;;  %v7134_v42 = vcombine.low %v9750_v38, %v9755_v59 }
 0xe0e   :  { %v4058_v56 = vmul.f32 0.03125, %v4041_v13  ;;  %v4082_v20 = vsel %vm162_vm0, %v4072_v1, 0.0  ;;  %v4073_v50 = vmul.f32 %v9661_v35, %v9661_v35 }
 0xe0f   :  { %4083 = vadd.xlane.f32.xlu0 %v4082_v20 }
 0xe10   :  { %v9669_v49 = vsub.f32 %v4023_v54, %v4058_v56  ;;  %v4085_v34 = vsel %vm162_vm0, %v4073_v50, 0.0 }
 0xe11   :  { %4086 = vadd.xlane.f32.xlu1 %v4085_v34 }
 0xe12   :  { %v4074_v2 = vmul.f32 %v9669_v49, %v9669_v49 }
 0xe14   :  { %v4088_v25 = vsel %vm162_vm0, %v4074_v2, 0.0 }
 0xe15   :  { %4089 = vadd.xlane.f32.xlu0 %v4088_v25 }
 0xe42   :  { %v4044_v46 = vpop.xlane.xlu1 %4043 }
 0xe43   :  { %v4059_v45 = vmul.f32 0.03125, %v4044_v46  ;;  %v4194_v46 = vld [vmem:[%s10747_s9 + $0xd8] sm:$0xff] }
 0xe44   :  { %v4047_v37 = vpop.xlane.xlu0 %4046 }
 0xe45   :  { %v9700_v55 = vsub.f32 %v9636_v63, %v4059_v45  ;;  %v4060_v15 = vmul.f32 0.03125, %v4047_v37 }
 0xe46   :  { %v4050_v4 = vpop.xlane.xlu1 %4049 }
 0xe47   :  { %v9703_v61 = vsub.f32 %v9642_v22, %v4060_v15  ;;  %v4061_v54 = vmul.f32 0.03125, %v4050_v4  ;;  %v4075_v52 = vmul.f32 %v9700_v55, %v9700_v55  ;;  %v4169_v22 = vld [vmem:[%s10747_s9 + $0x10] sm:$0xff]  ;;  %v7145_v4 = vcombine.high %v4185_v19, %v4193_v30 }
 0xe48   :  { %v4053_v58 = vpop.xlane.xlu0 %4052  ;;  %v7128_v40 = vcombine.low %v4169_v22, %v4177_v10  ;;  %v7129_v31 = vcombine.high %v4169_v22, %v4177_v10 }
 0xe49   :  { %v9708_v23 = vsub.f32 %v9639_v60, %v4061_v54  ;;  %v4062_v7 = vmul.f32 0.03125, %v4053_v58  ;;  %v4091_v21 = vsel %vm162_vm0, %v4075_v52, 0.0  ;;  %v4076_v0 = vmul.f32 %v9703_v61, %v9703_v61 }
 0xe4a   :  { %4092 = vadd.xlane.f32.xlu1 %v4091_v21  ;;  %4601 = vmatprep.subr.bf16.mxu1 %v7129_v31  ;;  %v7147_v54 = vcombine.high %v4186_v27, %v4194_v46  ;;  %v7146_v21 = vcombine.low %v4186_v27, %v4194_v46  ;;  %v4182_v27 = vld [vmem:[%s10747_s9 + $0x78] sm:$0xff] }
 0xe4b   :  { %v9714_v28 = vsub.f32 %v9647_v16, %v4062_v7  ;;  %v4094_v24 = vsel %vm162_vm0, %v4076_v0, 0.0  ;;  %v4077_v8 = vmul.f32 %v9708_v23, %v9708_v23  ;;  %v4170_v16 = vld [vmem:[%s10747_s9 + $0x18] sm:$0xff]  ;;  %v7133_v0 = vcombine.high %v9738_v51, %v9743_v5  ;;  %v4189_v51 = vld [vmem:[%s10747_s9 + $0xb0] sm:$0xff] }
 0xe4c   :  { %4095 = vadd.xlane.f32.xlu0 %v4094_v24  ;;  %v7131_v32 = vcombine.high %v4170_v16, %v4178_v39  ;;  %v7135_v24 = vcombine.high %v9750_v38, %v9755_v59  ;;  %v4197_v5 = vld [vmem:[%s10747_s9 + $0xf0] sm:$0xff]  ;;  %v4198_v38 = vld [vmem:[%s10747_s9 + $0xf8] sm:$0xff] }
 0xe4d   :  { %v4097_v63 = vsel %vm162_vm0, %v4077_v8, 0.0  ;;  %v4078_v33 = vmul.f32 %v9714_v28, %v9714_v28 }
 0xe4e   :  { %4098 = vadd.xlane.f32.xlu1 %v4097_v63  ;;  %4674 = vmatprep.subr.bf16.mxu0 %v7131_v32 }
 0xe4f   :  { %v4100_v60 = vsel %vm162_vm0, %v4078_v33, 0.0 }
 0xe50   :  { %4101 = vadd.xlane.f32.xlu0 %v4100_v60 }
 0xe9a   :  { %v4081_v47 = vpop.xlane.xlu1 %4080 }
 0xe9b   :  { %v4103_v1 = vmul.f32 0.03125, %v4081_v47 }
 0xe9c   :  { %v4084_v13 = vpop.xlane.xlu0 %4083 }
 0xe9d   :  { %v4111_v56 = vadd.f32 1e-05, %v4103_v1  ;;  %v4104_v20 = vmul.f32 0.03125, %v4084_v13 }
 0xe9e   :  { %v4087_v50 = vpop.xlane.xlu1 %4086 }
 0xe9f   :  { %8555 = vrsqrt.f32 %v4111_v56  ;;  %v4112_v34 = vadd.f32 1e-05, %v4104_v20  ;;  %v4105_v2 = vmul.f32 0.03125, %v4087_v50 }
 0xea1   :  { %8557 = vrsqrt.f32 %v4112_v34  ;;  %v4113_v25 = vadd.f32 1e-05, %v4105_v2 }
 0xea2   :  { %v4090_v9 = vpop.xlane.xlu0 %4089 }
 0xea3   :  { %8559 = vrsqrt.f32 %v4113_v25  ;;  %v4106_v44 = vmul.f32 0.03125, %v4090_v9 }
 0xea5   :  { %v4114_v62 = vadd.f32 1e-05, %v4106_v44 }
 0xea7   :  { %8561 = vrsqrt.f32 %v4114_v62 }
 0xea9   :  { %v8556_v36 = vpop.eup %8555 }
 0xeaa   :  { %v4127_v29 = vmul.f32 %v8556_v36, %v9655_v17 }
 0xeab   :  { %v8558_v6 = vpop.eup %8557 }
 0xeac   :  { %v4141_v57 = vmul.f32 %v9762_v18, %v4127_v29  ;;  %v4128_v14 = vmul.f32 %v8558_v6, %v9657_v12 }
 0xead   :  { %v8560_v43 = vpop.eup %8559 }
 0xeae   :  { %v4142_v11 = vmul.f32 %v9762_v18, %v4128_v14  ;;  %v9777_v48 = vadd.f32 %v9770_v26, %v4141_v57  ;;  %v4129_v12 = vmul.f32 %v8560_v43, %v9661_v35  ;;  %v7130_v35 = vcombine.low %v4170_v16, %v4178_v39  ;;  %v4195_v43 = vld [vmem:[%s10747_s9 + $0xe0] sm:$0xff] }
 0xeb0   :  { %v9780_v17 = vadd.f32 %v9770_v26, %v4142_v11  ;;  %v4143_v52 = vmul.f32 %v9762_v18, %v4129_v12  ;;  %v4196_v11 = vld [vmem:[%s10747_s9 + $0xe8] sm:$0xff]  ;;  %v4181_v12 = vld [vmem:[%s10747_s9 + $0x70] sm:$0xff] }
 0xeb1   :  { %v8562_v45 = vpop.eup %8561 }
 0xeb2   :  { %v9794_v37 = vpack.c.bf16 %v9780_v17, %v9777_v48  ;;  %v4130_v15 = vmul.f32 %v8562_v45, %v9669_v49  ;;  %v7144_v49 = vcombine.low %v4185_v19, %v4193_v30  ;;  %v9813_v8 = vadd.f32 %v9770_v26, %v4143_v52  ;;  %v4173_v19 = vld [vmem:[%s10747_s9 + $0x30] sm:$0xff]  ;;  %v4174_v30 = vld [vmem:[%s10747_s9 + $0x38] sm:$0xff] }
 0xeb3   :  { %v7136_v59 = vcombine.low %v4173_v19, %v4181_v12  ;;  %v7153_v52 = vcombine.high %v4189_v51, %v4197_v5 }
 0xeb4   :  { %v4144_v58 = vmul.f32 %v9762_v18, %v4130_v15  ;;  %7156 = vmatmul.mubr.msk.bf16.vlgmr.msra.gmra.mrb[136].mxu1 %vm162_vm0, %v9794_v37  ;;  %7160 = vmatmul.mubr.msk.bf16.vlgmr.msra.gmra.mrb[136].mxu0 %vm162_vm0, %v9794_v37 }
 0xeb5   :  { %4497 = vmatprep.mubr.bf16.mxu1 %v10767_v53  ;;  %4570 = vmatprep.mubr.bf16.mxu0 %v10767_v53 }
 0xeb6   :  { %v9806_v7 = vadd.f32 %v9770_v26, %v4144_v58  ;;  %4602 = vmatpush1.bf16.msra.mxu1 %v7128_v40  ;;  %4675 = vmatpush1.bf16.msra.mxu0 %v7130_v35 }
 0xeb7   :  { %4603 = vmatprep.subr.bf16.mxu1 %v7145_v4  ;;  %4676 = vmatprep.subr.bf16.mxu0 %v7147_v54  ;;  %v7137_v4 = vcombine.high %v4173_v19, %v4181_v12  ;;  %v7139_v54 = vcombine.high %v4174_v30, %v4182_v27 }
 0xeb8   :  { %v9817_v63 = vpack.c.bf16 %v9806_v7, %v9813_v8 }
 0xeba   :  { %4604 = vmatpush1.bf16.msra.mxu1 %v7144_v49  ;;  %4677 = vmatpush1.bf16.msra.mxu0 %v7146_v21  ;;  %v8299_v49 = vld [vmem:[%s10750_s11 + $0x40] sm:$0xff]  }
 0xebb   :  { %4747 = vmatprep.subr.bf16.mxu1 %v7133_v0  ;;  %4820 = vmatprep.subr.bf16.mxu0 %v7135_v24  ;;  %v8300_v21 = vld [vmem:[%s10750_s11 + $0xc0] sm:$0xff]   ;;  %v7152_v0 = vcombine.low %v4189_v51, %v4197_v5 }
 0xebc   :  { %7157 = vmatmul.mubr.msk.bf16.gmra.mrb[140].mxu1 %vm162_vm0, %v9817_v63  ;;  %7161 = vmatmul.mubr.msk.bf16.gmra.mrb[140].mxu0 %vm162_vm0, %v9817_v63 }
 0xebd   :  { %4507 = vmatprep.mubr.bf16.mxu1 %v10767_v53  ;;  %4580 = vmatprep.mubr.bf16.mxu0 %v10767_v53 }
 0xed7   :  { %v4093_v33 = vpop.xlane.xlu1 %4092 }
 0xed8   :  { %v4107_v60 = vmul.f32 0.03125, %v4093_v33  ;;  %v8301_v33 = vld [vmem:[%s10750_s11] sm:$0xff]  }
 0xed9   :  { %v4096_v22 = vpop.xlane.xlu0 %4095 }
 0xeda   :  { %v4115_v10 = vadd.f32 1e-05, %v4107_v60  ;;  %v4108_v16 = vmul.f32 0.03125, %v4096_v22  ;;  %v8302_v60 = vld [vmem:[%s10750_s11 + $0x80] sm:$0xff]   ;;  %v8303_v22 = vld [vmem:[%s10750_s11 + $0x48] sm:$0xff]  }
 0xedb   :  { %v4099_v40 = vpop.xlane.xlu1 %4098 }
 0xedc   :  { %8563 = vrsqrt.f32 %v4115_v10  ;;  %v4116_v31 = vadd.f32 1e-05, %v4108_v16  ;;  %v4109_v39 = vmul.f32 0.03125, %v4099_v40  ;;  %v8304_v10 = vld [vmem:[%s10750_s11 + $0xc8] sm:$0xff]  }
 0xedd   :  { %v4102_v32 = vpop.xlane.xlu0 %4101  ;;  %v8305_v16 = vld [vmem:[%s10750_s11 + $0x8] sm:$0xff]  }
 0xede   :  { %8565 = vrsqrt.f32 %v4116_v31  ;;  %v4117_v47 = vadd.f32 1e-05, %v4109_v39  ;;  %v4110_v1 = vmul.f32 0.03125, %v4102_v32  ;;  %v8306_v40 = vld [vmem:[%s10750_s11 + $0x88] sm:$0xff]   ;;  %v8308_v31 = vld [vmem:[%s10750_s11 + $0xd0] sm:$0xff]  }
 0xedf   :  { %v8309_v39 = vld [vmem:[%s10750_s11 + $0x10] sm:$0xff]  }
 0xee0   :  { %8567 = vrsqrt.f32 %v4117_v47  ;;  %v4118_v13 = vadd.f32 1e-05, %v4110_v1  ;;  %v8310_v32 = vld [vmem:[%s10750_s11 + $0x90] sm:$0xff]   ;;  %v8311_v47 = vld [vmem:[%s10750_s11 + $0x58] sm:$0xff]  }
 0xee1   :  { %v8312_v1 = vld [vmem:[%s10750_s11 + $0xd8] sm:$0xff]  }
 0xee2   :  { %8569 = vrsqrt.f32 %v4118_v13  ;;  %v8313_v13 = vld [vmem:[%s10750_s11 + $0x18] sm:$0xff]  }
 0xee6   :  { %v8564_v56 = vpop.eup %8563 }
 0xee7   :  { %v4131_v20 = vmul.f32 %v8564_v56, %v9700_v55  ;;  %v8314_v56 = vld [vmem:[%s10750_s11 + $0x98] sm:$0xff]  }
 0xee8   :  { %v8566_v50 = vpop.eup %8565 }
 0xee9   :  { %v4145_v34 = vmul.f32 %v9762_v18, %v4131_v20  ;;  %v4132_v2 = vmul.f32 %v8566_v50, %v9703_v61  ;;  %v8316_v20 = vld [vmem:[%s10750_s11 + $0xe0] sm:$0xff]  }
 0xeea   :  { %v8568_v25 = vpop.eup %8567  ;;  %v8317_v50 = vld [vmem:[%s10750_s11 + $0x20] sm:$0xff]  }
 0xeeb   :  { %v4146_v9 = vmul.f32 %v9762_v18, %v4132_v2  ;;  %v9830_v62 = vadd.f32 %v9770_v26, %v4145_v34  ;;  %v4133_v29 = vmul.f32 %v8568_v25, %v9708_v23  ;;  %v8318_v34 = vld [vmem:[%s10750_s11 + $0xa0] sm:$0xff]   ;;  %v8319_v2 = vld [vmem:[%s10750_s11 + $0x68] sm:$0xff]  }
 0xeec   :  { %v8570_v44 = vpop.eup %8569  ;;  %v8320_v25 = vld [vmem:[%s10750_s11 + $0xe8] sm:$0xff]  }
 0xeed   :  { %v9833_v36 = vadd.f32 %v9770_v26, %v4146_v9  ;;  %v4134_v6 = vmul.f32 %v8570_v44, %v9714_v28  ;;  %v4147_v57 = vmul.f32 %v9762_v18, %v4133_v29  ;;  %v8321_v9 = vld [vmem:[%s10750_s11 + $0x28] sm:$0xff]   ;;  %v8323_v29 = vld [vmem:[%s10750_s11 + $0x70] sm:$0xff]  }
 0xeee   :  { %v8322_v44 = vld [vmem:[%s10750_s11 + $0xa8] sm:$0xff]  }
 0xeef   :  { %v9839_v55 = vpack.c.bf16 %v9833_v36, %v9830_v62  ;;  %v4148_v61 = vmul.f32 %v9762_v18, %v4134_v6  ;;  %v9853_v28 = vadd.f32 %v9770_v26, %v4147_v57  ;;  %v4187_v18 = vld [vmem:[%s10747_s9 + $0xa0] sm:$0xff]  ;;  %v8325_v6 = vld [vmem:[%s10750_s11 + $0x30] sm:$0xff]   ;;  %v8328_v57 = vld [vmem:[%s10750_s11 + $0xf8] sm:$0xff]  }
 0xef0   :  { %v7149_v46 = vcombine.high %v4187_v18, %v4195_v43  ;;  %v7148_v15 = vcombine.low %v4187_v18, %v4195_v43  ;;  %v8329_v18 = vld [vmem:[%s10750_s11 + $0x38] sm:$0xff]  }
 0xef1   :  { %7158 = vmatmul.mubr.msk.bf16.gmra.mrb[144].mxu1 %vm162_vm0, %v9839_v55  ;;  %7162 = vmatmul.mubr.msk.bf16.gmra.mrb[144].mxu0 %vm162_vm0, %v9839_v55  ;;  %v9850_v23 = vadd.f32 %v9770_v26, %v4148_v61  ;;  %v4188_v26 = vld [vmem:[%s10747_s9 + $0xa8] sm:$0xff]  ;;  %v8327_v61 = vld [vmem:[%s10750_s11 + $0x78] sm:$0xff]  }
 0xef2   :  { %4517 = vmatprep.mubr.bf16.mxu1 %v10767_v53  ;;  %4590 = vmatprep.mubr.bf16.mxu0 %v10767_v53  ;;  %v7151_v45 = vcombine.high %v4188_v26, %v4196_v11  ;;  %v7150_v35 = vcombine.low %v4188_v26, %v4196_v11  ;;  %v8330_v43 = vld [vmem:[%s10750_s11 + $0xb8] sm:$0xff]   ;;  %v8331_v26 = vld [vmem:[%s10750_s11 + $0x140] sm:$0xff]   ;;  %v4203_v11 = vlaneseq }
 0xef3   :  { %v9857_v14 = vpack.c.bf16 %v9850_v23, %v9853_v28 }
 0xef4   :  { %v10079_v19 = vshrl.u32 %v4203_v11, 7 }
 0xef6   :  { %v4205_v12 = vsub.s32 0, %v10079_v19 }
 0xef9   :  { %7159 = vmatmul.mubr.msk.bf16.gmra.mrb[148].mxu1 %vm162_vm0, %v9857_v14  ;;  %7163 = vmatmul.mubr.msk.bf16.gmra.mrb[148].mxu0 %vm162_vm0, %v9857_v14 }
 0xefa   :  { %4633 = vmatprep.mubr.bf16.mxu1 %v10767_v53  ;;  %4706 = vmatprep.mubr.bf16.mxu0 %v10767_v53 }
 0xf01   :  { %7164 = vmatmul.mubr.msk.bf16.vlgmr.msra.gmra.mrb[152].mxu1 %vm162_vm0, %v9794_v37  ;;  %7168 = vmatmul.mubr.msk.bf16.vlgmr.msra.gmra.mrb[152].mxu0 %vm162_vm0, %v9794_v37 }
 0xf02   :  { %4748 = vmatpush1.bf16.msra.mxu1 %v7132_v3  ;;  %4821 = vmatpush1.bf16.msra.mxu0 %v7134_v42  ;;  %v4190_v3 = vld [vmem:[%s10747_s9 + $0xb8] sm:$0xff]  ;;  %v7138_v42 = vcombine.low %v4174_v30, %v4182_v27  ;;  %v4213_v30 = vsub.s32 2, %v10079_v19  ;;  %v10086_v27 = vld [vmem:[%s10751_s10] sm:$0xff] }
 0xf03   :  { %4643 = vmatprep.mubr.bf16.mxu1 %v10767_v53  ;;  %4716 = vmatprep.mubr.bf16.mxu0 %v10767_v53  ;;  %v7155_v58 = vcombine.high %v4190_v3, %v4198_v38  ;;  %v7154_v24 = vcombine.low %v4190_v3, %v4198_v38 }
 0xf04   :  { %4749 = vmatprep.subr.bf16.mxu1 %v7149_v46  ;;  %4822 = vmatprep.subr.bf16.mxu0 %v7151_v45  ;;  %v4209_v46 = vsub.s32 1, %v10079_v19  ;;  %v4217_v45 = vsub.s32 3, %v10079_v19 }
 0xf06   :  { %4750 = vmatpush1.bf16.msra.mxu1 %v7148_v15  ;;  %4823 = vmatpush1.bf16.msra.mxu0 %v7150_v35  ;;  %v10093_v15 = vrot.slane %v10086_v27, %v4205_v12  ;;  %v10098_v35 = vrot.slane %v10086_v27, %v4213_v30 }
 0xf07   :  { %4893 = vmatprep.subr.bf16.mxu1 %v7137_v4  ;;  %4966 = vmatprep.subr.bf16.mxu0 %v7139_v54  ;;  %v10103_v4 = vrot.slane %v10086_v27, %v4209_v46  ;;  %v10108_v54 = vrot.slane %v10086_v27, %v4217_v45 }
 0xf09   :  { %7165 = vmatmul.mubr.msk.bf16.gmra.mrb[156].mxu1 %vm162_vm0, %v9817_v63  ;;  %7169 = vmatmul.mubr.msk.bf16.gmra.mrb[156].mxu0 %vm162_vm0, %v9817_v63 }
 0xf0a   :  { %4653 = vmatprep.mubr.bf16.mxu1 %v10767_v53  ;;  %4726 = vmatprep.mubr.bf16.mxu0 %v10767_v53 }
 0xf11   :  { %7166 = vmatmul.mubr.msk.bf16.gmra.mrb[160].mxu1 %vm162_vm0, %v9839_v55  ;;  %7170 = vmatmul.mubr.msk.bf16.gmra.mrb[160].mxu0 %vm162_vm0, %v9839_v55 }
 0xf12   :  { %4663 = vmatprep.mubr.bf16.mxu1 %v10767_v53  ;;  %4736 = vmatprep.mubr.bf16.mxu0 %v10767_v53 }
 0xf19   :  { %7167 = vmatmul.mubr.msk.bf16.gmra.mrb[164].mxu1 %vm162_vm0, %v9857_v14  ;;  %7171 = vmatmul.mubr.msk.bf16.gmra.mrb[164].mxu0 %vm162_vm0, %v9857_v14 }
 0xf1a   :  { %4779 = vmatprep.mubr.bf16.mxu1 %v10767_v53  ;;  %4852 = vmatprep.mubr.bf16.mxu0 %v10767_v53 }
 0xf21   :  { %7172 = vmatmul.mubr.msk.bf16.vlgmr.msra.gmra.mrb[168].mxu1 %vm162_vm0, %v9794_v37  ;;  %7176 = vmatmul.mubr.msk.bf16.vlgmr.msra.gmra.mrb[168].mxu0 %vm162_vm0, %v9794_v37 }
 0xf22   :  { %4894 = vmatpush1.bf16.msra.mxu1 %v7136_v59  ;;  %4967 = vmatpush1.bf16.msra.mxu0 %v7138_v42 }
 0xf23   :  { %4789 = vmatprep.mubr.bf16.mxu1 %v10767_v53  ;;  %4862 = vmatprep.mubr.bf16.mxu0 %v10767_v53 }
 0xf24   :  { %4895 = vmatprep.subr.bf16.mxu1 %v7153_v52  ;;  %4968 = vmatprep.subr.bf16.mxu0 %v7155_v58 }
 0xf26   :  { %4896 = vmatpush1.bf16.msra.mxu1 %v7152_v0  ;;  %4969 = vmatpush1.bf16.msra.mxu0 %v7154_v24 }
 0xf27   :  { %7461 = vmatprep.subr.bf16.mxu1 %v8299_v49  ;;  %7501 = vmatprep.subr.bf16.mxu0 %v8300_v21 }
 0xf29   :  { %7173 = vmatmul.mubr.msk.bf16.gmra.mrb[172].mxu1 %vm162_vm0, %v9817_v63  ;;  %7177 = vmatmul.mubr.msk.bf16.gmra.mrb[172].mxu0 %vm162_vm0, %v9817_v63 }
 0xf2a   :  { %4799 = vmatprep.mubr.bf16.mxu1 %v10767_v53  ;;  %4872 = vmatprep.mubr.bf16.mxu0 %v10767_v53 }
 0xf31   :  { %7174 = vmatmul.mubr.msk.bf16.gmra.mrb[176].mxu1 %vm162_vm0, %v9839_v55  ;;  %7178 = vmatmul.mubr.msk.bf16.gmra.mrb[176].mxu0 %vm162_vm0, %v9839_v55 }
 0xf32   :  { %4809 = vmatprep.mubr.bf16.mxu1 %v10767_v53  ;;  %4882 = vmatprep.mubr.bf16.mxu0 %v10767_v53 }
 0xf39   :  { %7175 = vmatmul.mubr.msk.bf16.gmra.mrb[180].mxu1 %vm162_vm0, %v9857_v14  ;;  %7179 = vmatmul.mubr.msk.bf16.gmra.mrb[180].mxu0 %vm162_vm0, %v9857_v14 }
 0xf3a   :  { %4925 = vmatprep.mubr.bf16.mxu1 %v10767_v53  ;;  %4998 = vmatprep.mubr.bf16.mxu0 %v10767_v53 }
 0xf41   :  { %7180 = vmatmul.mubr.msk.bf16.vlgmr.msra.gmra.mrb[184].mxu1 %vm162_vm0, %v9794_v37  ;;  %7184 = vmatmul.mubr.msk.bf16.vlgmr.msra.gmra.mrb[184].mxu0 %vm162_vm0, %v9794_v37  ;;  %v8307_v37 = vld [vmem:[%s10750_s11 + $0x50] sm:$0xff]  }
 0xf42   :  { %4935 = vmatprep.mubr.bf16.mxu1 %v10767_v53  ;;  %5008 = vmatprep.mubr.bf16.mxu0 %v10767_v53 }
 0xf43   :  { %7462 = vmatpush3.bf16.msra.mxu1 %v8301_v33  ;;  %7502 = vmatpush3.bf16.msra.mxu0 %v8302_v60 }
 0xf44   :  { %7463 = vmatprep.subr.bf16.mxu1 %v8303_v22  ;;  %7503 = vmatprep.subr.bf16.mxu0 %v8304_v10 }
 0xf47   :  { %7464 = vmatpush3.bf16.msra.mxu1 %v8305_v16  ;;  %7504 = vmatpush3.bf16.msra.mxu0 %v8306_v40 }
 0xf48   :  { %7465 = vmatprep.subr.bf16.mxu1 %v8307_v37  ;;  %7505 = vmatprep.subr.bf16.mxu0 %v8308_v31 }
 0xf49   :  { %7181 = vmatmul.mubr.msk.bf16.gmra.mrb[188].mxu1 %vm162_vm0, %v9817_v63  ;;  %7185 = vmatmul.mubr.msk.bf16.gmra.mrb[188].mxu0 %vm162_vm0, %v9817_v63  ;;  %v8315_v63 = vld [vmem:[%s10750_s11 + $0x60] sm:$0xff]  }
 0xf4a   :  { %4945 = vmatprep.mubr.bf16.mxu1 %v10767_v53  ;;  %5018 = vmatprep.mubr.bf16.mxu0 %v10767_v53 }
 0xf4b   :  { %7466 = vmatpush3.bf16.msra.mxu1 %v8309_v39  ;;  %7506 = vmatpush3.bf16.msra.mxu0 %v8310_v32 }
 0xf4c   :  { %7467 = vmatprep.subr.bf16.mxu1 %v8311_v47  ;;  %7507 = vmatprep.subr.bf16.mxu0 %v8312_v1 }
 0xf4f   :  { %7468 = vmatpush3.bf16.msra.mxu1 %v8313_v13  ;;  %7508 = vmatpush3.bf16.msra.mxu0 %v8314_v56 }
 0xf50   :  { %7469 = vmatprep.subr.bf16.mxu1 %v8315_v63  ;;  %7509 = vmatprep.subr.bf16.mxu0 %v8316_v20 }
 0xf51   :  { %7182 = vmatmul.mubr.msk.bf16.gmra.mrb[192].mxu1 %vm162_vm0, %v9839_v55  ;;  %7186 = vmatmul.mubr.msk.bf16.gmra.mrb[192].mxu0 %vm162_vm0, %v9839_v55  ;;  %v8326_v55 = vld [vmem:[%s10750_s11 + $0xb0] sm:$0xff]  }
 0xf52   :  { %4955 = vmatprep.mubr.bf16.mxu1 %v10767_v53  ;;  %5028 = vmatprep.mubr.bf16.mxu0 %v10767_v53  ;;  %v8324_v53 = vld [vmem:[%s10750_s11 + $0xf0] sm:$0xff]  }
 0xf53   :  { %7470 = vmatpush3.bf16.msra.mxu1 %v8317_v50  ;;  %7510 = vmatpush3.bf16.msra.mxu0 %v8318_v34 }
 0xf54   :  { %7471 = vmatprep.subr.bf16.mxu1 %v8319_v2  ;;  %7511 = vmatprep.subr.bf16.mxu0 %v8320_v25  ;;  %v8333_v2 = vld [vmem:[%s10750_s11 + $0x100] sm:$0xff]  }
 0xf55   :  { %v8334_v25 = vld [vmem:[%s10750_s11 + $0x180] sm:$0xff]  }
 0xf57   :  { %7472 = vmatpush3.bf16.msra.mxu1 %v8321_v9  ;;  %7512 = vmatpush3.bf16.msra.mxu0 %v8322_v44 }
 0xf58   :  { %7473 = vmatprep.subr.bf16.mxu1 %v8323_v29  ;;  %7513 = vmatprep.subr.bf16.mxu0 %v8324_v53 }
 0xf59   :  { %7183 = vmatmul.mubr.msk.bf16.gmra.mrb[196].mxu1 %vm162_vm0, %v9857_v14  ;;  %7187 = vmatmul.mubr.msk.bf16.gmra.mrb[196].mxu0 %vm162_vm0, %v9857_v14  ;;  %v8332_v14 = vld [vmem:[%s10750_s11 + $0x1c0] sm:$0xff]  }
 0xf5b   :  { %7474 = vmatpush3.bf16.msra.mxu1 %v8325_v6  ;;  %7514 = vmatpush3.bf16.msra.mxu0 %v8326_v55  ;;  %v8335_v6 = vld [vmem:[%s10750_s11 + $0x148] sm:$0xff]  }
 0xf5c   :  { %7475 = vmatprep.subr.bf16.mxu1 %v8327_v61  ;;  %7515 = vmatprep.subr.bf16.mxu0 %v8328_v57  ;;  %v8336_v55 = vld [vmem:[%s10750_s11 + $0x1c8] sm:$0xff]  }
 0xf5f   :  { %7476 = vmatpush3.bf16.msra.mxu1 %v8329_v18  ;;  %7516 = vmatpush3.bf16.msra.mxu0 %v8330_v43 }
 0xf60   :  { %7541 = vmatprep.subr.bf16.mxu1 %v8331_v26  ;;  %7581 = vmatprep.subr.bf16.mxu0 %v8332_v14 }
 0xf87   :  { %v4489_v51 = vpop.f32.mrb[136].mxu1  ;;  %v4562_v5 = vpop.f32.mrb[136].mxu0 }
 0xf88   :  { %v4490_v3 = vadd.f32 %v4489_v51, %v10093_v15  ;;  %v4563_v38 = vadd.f32 %v4562_v5, %v10098_v35  ;;  %v4491_v59 = vpop.f32.mrb[137].mxu1  ;;  %v4564_v42 = vpop.f32.mrb[137].mxu0 }
 0xf89   :  { %v4492_v52 = vadd.f32 %v4491_v59, %v10103_v4  ;;  %v4565_v58 = vadd.f32 %v4564_v42, %v10108_v54  ;;  %v4493_v49 = vpop.f32.mrb[138].mxu1  ;;  %v4566_v21 = vpop.f32.mrb[138].mxu0  ;;  %v8338_v59 = vld [vmem:[%s10750_s11 + $0x188] sm:$0xff]  }
 0xf8a   :  { %v4494_v0 = vadd.f32 %v4493_v49, %v10093_v15  ;;  %v4567_v24 = vadd.f32 %v4566_v21, %v10098_v35  ;;  %v4495_v33 = vpop.f32.mrb[139].mxu1  ;;  %v4568_v60 = vpop.f32.mrb[139].mxu0  ;;  %v5039_v16 = vmax.f32 %v4490_v3, 0.0  ;;  %v5041_v40 = vmax.f32 %v4563_v38, 0.0  ;;  %v8337_v38 = vld [vmem:[%s10750_s11 + $0x108] sm:$0xff]   ;;  %v8339_v21 = vld [vmem:[%s10750_s11 + $0x150] sm:$0xff]  }
 0xf8b   :  { %v4496_v22 = vadd.f32 %v4495_v33, %v10103_v4  ;;  %v4569_v10 = vadd.f32 %v4568_v60, %v10108_v54  ;;  %v5040_v39 = vmax.f32 %v4492_v52, 0.0  ;;  %v5042_v32 = vmax.f32 %v4565_v58, 0.0 }
 0xf8c   :  { %v5055_v37 = vmax.f32 %v4494_v0, 0.0  ;;  %v5057_v31 = vmax.f32 %v4567_v24, 0.0  ;;  %v8340_v0 = vld [vmem:[%s10750_s11 + $0x1d0] sm:$0xff]  }
 0xf8d   :  { %v5056_v47 = vmax.f32 %v4496_v22, 0.0  ;;  %v5058_v1 = vmax.f32 %v4569_v10, 0.0 }
 0xf8e   :  { %v5167_v13 = vpack.c.bf16 %v5055_v37, %v5039_v16  ;;  %v5169_v56 = vpack.c.bf16 %v5057_v31, %v5041_v40  ;;  %v8341_v31 = vld [vmem:[%s10750_s11 + $0x110] sm:$0xff]  }
 0xf8f   :  { %v5168_v63 = vpack.c.bf16 %v5056_v47, %v5040_v39  ;;  %v5170_v20 = vpack.c.bf16 %v5058_v1, %v5042_v32  ;;  %v4499_v50 = vpop.f32.mrb[140].mxu1  ;;  %v4572_v34 = vpop.f32.mrb[140].mxu0  ;;  %v8342_v39 = vld [vmem:[%s10750_s11 + $0x190] sm:$0xff]   ;;  %v8343_v32 = vld [vmem:[%s10750_s11 + $0x158] sm:$0xff]  }
 0xf90   :  { %v4500_v9 = vadd.f32 %v4499_v50, %v10093_v15  ;;  %v4573_v44 = vadd.f32 %v4572_v34, %v10098_v35  ;;  %v4501_v29 = vpop.f32.mrb[141].mxu1  ;;  %v4574_v53 = vpop.f32.mrb[141].mxu0  ;;  %v8344_v47 = vld [vmem:[%s10750_s11 + $0x1d8] sm:$0xff]   ;;  %v8350_v50 = vld [vmem:[%s10750_s11 + $0x1a0] sm:$0xff]   ;;  %v8351_v34 = vld [vmem:[%s10750_s11 + $0x168] sm:$0xff]  }
 0xf91   :  { %v4502_v61 = vadd.f32 %v4501_v29, %v10103_v4  ;;  %v4575_v57 = vadd.f32 %v4574_v53, %v10108_v54  ;;  %v4503_v18 = vpop.f32.mrb[142].mxu1  ;;  %v4576_v43 = vpop.f32.mrb[142].mxu0  ;;  %6294 = vmatprep.mubr.bf16.mxu1 %v5168_v63  ;;  %6359 = vmatprep.mubr.bf16.mxu0 %v5170_v20  ;;  %v8345_v1 = vld [vmem:[%s10750_s11 + $0x118] sm:$0xff]   ;;  %v8348_v63 = vld [vmem:[%s10750_s11 + $0x1e0] sm:$0xff]   ;;  %v8356_v29 = vld [vmem:[%s10750_s11 + $0x1f0] sm:$0xff]  }
 0xf92   :  { %v4504_v26 = vadd.f32 %v4503_v18, %v10093_v15  ;;  %v4577_v14 = vadd.f32 %v4576_v43, %v10098_v35  ;;  %v4505_v11 = vpop.f32.mrb[143].mxu1  ;;  %v4578_v51 = vpop.f32.mrb[143].mxu0  ;;  %6295 = vmatmul.mubr.bf16.vlgmr.msra.gmra.mrb[200].mxu1 %v5167_v13  ;;  %6360 = vmatmul.mubr.bf16.vlgmr.msra.gmra.mrb[200].mxu0 %v5169_v56  ;;  %v5071_v42 = vmax.f32 %v4500_v9, 0.0  ;;  %v5073_v52 = vmax.f32 %v4573_v44, 0.0  ;;  %v8346_v13 = vld [vmem:[%s10750_s11 + $0x198] sm:$0xff]   ;;  %v8347_v56 = vld [vmem:[%s10750_s11 + $0x160] sm:$0xff]  }
 0xf93   :  { %v4506_v5 = vadd.f32 %v4505_v11, %v10103_v4  ;;  %v4579_v3 = vadd.f32 %v4578_v51, %v10108_v54  ;;  %7542 = vmatpush3.bf16.msra.mxu1 %v8333_v2  ;;  %7582 = vmatpush3.bf16.msra.mxu0 %v8334_v25  ;;  %v5072_v24 = vmax.f32 %v4502_v61, 0.0  ;;  %v5074_v33 = vmax.f32 %v4575_v57, 0.0  ;;  %v8349_v20 = vld [vmem:[%s10750_s11 + $0x120] sm:$0xff]   ;;  %v8352_v2 = vld [vmem:[%s10750_s11 + $0x1e8] sm:$0xff]   ;;  %v8355_v44 = vld [vmem:[%s10750_s11 + $0x170] sm:$0xff]  }
 0xf94   :  { %v5087_v58 = vmax.f32 %v4504_v26, 0.0  ;;  %v5089_v49 = vmax.f32 %v4577_v14, 0.0  ;;  %7543 = vmatprep.subr.bf16.mxu1 %v8335_v6  ;;  %7583 = vmatprep.subr.bf16.mxu0 %v8336_v55  ;;  %v8353_v25 = vld [vmem:[%s10750_s11 + $0x128] sm:$0xff]   ;;  %v8357_v53 = vld [vmem:[%s10750_s11 + $0x130] sm:$0xff]   ;;  %v8359_v55 = vld [vmem:[%s10750_s11 + $0x178] sm:$0xff]  }
 0xf95   :  { %v5088_v60 = vmax.f32 %v4506_v5, 0.0  ;;  %v5090_v22 = vmax.f32 %v4579_v3, 0.0  ;;  %v8354_v9 = vld [vmem:[%s10750_s11 + $0x1a8] sm:$0xff]   ;;  %v8358_v6 = vld [vmem:[%s10750_s11 + $0x1b0] sm:$0xff]   ;;  %v8360_v61 = vld [vmem:[%s10750_s11 + $0x1f8] sm:$0xff]  }
 0xf96   :  { %v5183_v10 = vpack.c.bf16 %v5087_v58, %v5071_v42  ;;  %v5185_v16 = vpack.c.bf16 %v5089_v49, %v5073_v52  ;;  %v8361_v57 = vld [vmem:[%s10750_s11 + $0x138] sm:$0xff]   ;;  %v8363_v43 = vld [vmem:[%s10750_s11 + $0x240] sm:$0xff]  }
 0xf97   :  { %v5184_v40 = vpack.c.bf16 %v5088_v60, %v5072_v24  ;;  %v5186_v37 = vpack.c.bf16 %v5090_v22, %v5074_v33  ;;  %7544 = vmatpush3.bf16.msra.mxu1 %v8337_v38  ;;  %7584 = vmatpush3.bf16.msra.mxu0 %v8338_v59  ;;  %v8362_v18 = vld [vmem:[%s10750_s11 + $0x1b8] sm:$0xff]   ;;  %v8364_v26 = vld [vmem:[%s10750_s11 + $0x2c0] sm:$0xff]   ;;  %v4221_v22 = vsub.s32 4, %v10079_v19 }
 0xf98   :  { %7545 = vmatprep.subr.bf16.mxu1 %v8339_v21  ;;  %7585 = vmatprep.subr.bf16.mxu0 %v8340_v0 }
 0xf99   :  { %6302 = vmatprep.mubr.bf16.mxu1 %v5184_v40  ;;  %6367 = vmatprep.mubr.bf16.mxu0 %v5186_v37 }
 0xf9a   :  { %6303 = vmatmul.mubr.bf16.gmra.mrb[204].mxu1 %v5183_v10  ;;  %6368 = vmatmul.mubr.bf16.gmra.mrb[204].mxu0 %v5185_v16 }
 0xf9b   :  { %7546 = vmatpush3.bf16.msra.mxu1 %v8341_v31  ;;  %7586 = vmatpush3.bf16.msra.mxu0 %v8342_v39 }
 0xf9c   :  { %7547 = vmatprep.subr.bf16.mxu1 %v8343_v32  ;;  %7587 = vmatprep.subr.bf16.mxu0 %v8344_v47 }
 0xf9f   :  { %7548 = vmatpush3.bf16.msra.mxu1 %v8345_v1  ;;  %7588 = vmatpush3.bf16.msra.mxu0 %v8346_v13 }
 0xfa0   :  { %7549 = vmatprep.subr.bf16.mxu1 %v8347_v56  ;;  %7589 = vmatprep.subr.bf16.mxu0 %v8348_v63  ;;  %v4229_v56 = vsub.s32 6, %v10079_v19 }
 0xfa3   :  { %7550 = vmatpush3.bf16.msra.mxu1 %v8349_v20  ;;  %7590 = vmatpush3.bf16.msra.mxu0 %v8350_v50 }
 0xfa4   :  { %7551 = vmatprep.subr.bf16.mxu1 %v8351_v34  ;;  %7591 = vmatprep.subr.bf16.mxu0 %v8352_v2  ;;  %v4225_v2 = vsub.s32 5, %v10079_v19 }
 0xfa7   :  { %7552 = vmatpush3.bf16.msra.mxu1 %v8353_v25  ;;  %7592 = vmatpush3.bf16.msra.mxu0 %v8354_v9  ;;  %v4233_v25 = vsub.s32 7, %v10079_v19 }
 0xfa8   :  { %7553 = vmatprep.subr.bf16.mxu1 %v8355_v44  ;;  %7593 = vmatprep.subr.bf16.mxu0 %v8356_v29 }
 0xfab   :  { %7554 = vmatpush3.bf16.msra.mxu1 %v8357_v53  ;;  %7594 = vmatpush3.bf16.msra.mxu0 %v8358_v6 }
 0xfac   :  { %7555 = vmatprep.subr.bf16.mxu1 %v8359_v55  ;;  %7595 = vmatprep.subr.bf16.mxu0 %v8360_v61 }
 0xfaf   :  { %7556 = vmatpush3.bf16.msra.mxu1 %v8361_v57  ;;  %7596 = vmatpush3.bf16.msra.mxu0 %v8362_v18  ;;  %v10241_v18 = vrot.slane %v10086_v27, %v4221_v22 }
 0xfb0   :  { %7621 = vmatprep.subr.bf16.mxu1 %v8363_v43  ;;  %7661 = vmatprep.subr.bf16.mxu0 %v8364_v26 }
 0xfc4   :  { %v4509_v14 = vpop.f32.mrb[144].mxu1  ;;  %v4582_v11 = vpop.f32.mrb[144].mxu0 }
 0xfc5   :  { %v4510_v51 = vadd.f32 %v4509_v14, %v10093_v15  ;;  %v4583_v5 = vadd.f32 %v4582_v11, %v10098_v35  ;;  %v4511_v3 = vpop.f32.mrb[145].mxu1  ;;  %v4584_v38 = vpop.f32.mrb[145].mxu0 }
 0xfc6   :  { %v4512_v59 = vadd.f32 %v4511_v3, %v10103_v4  ;;  %v4585_v42 = vadd.f32 %v4584_v38, %v10108_v54  ;;  %v4513_v52 = vpop.f32.mrb[146].mxu1  ;;  %v4586_v58 = vpop.f32.mrb[146].mxu0  ;;  %v10255_v38 = vrot.slane %v10086_v27, %v4225_v2 }
 0xfc7   :  { %v4514_v49 = vadd.f32 %v4513_v52, %v10093_v15  ;;  %v4587_v21 = vadd.f32 %v4586_v58, %v10098_v35  ;;  %v4515_v0 = vpop.f32.mrb[147].mxu1  ;;  %v4588_v24 = vpop.f32.mrb[147].mxu0  ;;  %v5103_v10 = vmax.f32 %v4510_v51, 0.0  ;;  %v5105_v16 = vmax.f32 %v4583_v5, 0.0 }
 0xfc8   :  { %v4516_v33 = vadd.f32 %v4515_v0, %v10103_v4  ;;  %v4589_v60 = vadd.f32 %v4588_v24, %v10108_v54  ;;  %v5104_v31 = vmax.f32 %v4512_v59, 0.0  ;;  %v5106_v39 = vmax.f32 %v4585_v42, 0.0 }
 0xfc9   :  { %v5119_v40 = vmax.f32 %v4514_v49, 0.0  ;;  %v5121_v37 = vmax.f32 %v4587_v21, 0.0  ;;  %v10248_v51 = vrot.slane %v10086_v27, %v4229_v56 }
 0xfca   :  { %v5120_v32 = vmax.f32 %v4516_v33, 0.0  ;;  %v5122_v47 = vmax.f32 %v4589_v60, 0.0 }
 0xfcb   :  { %v5199_v1 = vpack.c.bf16 %v5119_v40, %v5103_v10  ;;  %v5201_v13 = vpack.c.bf16 %v5121_v37, %v5105_v16 }
 0xfcc   :  { %v5200_v63 = vpack.c.bf16 %v5120_v32, %v5104_v31  ;;  %v5202_v20 = vpack.c.bf16 %v5122_v47, %v5106_v39  ;;  %v4519_v50 = vpop.f32.mrb[148].mxu1  ;;  %v4592_v34 = vpop.f32.mrb[148].mxu0 }
 0xfcd   :  { %v4520_v9 = vadd.f32 %v4519_v50, %v10093_v15  ;;  %v4593_v44 = vadd.f32 %v4592_v34, %v10098_v35  ;;  %v4521_v29 = vpop.f32.mrb[149].mxu1  ;;  %v4594_v53 = vpop.f32.mrb[149].mxu0 }
 0xfce   :  { %v4522_v6 = vadd.f32 %v4521_v29, %v10103_v4  ;;  %v4595_v55 = vadd.f32 %v4594_v53, %v10108_v54  ;;  %v4523_v61 = vpop.f32.mrb[150].mxu1  ;;  %v4596_v57 = vpop.f32.mrb[150].mxu0  ;;  %6310 = vmatprep.mubr.bf16.mxu1 %v5200_v63  ;;  %6375 = vmatprep.mubr.bf16.mxu0 %v5202_v20 }
 0xfcf   :  { %v4524_v43 = vadd.f32 %v4523_v61, %v10093_v15  ;;  %v4597_v26 = vadd.f32 %v4596_v57, %v10098_v35  ;;  %v4525_v14 = vpop.f32.mrb[151].mxu1  ;;  %v4598_v11 = vpop.f32.mrb[151].mxu0  ;;  %6311 = vmatmul.mubr.bf16.gmra.mrb[208].mxu1 %v5199_v1  ;;  %6376 = vmatmul.mubr.bf16.gmra.mrb[208].mxu0 %v5201_v13  ;;  %v10260_v15 = vrot.slane %v10086_v27, %v4233_v25  ;;  %v5135_v35 = vmax.f32 %v4520_v9, 0.0 }
 0xfd0   :  { %v4526_v5 = vadd.f32 %v4525_v14, %v10103_v4  ;;  %v4599_v3 = vadd.f32 %v4598_v11, %v10108_v54  ;;  %v5137_v59 = vmax.f32 %v4593_v44, 0.0  ;;  %v5136_v58 = vmax.f32 %v4522_v6, 0.0 }
 0xfd1   :  { %v5151_v42 = vmax.f32 %v4524_v43, 0.0  ;;  %v5153_v52 = vmax.f32 %v4597_v26, 0.0  ;;  %v5138_v49 = vmax.f32 %v4595_v55, 0.0 }
 0xfd2   :  { %v5152_v21 = vmax.f32 %v4526_v5, 0.0  ;;  %v5154_v4 = vmax.f32 %v4599_v3, 0.0 }
 0xfd3   :  { %v5215_v0 = vpack.c.bf16 %v5151_v42, %v5135_v35  ;;  %v5217_v54 = vpack.c.bf16 %v5153_v52, %v5137_v59  ;;  %v8365_v35 = vld [vmem:[%s10750_s11 + $0x200] sm:$0xff]  }
 0xfd4   :  { %v5216_v24 = vpack.c.bf16 %v5152_v21, %v5136_v58  ;;  %v5218_v33 = vpack.c.bf16 %v5154_v4, %v5138_v49  ;;  %v4635_v60 = vpop.f32.mrb[152].mxu1  ;;  %v4708_v10 = vpop.f32.mrb[152].mxu0  ;;  %v8366_v59 = vld [vmem:[%s10750_s11 + $0x280] sm:$0xff]   ;;  %v8367_v21 = vld [vmem:[%s10750_s11 + $0x248] sm:$0xff]  }
 0xfd5   :  { %v4636_v16 = vadd.f32 %v4635_v60, %v10241_v18  ;;  %v4709_v40 = vadd.f32 %v4708_v10, %v10248_v51  ;;  %v4637_v27 = vpop.f32.mrb[153].mxu1  ;;  %v4710_v37 = vpop.f32.mrb[153].mxu0  ;;  %v8368_v4 = vld [vmem:[%s10750_s11 + $0x2c8] sm:$0xff]  }
 0xfd6   :  { %v4638_v31 = vadd.f32 %v4637_v27, %v10255_v38  ;;  %v4711_v39 = vadd.f32 %v4710_v37, %v10260_v15  ;;  %v4639_v32 = vpop.f32.mrb[154].mxu1  ;;  %v4712_v47 = vpop.f32.mrb[154].mxu0  ;;  %6318 = vmatprep.mubr.bf16.mxu1 %v5216_v24  ;;  %6383 = vmatprep.mubr.bf16.mxu0 %v5218_v33 }
 0xfd7   :  { %v4640_v1 = vadd.f32 %v4639_v32, %v10241_v18  ;;  %v4713_v13 = vadd.f32 %v4712_v47, %v10248_v51  ;;  %v4641_v63 = vpop.f32.mrb[155].mxu1  ;;  %v4714_v20 = vpop.f32.mrb[155].mxu0  ;;  %6319 = vmatmul.mubr.bf16.gmra.mrb[212].mxu1 %v5215_v0  ;;  %6384 = vmatmul.mubr.bf16.gmra.mrb[212].mxu0 %v5217_v54  ;;  %v5043_v9 = vmax.f32 %v4636_v16, 0.0  ;;  %v5045_v44 = vmax.f32 %v4709_v40, 0.0 }
 0xfd8   :  { %v4642_v50 = vadd.f32 %v4641_v63, %v10255_v38  ;;  %v4715_v34 = vadd.f32 %v4714_v20, %v10260_v15  ;;  %v5044_v6 = vmax.f32 %v4638_v31, 0.0  ;;  %v5046_v55 = vmax.f32 %v4711_v39, 0.0  ;;  %v8369_v31 = vld [vmem:[%s10750_s11 + $0x208] sm:$0xff]   ;;  %v8371_v63 = vld [vmem:[%s10750_s11 + $0x250] sm:$0xff]  }
 0xfd9   :  { %v5059_v29 = vmax.f32 %v4640_v1, 0.0  ;;  %v5061_v53 = vmax.f32 %v4713_v13, 0.0  ;;  %v8370_v39 = vld [vmem:[%s10750_s11 + $0x288] sm:$0xff]   ;;  %v8372_v20 = vld [vmem:[%s10750_s11 + $0x2d0] sm:$0xff]  }
 0xfda   :  { %v5060_v61 = vmax.f32 %v4642_v50, 0.0  ;;  %v5062_v57 = vmax.f32 %v4715_v34, 0.0 }
 0xfdb   :  { %v5171_v43 = vpack.c.bf16 %v5059_v29, %v5043_v9  ;;  %v5173_v26 = vpack.c.bf16 %v5061_v53, %v5045_v44 }
 0xfdc   :  { %v5172_v14 = vpack.c.bf16 %v5060_v61, %v5044_v6  ;;  %v5174_v11 = vpack.c.bf16 %v5062_v57, %v5046_v55  ;;  %v4645_v5 = vpop.f32.mrb[156].mxu1  ;;  %v4718_v3 = vpop.f32.mrb[156].mxu0 }
 0xfdd   :  { %v4646_v42 = vadd.f32 %v4645_v5, %v10241_v18  ;;  %v4719_v52 = vadd.f32 %v4718_v3, %v10248_v51  ;;  %v4647_v58 = vpop.f32.mrb[157].mxu1  ;;  %v4720_v49 = vpop.f32.mrb[157].mxu0 }
 0xfde   :  { %v4648_v0 = vadd.f32 %v4647_v58, %v10255_v38  ;;  %v4721_v54 = vadd.f32 %v4720_v49, %v10260_v15  ;;  %v4649_v24 = vpop.f32.mrb[158].mxu1  ;;  %v4722_v33 = vpop.f32.mrb[158].mxu0  ;;  %6424 = vmatprep.mubr.bf16.mxu1 %v5172_v14  ;;  %6489 = vmatprep.mubr.bf16.mxu0 %v5174_v11 }
 0xfdf   :  { %v4650_v60 = vadd.f32 %v4649_v24, %v10241_v18  ;;  %v4723_v10 = vadd.f32 %v4722_v33, %v10248_v51  ;;  %v4651_v16 = vpop.f32.mrb[159].mxu1  ;;  %v4724_v40 = vpop.f32.mrb[159].mxu0  ;;  %6425 = vmatmul.mubr.bf16.vlgmr.msra.gmra.mrb[216].mxu1 %v5171_v43  ;;  %6490 = vmatmul.mubr.bf16.vlgmr.msra.gmra.mrb[216].mxu0 %v5173_v26  ;;  %v5075_v32 = vmax.f32 %v4646_v42, 0.0  ;;  %v5077_v47 = vmax.f32 %v4719_v52, 0.0  ;;  %v8373_v43 = vld [vmem:[%s10750_s11 + $0x210] sm:$0xff]  }
 0xfe0   :  { %v4652_v27 = vadd.f32 %v4651_v16, %v10255_v38  ;;  %v4725_v37 = vadd.f32 %v4724_v40, %v10260_v15  ;;  %7622 = vmatpush3.bf16.msra.mxu1 %v8365_v35  ;;  %7662 = vmatpush3.bf16.msra.mxu0 %v8366_v59  ;;  %v5076_v50 = vmax.f32 %v4648_v0, 0.0  ;;  %v5078_v34 = vmax.f32 %v4721_v54, 0.0  ;;  %v8374_v26 = vld [vmem:[%s10750_s11 + $0x290] sm:$0xff]   ;;  %v8375_v35 = vld [vmem:[%s10750_s11 + $0x258] sm:$0xff]  }
 0xfe1   :  { %v5091_v1 = vmax.f32 %v4650_v60, 0.0  ;;  %v5093_v13 = vmax.f32 %v4723_v10, 0.0  ;;  %7623 = vmatprep.subr.bf16.mxu1 %v8367_v21  ;;  %7663 = vmatprep.subr.bf16.mxu0 %v8368_v4  ;;  %v8376_v59 = vld [vmem:[%s10750_s11 + $0x2d8] sm:$0xff]  }
 0xfe2   :  { %v5092_v9 = vmax.f32 %v4652_v27, 0.0  ;;  %v5094_v44 = vmax.f32 %v4725_v37, 0.0  ;;  %v8377_v60 = vld [vmem:[%s10750_s11 + $0x218] sm:$0xff]  }
 0xfe3   :  { %v5187_v29 = vpack.c.bf16 %v5091_v1, %v5075_v32  ;;  %v5189_v53 = vpack.c.bf16 %v5093_v13, %v5077_v47  ;;  %v8378_v10 = vld [vmem:[%s10750_s11 + $0x298] sm:$0xff]  }
 0xfe4   :  { %v5188_v6 = vpack.c.bf16 %v5092_v9, %v5076_v50  ;;  %v5190_v55 = vpack.c.bf16 %v5094_v44, %v5078_v34  ;;  %v4655_v61 = vpop.f32.mrb[160].mxu1  ;;  %v4728_v57 = vpop.f32.mrb[160].mxu0  ;;  %7624 = vmatpush3.bf16.msra.mxu1 %v8369_v31  ;;  %7664 = vmatpush3.bf16.msra.mxu0 %v8370_v39  ;;  %v8379_v31 = vld [vmem:[%s10750_s11 + $0x260] sm:$0xff]  }
 0xfe5   :  { %v4656_v14 = vadd.f32 %v4655_v61, %v10241_v18  ;;  %v4729_v11 = vadd.f32 %v4728_v57, %v10248_v51  ;;  %v4657_v5 = vpop.f32.mrb[161].mxu1  ;;  %v4730_v3 = vpop.f32.mrb[161].mxu0  ;;  %7625 = vmatprep.subr.bf16.mxu1 %v8371_v63  ;;  %7665 = vmatprep.subr.bf16.mxu0 %v8372_v20  ;;  %v8380_v39 = vld [vmem:[%s10750_s11 + $0x2e0] sm:$0xff]   ;;  %v10337_v63 = vld [vmem:[%s10751_s10 + $0x8] sm:$0xff] }
 0xfe6   :  { %v4658_v42 = vadd.f32 %v4657_v5, %v10255_v38  ;;  %v4731_v52 = vadd.f32 %v4730_v3, %v10260_v15  ;;  %v4659_v58 = vpop.f32.mrb[162].mxu1  ;;  %v4732_v49 = vpop.f32.mrb[162].mxu0  ;;  %6432 = vmatprep.mubr.bf16.mxu1 %v5188_v6  ;;  %6497 = vmatprep.mubr.bf16.mxu0 %v5190_v55  ;;  %v8382_v6 = vld [vmem:[%s10750_s11 + $0x2a0] sm:$0xff]  }
 0xfe7   :  { %v4660_v21 = vadd.f32 %v4659_v58, %v10241_v18  ;;  %v4733_v4 = vadd.f32 %v4732_v49, %v10248_v51  ;;  %v4661_v0 = vpop.f32.mrb[163].mxu1  ;;  %v4734_v54 = vpop.f32.mrb[163].mxu0  ;;  %6433 = vmatmul.mubr.bf16.gmra.mrb[220].mxu1 %v5187_v29  ;;  %6498 = vmatmul.mubr.bf16.gmra.mrb[220].mxu0 %v5189_v53  ;;  %v5107_v16 = vmax.f32 %v4656_v14, 0.0  ;;  %v5109_v40 = vmax.f32 %v4729_v11, 0.0  ;;  %v8381_v53 = vld [vmem:[%s10750_s11 + $0x220] sm:$0xff]   ;;  %v8384_v14 = vld [vmem:[%s10750_s11 + $0x2e8] sm:$0xff]  }
 0xfe8   :  { %v4662_v24 = vadd.f32 %v4661_v0, %v10255_v38  ;;  %v4735_v33 = vadd.f32 %v4734_v54, %v10260_v15  ;;  %7626 = vmatpush3.bf16.msra.mxu1 %v8373_v43  ;;  %7666 = vmatpush3.bf16.msra.mxu0 %v8374_v26  ;;  %v5108_v32 = vmax.f32 %v4658_v42, 0.0  ;;  %v5110_v47 = vmax.f32 %v4731_v52, 0.0  ;;  %v8383_v26 = vld [vmem:[%s10750_s11 + $0x268] sm:$0xff]  }
 0xfe9   :  { %v5123_v27 = vmax.f32 %v4660_v21, 0.0  ;;  %v5125_v37 = vmax.f32 %v4733_v4, 0.0  ;;  %7627 = vmatprep.subr.bf16.mxu1 %v8375_v35  ;;  %7667 = vmatprep.subr.bf16.mxu0 %v8376_v59  ;;  %v10356_v11 = vrot.slane %v10337_v63, %v4205_v12  ;;  %v10363_v42 = vrot.slane %v10337_v63, %v4213_v30  ;;  %v8385_v30 = vld [vmem:[%s10750_s11 + $0x228] sm:$0xff]  }
 0xfea   :  { %v5124_v1 = vmax.f32 %v4662_v24, 0.0  ;;  %v5126_v13 = vmax.f32 %v4735_v33, 0.0  ;;  %v10370_v21 = vrot.slane %v10337_v63, %v4209_v46  ;;  %v8388_v33 = vld [vmem:[%s10750_s11 + $0x2f0] sm:$0xff]  }
 0xfeb   :  { %v5203_v20 = vpack.c.bf16 %v5123_v27, %v5107_v16  ;;  %v5205_v50 = vpack.c.bf16 %v5125_v37, %v5109_v40 }
 0xfec   :  { %v5204_v34 = vpack.c.bf16 %v5124_v1, %v5108_v32  ;;  %v5206_v9 = vpack.c.bf16 %v5126_v13, %v5110_v47  ;;  %v4665_v44 = vpop.f32.mrb[164].mxu1  ;;  %v4738_v29 = vpop.f32.mrb[164].mxu0  ;;  %7628 = vmatpush3.bf16.msra.mxu1 %v8377_v60  ;;  %7668 = vmatpush3.bf16.msra.mxu0 %v8378_v10  ;;  %v8389_v47 = vld [vmem:[%s10750_s11 + $0x230] sm:$0xff]  }
 0xfed   :  { %v4666_v55 = vadd.f32 %v4665_v44, %v10241_v18  ;;  %v4739_v61 = vadd.f32 %v4738_v29, %v10248_v51  ;;  %v4667_v57 = vpop.f32.mrb[165].mxu1  ;;  %v4740_v43 = vpop.f32.mrb[165].mxu0  ;;  %7629 = vmatprep.subr.bf16.mxu1 %v8379_v31  ;;  %7669 = vmatprep.subr.bf16.mxu0 %v8380_v39  ;;  %v8390_v1 = vld [vmem:[%s10750_s11 + $0x2b0] sm:$0xff]   ;;  %v8392_v44 = vld [vmem:[%s10750_s11 + $0x2f8] sm:$0xff]  }
 0xfee   :  { %v4668_v5 = vadd.f32 %v4667_v57, %v10255_v38  ;;  %v4741_v3 = vadd.f32 %v4740_v43, %v10260_v15  ;;  %v4669_v35 = vpop.f32.mrb[166].mxu1  ;;  %v4742_v59 = vpop.f32.mrb[166].mxu0  ;;  %6440 = vmatprep.mubr.bf16.mxu1 %v5204_v34  ;;  %6505 = vmatprep.mubr.bf16.mxu0 %v5206_v9  ;;  %v8391_v9 = vld [vmem:[%s10750_s11 + $0x278] sm:$0xff]  }
 0xfef   :  { %v4670_v52 = vadd.f32 %v4669_v35, %v10241_v18  ;;  %v4743_v58 = vadd.f32 %v4742_v59, %v10248_v51  ;;  %v4671_v49 = vpop.f32.mrb[167].mxu1  ;;  %v4744_v12 = vpop.f32.mrb[167].mxu0  ;;  %6441 = vmatmul.mubr.bf16.gmra.mrb[224].mxu1 %v5203_v20  ;;  %6506 = vmatmul.mubr.bf16.gmra.mrb[224].mxu0 %v5205_v50  ;;  %v8386_v18 = vld [vmem:[%s10750_s11 + $0x2a8] sm:$0xff]   ;;  %v10383_v51 = vrot.slane %v10337_v63, %v4217_v45  ;;  %v5139_v46 = vmax.f32 %v4666_v55, 0.0  ;;  %v8394_v35 = vld [vmem:[%s10750_s11 + $0x2b8] sm:$0xff]  }
 0xff0   :  { %v4672_v4 = vadd.f32 %v4671_v49, %v10255_v38  ;;  %v4745_v0 = vadd.f32 %v4744_v12, %v10260_v15  ;;  %7630 = vmatpush3.bf16.msra.mxu1 %v8381_v53  ;;  %7670 = vmatpush3.bf16.msra.mxu0 %v8382_v6  ;;  %v5141_v54 = vmax.f32 %v4739_v61, 0.0  ;;  %v8387_v15 = vld [vmem:[%s10750_s11 + $0x270] sm:$0xff]   ;;  %v5140_v60 = vmax.f32 %v4668_v5, 0.0  ;;  %v8395_v12 = vld [vmem:[%s10750_s11 + $0x340] sm:$0xff]  }
 0xff1   :  { %v5155_v38 = vmax.f32 %v4670_v52, 0.0  ;;  %v5157_v24 = vmax.f32 %v4743_v58, 0.0  ;;  %7631 = vmatprep.subr.bf16.mxu1 %v8383_v26  ;;  %7671 = vmatprep.subr.bf16.mxu0 %v8384_v14  ;;  %v5142_v10 = vmax.f32 %v4741_v3, 0.0  ;;  %v8393_v3 = vld [vmem:[%s10750_s11 + $0x238] sm:$0xff]  }
 0xff2   :  { %v5156_v16 = vmax.f32 %v4672_v4, 0.0  ;;  %v5158_v40 = vmax.f32 %v4745_v0, 0.0  ;;  %v8396_v4 = vld [vmem:[%s10750_s11 + $0x3c0] sm:$0xff]  }
 0xff3   :  { %v5219_v45 = vpack.c.bf16 %v5155_v38, %v5139_v46  ;;  %v5221_v27 = vpack.c.bf16 %v5157_v24, %v5141_v54 }
 0xff4   :  { %v5220_v37 = vpack.c.bf16 %v5156_v16, %v5140_v60  ;;  %v5222_v31 = vpack.c.bf16 %v5158_v40, %v5142_v10  ;;  %v4781_v39 = vpop.f32.mrb[168].mxu1  ;;  %v4854_v32 = vpop.f32.mrb[168].mxu0  ;;  %7632 = vmatpush3.bf16.msra.mxu1 %v8385_v30  ;;  %7672 = vmatpush3.bf16.msra.mxu0 %v8386_v18  ;;  %v8397_v10 = vld [vmem:[%s10750_s11 + $0x300] sm:$0xff]  }
 0xff5   :  { %v4782_v13 = vadd.f32 %v4781_v39, %v10356_v11  ;;  %v4855_v20 = vadd.f32 %v4854_v32, %v10363_v42  ;;  %v4783_v50 = vpop.f32.mrb[169].mxu1  ;;  %v4856_v34 = vpop.f32.mrb[169].mxu0  ;;  %7633 = vmatprep.subr.bf16.mxu1 %v8387_v15  ;;  %7673 = vmatprep.subr.bf16.mxu0 %v8388_v33  ;;  %v8398_v16 = vld [vmem:[%s10750_s11 + $0x380] sm:$0xff]   ;;  %v8400_v39 = vld [vmem:[%s10750_s11 + $0x3c8] sm:$0xff]  }
 0xff6   :  { %v4784_v29 = vadd.f32 %v4783_v50, %v10370_v21  ;;  %v4857_v53 = vadd.f32 %v4856_v34, %v10383_v51  ;;  %v4785_v6 = vpop.f32.mrb[170].mxu1  ;;  %v4858_v55 = vpop.f32.mrb[170].mxu0  ;;  %6448 = vmatprep.mubr.bf16.mxu1 %v5220_v37  ;;  %6513 = vmatprep.mubr.bf16.mxu0 %v5222_v31  ;;  %v8399_v31 = vld [vmem:[%s10750_s11 + $0x348] sm:$0xff]  }
 0xff7   :  { %v4786_v61 = vadd.f32 %v4785_v6, %v10356_v11  ;;  %v4859_v57 = vadd.f32 %v4858_v55, %v10363_v42  ;;  %v4787_v43 = vpop.f32.mrb[171].mxu1  ;;  %v4860_v26 = vpop.f32.mrb[171].mxu0  ;;  %6449 = vmatmul.mubr.bf16.gmra.mrb[228].mxu1 %v5219_v45  ;;  %6514 = vmatmul.mubr.bf16.gmra.mrb[228].mxu0 %v5221_v27  ;;  %v5047_v59 = vmax.f32 %v4782_v13, 0.0  ;;  %v5049_v52 = vmax.f32 %v4855_v20, 0.0  ;;  %v8402_v6 = vld [vmem:[%s10750_s11 + $0x388] sm:$0xff]  }
 0xff8   :  { %v4788_v14 = vadd.f32 %v4787_v43, %v10370_v21  ;;  %v4861_v5 = vadd.f32 %v4860_v26, %v10383_v51  ;;  %7634 = vmatpush3.bf16.msra.mxu1 %v8389_v47  ;;  %7674 = vmatpush3.bf16.msra.mxu0 %v8390_v1  ;;  %v5048_v0 = vmax.f32 %v4784_v29, 0.0  ;;  %v5050_v30 = vmax.f32 %v4857_v53, 0.0  ;;  %v8401_v53 = vld [vmem:[%s10750_s11 + $0x308] sm:$0xff]   ;;  %v8403_v26 = vld [vmem:[%s10750_s11 + $0x350] sm:$0xff]  }
 0xff9   :  { %v5063_v58 = vmax.f32 %v4786_v61, 0.0  ;;  %v5065_v49 = vmax.f32 %v4859_v57, 0.0  ;;  %7635 = vmatprep.subr.bf16.mxu1 %v8391_v9  ;;  %7675 = vmatprep.subr.bf16.mxu0 %v8392_v44 }
 0xffa   :  { %v5064_v18 = vmax.f32 %v4788_v14, 0.0  ;;  %v5066_v46 = vmax.f32 %v4861_v5, 0.0  ;;  %v8404_v14 = vld [vmem:[%s10750_s11 + $0x3d0] sm:$0xff]  }
 0xffb   :  { %v5175_v54 = vpack.c.bf16 %v5063_v58, %v5047_v59  ;;  %v5177_v38 = vpack.c.bf16 %v5065_v49, %v5049_v52 }
 0xffc   :  { %v5176_v24 = vpack.c.bf16 %v5064_v18, %v5048_v0  ;;  %v5178_v15 = vpack.c.bf16 %v5066_v46, %v5050_v30  ;;  %v4791_v33 = vpop.f32.mrb[172].mxu1  ;;  %v4864_v60 = vpop.f32.mrb[172].mxu0  ;;  %7636 = vmatpush3.bf16.msra.mxu1 %v8393_v3  ;;  %7676 = vmatpush3.bf16.msra.mxu0 %v8394_v35  ;;  %v8405_v30 = vld [vmem:[%s10750_s11 + $0x310] sm:$0xff]  }
 0xffd   :  { %v4792_v40 = vadd.f32 %v4791_v33, %v10356_v11  ;;  %v4865_v45 = vadd.f32 %v4864_v60, %v10363_v42  ;;  %v4793_v27 = vpop.f32.mrb[173].mxu1  ;;  %v4866_v37 = vpop.f32.mrb[173].mxu0  ;;  %7701 = vmatprep.subr.bf16.mxu1 %v8395_v12  ;;  %7741 = vmatprep.subr.bf16.mxu0 %v8396_v4  ;;  %v8406_v18 = vld [vmem:[%s10750_s11 + $0x390] sm:$0xff]   ;;  %v8408_v33 = vld [vmem:[%s10750_s11 + $0x3d8] sm:$0xff]  }
 0xffe   :  { %v4794_v32 = vadd.f32 %v4793_v27, %v10370_v21  ;;  %v4867_v47 = vadd.f32 %v4866_v37, %v10383_v51  ;;  %v4795_v1 = vpop.f32.mrb[174].mxu1  ;;  %v4868_v13 = vpop.f32.mrb[174].mxu0  ;;  %6554 = vmatprep.mubr.bf16.mxu1 %v5176_v24  ;;  %6619 = vmatprep.mubr.bf16.mxu0 %v5178_v15  ;;  %v8407_v15 = vld [vmem:[%s10750_s11 + $0x358] sm:$0xff]  }
 0xfff   :  { %v4796_v20 = vadd.f32 %v4795_v1, %v10356_v11  ;;  %v4869_v50 = vadd.f32 %v4868_v13, %v10363_v42  ;;  %v4797_v34 = vpop.f32.mrb[175].mxu1  ;;  %v4870_v9 = vpop.f32.mrb[175].mxu0  ;;  %6555 = vmatmul.mubr.bf16.vlgmr.msra.gmra.mrb[232].mxu1 %v5175_v54  ;;  %6620 = vmatmul.mubr.bf16.vlgmr.msra.gmra.mrb[232].mxu0 %v5177_v38  ;;  %v5079_v55 = vmax.f32 %v4792_v40, 0.0  ;;  %v5081_v61 = vmax.f32 %v4865_v45, 0.0  ;;  %v8410_v1 = vld [vmem:[%s10750_s11 + $0x398] sm:$0xff]  }
0x1000   :  { %v4798_v44 = vadd.f32 %v4797_v34, %v10370_v21  ;;  %v4871_v29 = vadd.f32 %v4870_v9, %v10383_v51  ;;  %7702 = vmatpush3.bf16.msra.mxu1 %v8397_v10  ;;  %7742 = vmatpush3.bf16.msra.mxu0 %v8398_v16  ;;  %v5080_v5 = vmax.f32 %v4794_v32, 0.0  ;;  %v5082_v3 = vmax.f32 %v4867_v47, 0.0  ;;  %v8409_v47 = vld [vmem:[%s10750_s11 + $0x318] sm:$0xff]   ;;  %v8411_v9 = vld [vmem:[%s10750_s11 + $0x360] sm:$0xff]  }
0x1001   :  { %v5095_v57 = vmax.f32 %v4796_v20, 0.0  ;;  %v5097_v43 = vmax.f32 %v4869_v50, 0.0  ;;  %7703 = vmatprep.subr.bf16.mxu1 %v8399_v31  ;;  %7743 = vmatprep.subr.bf16.mxu0 %v8400_v39 }
0x1002   :  { %v5096_v35 = vmax.f32 %v4798_v44, 0.0  ;;  %v5098_v59 = vmax.f32 %v4871_v29, 0.0  ;;  %v8412_v44 = vld [vmem:[%s10750_s11 + $0x3e0] sm:$0xff]  }
0x1003   :  { %v5191_v52 = vpack.c.bf16 %v5095_v57, %v5079_v55  ;;  %v5193_v58 = vpack.c.bf16 %v5097_v43, %v5081_v61 }
0x1004   :  { %v5192_v49 = vpack.c.bf16 %v5096_v35, %v5080_v5  ;;  %v5194_v12 = vpack.c.bf16 %v5098_v59, %v5082_v3  ;;  %v4801_v4 = vpop.f32.mrb[176].mxu1  ;;  %v4874_v0 = vpop.f32.mrb[176].mxu0  ;;  %7704 = vmatpush3.bf16.msra.mxu1 %v8401_v53  ;;  %7744 = vmatpush3.bf16.msra.mxu0 %v8402_v6  ;;  %v8413_v3 = vld [vmem:[%s10750_s11 + $0x320] sm:$0xff]  }
0x1005   :  { %v4802_v46 = vadd.f32 %v4801_v4, %v10356_v11  ;;  %v4875_v54 = vadd.f32 %v4874_v0, %v10363_v42  ;;  %v4803_v38 = vpop.f32.mrb[177].mxu1  ;;  %v4876_v24 = vpop.f32.mrb[177].mxu0  ;;  %7705 = vmatprep.subr.bf16.mxu1 %v8403_v26  ;;  %7745 = vmatprep.subr.bf16.mxu0 %v8404_v14  ;;  %v8414_v35 = vld [vmem:[%s10750_s11 + $0x3a0] sm:$0xff]   ;;  %v8416_v4 = vld [vmem:[%s10750_s11 + $0x3e8] sm:$0xff]   ;;  %v10504_v0 = vrot.slane %v10337_v63, %v4221_v22 }
0x1006   :  { %v4804_v60 = vadd.f32 %v4803_v38, %v10370_v21  ;;  %v4877_v10 = vadd.f32 %v4876_v24, %v10383_v51  ;;  %v4805_v16 = vpop.f32.mrb[178].mxu1  ;;  %v4878_v40 = vpop.f32.mrb[178].mxu0  ;;  %6562 = vmatprep.mubr.bf16.mxu1 %v5192_v49  ;;  %6627 = vmatprep.mubr.bf16.mxu0 %v5194_v12  ;;  %v8415_v12 = vld [vmem:[%s10750_s11 + $0x368] sm:$0xff]   ;;  %v10511_v38 = vrot.slane %v10337_v63, %v4229_v56 }
0x1007   :  { %v4806_v45 = vadd.f32 %v4805_v16, %v10356_v11  ;;  %v4879_v27 = vadd.f32 %v4878_v40, %v10363_v42  ;;  %v4807_v37 = vpop.f32.mrb[179].mxu1  ;;  %v4880_v31 = vpop.f32.mrb[179].mxu0  ;;  %6563 = vmatmul.mubr.bf16.gmra.mrb[236].mxu1 %v5191_v52  ;;  %6628 = vmatmul.mubr.bf16.gmra.mrb[236].mxu0 %v5193_v58  ;;  %v5111_v13 = vmax.f32 %v4802_v46, 0.0  ;;  %v5113_v20 = vmax.f32 %v4875_v54, 0.0  ;;  %v8417_v56 = vld [vmem:[%s10750_s11 + $0x328] sm:$0xff]  }
0x1008   :  { %v4808_v39 = vadd.f32 %v4807_v37, %v10370_v21  ;;  %v4881_v32 = vadd.f32 %v4880_v31, %v10383_v51  ;;  %7706 = vmatpush3.bf16.msra.mxu1 %v8405_v30  ;;  %7746 = vmatpush3.bf16.msra.mxu0 %v8406_v18  ;;  %v5112_v29 = vmax.f32 %v4804_v60, 0.0  ;;  %v5114_v53 = vmax.f32 %v4877_v10, 0.0 }
0x1009   :  { %v5127_v50 = vmax.f32 %v4806_v45, 0.0  ;;  %v5129_v34 = vmax.f32 %v4879_v27, 0.0  ;;  %7707 = vmatprep.subr.bf16.mxu1 %v8407_v15  ;;  %7747 = vmatprep.subr.bf16.mxu0 %v8408_v33  ;;  %v10518_v60 = vrot.slane %v10337_v63, %v4225_v2  ;;  %v8420_v27 = vld [vmem:[%s10750_s11 + $0x3f0] sm:$0xff]  }
0x100a   :  { %v5128_v6 = vmax.f32 %v4808_v39, 0.0  ;;  %v5130_v55 = vmax.f32 %v4881_v32, 0.0 }
0x100b   :  { %v5207_v61 = vpack.c.bf16 %v5127_v50, %v5111_v13  ;;  %v5209_v57 = vpack.c.bf16 %v5129_v34, %v5113_v20  ;;  %v8421_v20 = vld [vmem:[%s10750_s11 + $0x330] sm:$0xff]  }
0x100c   :  { %v5208_v43 = vpack.c.bf16 %v5128_v6, %v5112_v29  ;;  %v5210_v26 = vpack.c.bf16 %v5130_v55, %v5114_v53  ;;  %v4811_v14 = vpop.f32.mrb[180].mxu1  ;;  %v4884_v5 = vpop.f32.mrb[180].mxu0  ;;  %7708 = vmatpush3.bf16.msra.mxu1 %v8409_v47  ;;  %7748 = vmatpush3.bf16.msra.mxu0 %v8410_v1  ;;  %v8422_v50 = vld [vmem:[%s10750_s11 + $0x3b0] sm:$0xff]   ;;  %v8423_v53 = vld [vmem:[%s10750_s11 + $0x378] sm:$0xff]  }
0x100d   :  { %v4812_v59 = vadd.f32 %v4811_v14, %v10356_v11  ;;  %v4885_v52 = vadd.f32 %v4884_v5, %v10363_v42  ;;  %v4813_v58 = vpop.f32.mrb[181].mxu1  ;;  %v4886_v49 = vpop.f32.mrb[181].mxu0  ;;  %7709 = vmatprep.subr.bf16.mxu1 %v8411_v9  ;;  %7749 = vmatprep.subr.bf16.mxu0 %v8412_v44  ;;  %v8424_v6 = vld [vmem:[%s10750_s11 + $0x3f8] sm:$0xff]  }
0x100e   :  { %v4814_v30 = vadd.f32 %v4813_v58, %v10370_v21  ;;  %v4887_v18 = vadd.f32 %v4886_v49, %v10383_v51  ;;  %v4815_v46 = vpop.f32.mrb[182].mxu1  ;;  %v4888_v54 = vpop.f32.mrb[182].mxu0  ;;  %6570 = vmatprep.mubr.bf16.mxu1 %v5208_v43  ;;  %6635 = vmatprep.mubr.bf16.mxu0 %v5210_v26  ;;  %v8426_v58 = vld [vmem:[%s10750_s11 + $0x3b8] sm:$0xff]  }
0x100f   :  { %v4816_v24 = vadd.f32 %v4815_v46, %v10356_v11  ;;  %v4889_v15 = vadd.f32 %v4888_v54, %v10363_v42  ;;  %v4817_v33 = vpop.f32.mrb[183].mxu1  ;;  %v4890_v22 = vpop.f32.mrb[183].mxu0  ;;  %6571 = vmatmul.mubr.bf16.gmra.mrb[240].mxu1 %v5207_v61  ;;  %6636 = vmatmul.mubr.bf16.gmra.mrb[240].mxu0 %v5209_v57  ;;  %v8418_v11 = vld [vmem:[%s10750_s11 + $0x3a8] sm:$0xff]   ;;  %v10531_v42 = vrot.slane %v10337_v63, %v4233_v25  ;;  %v5143_v2 = vmax.f32 %v4812_v59, 0.0 }
0x1010   :  { %v4818_v10 = vadd.f32 %v4817_v33, %v10370_v21  ;;  %v4891_v16 = vadd.f32 %v4890_v22, %v10383_v51  ;;  %7710 = vmatpush3.bf16.msra.mxu1 %v8413_v3  ;;  %7750 = vmatpush3.bf16.msra.mxu0 %v8414_v35  ;;  %v5145_v40 = vmax.f32 %v4885_v52, 0.0  ;;  %v8419_v51 = vld [vmem:[%s10750_s11 + $0x370] sm:$0xff]   ;;  %v5144_v37 = vmax.f32 %v4814_v30, 0.0  ;;  %v8425_v52 = vld [vmem:[%s10750_s11 + $0x338] sm:$0xff]  }
0x1011   :  { %v5159_v21 = vmax.f32 %v4816_v24, 0.0  ;;  %v5161_v45 = vmax.f32 %v4889_v15, 0.0  ;;  %7711 = vmatprep.subr.bf16.mxu1 %v8415_v12  ;;  %7751 = vmatprep.subr.bf16.mxu0 %v8416_v4  ;;  %v5146_v31 = vmax.f32 %v4887_v18, 0.0 }
0x1012   :  { %v5160_v19 = vmax.f32 %v4818_v10, 0.0  ;;  %v5162_v39 = vmax.f32 %v4891_v16, 0.0 }
0x1013   :  { %v5223_v25 = vpack.c.bf16 %v5159_v21, %v5143_v2  ;;  %v5225_v63 = vpack.c.bf16 %v5161_v45, %v5145_v40 }
0x1014   :  { %v5224_v32 = vpack.c.bf16 %v5160_v19, %v5144_v37  ;;  %v5226_v47 = vpack.c.bf16 %v5162_v39, %v5146_v31  ;;  %v4927_v1 = vpop.f32.mrb[184].mxu1  ;;  %v5000_v13 = vpop.f32.mrb[184].mxu0  ;;  %7712 = vmatpush3.bf16.msra.mxu1 %v8417_v56  ;;  %7752 = vmatpush3.bf16.msra.mxu0 %v8418_v11 }
0x1015   :  { %v4928_v34 = vadd.f32 %v4927_v1, %v10504_v0  ;;  %v5001_v9 = vadd.f32 %v5000_v13, %v10511_v38  ;;  %v4929_v44 = vpop.f32.mrb[185].mxu1  ;;  %v5002_v29 = vpop.f32.mrb[185].mxu0  ;;  %7713 = vmatprep.subr.bf16.mxu1 %v8419_v51  ;;  %7753 = vmatprep.subr.bf16.mxu0 %v8420_v27 }
0x1016   :  { %v4930_v55 = vadd.f32 %v4929_v44, %v10518_v60  ;;  %v5003_v61 = vadd.f32 %v5002_v29, %v10531_v42  ;;  %v4931_v57 = vpop.f32.mrb[186].mxu1  ;;  %v5004_v43 = vpop.f32.mrb[186].mxu0  ;;  %6578 = vmatprep.mubr.bf16.mxu1 %v5224_v32  ;;  %6643 = vmatprep.mubr.bf16.mxu0 %v5226_v47 }
0x1017   :  { %v4932_v26 = vadd.f32 %v4931_v57, %v10504_v0  ;;  %v5005_v14 = vadd.f32 %v5004_v43, %v10511_v38  ;;  %v4933_v5 = vpop.f32.mrb[187].mxu1  ;;  %v5006_v3 = vpop.f32.mrb[187].mxu0  ;;  %6579 = vmatmul.mubr.bf16.gmra.mrb[244].mxu1 %v5223_v25  ;;  %6644 = vmatmul.mubr.bf16.gmra.mrb[244].mxu0 %v5225_v63  ;;  %v5051_v49 = vmax.f32 %v4928_v34, 0.0  ;;  %v5053_v12 = vmax.f32 %v5001_v9, 0.0 }
0x1018   :  { %v4934_v35 = vadd.f32 %v4933_v5, %v10518_v60  ;;  %v5007_v59 = vadd.f32 %v5006_v3, %v10531_v42  ;;  %7714 = vmatpush3.bf16.msra.mxu1 %v8421_v20  ;;  %7754 = vmatpush3.bf16.msra.mxu0 %v8422_v50  ;;  %v5052_v18 = vmax.f32 %v4930_v55, 0.0  ;;  %v5054_v46 = vmax.f32 %v5003_v61, 0.0 }
0x1019   :  { %v5067_v4 = vmax.f32 %v4932_v26, 0.0  ;;  %v5069_v30 = vmax.f32 %v5005_v14, 0.0  ;;  %7715 = vmatprep.subr.bf16.mxu1 %v8423_v53  ;;  %7755 = vmatprep.subr.bf16.mxu0 %v8424_v6 }
0x101a   :  { %v5068_v54 = vmax.f32 %v4934_v35, 0.0  ;;  %v5070_v24 = vmax.f32 %v5007_v59, 0.0 }
0x101b   :  { %v5179_v15 = vpack.c.bf16 %v5067_v4, %v5051_v49  ;;  %v5181_v33 = vpack.c.bf16 %v5069_v30, %v5053_v12 }
0x101c   :  { %v5180_v22 = vpack.c.bf16 %v5068_v54, %v5052_v18  ;;  %v5182_v10 = vpack.c.bf16 %v5070_v24, %v5054_v46  ;;  %v4937_v16 = vpop.f32.mrb[188].mxu1  ;;  %v5010_v56 = vpop.f32.mrb[188].mxu0  ;;  %7716 = vmatpush3.bf16.msra.mxu1 %v8425_v52  ;;  %7756 = vmatpush3.bf16.msra.mxu0 %v8426_v58 }
0x101d   :  { %v4938_v11 = vadd.f32 %v4937_v16, %v10504_v0  ;;  %v5011_v2 = vadd.f32 %v5010_v56, %v10511_v38  ;;  %v4939_v40 = vpop.f32.mrb[189].mxu1  ;;  %v5012_v21 = vpop.f32.mrb[189].mxu0 }
0x101e   :  { %v4940_v45 = vadd.f32 %v4939_v40, %v10518_v60  ;;  %v5013_v51 = vadd.f32 %v5012_v21, %v10531_v42  ;;  %v4941_v27 = vpop.f32.mrb[190].mxu1  ;;  %v5014_v37 = vpop.f32.mrb[190].mxu0  ;;  %6684 = vmatprep.mubr.bf16.mxu1 %v5180_v22  ;;  %6749 = vmatprep.mubr.bf16.mxu0 %v5182_v10 }
0x101f   :  { %v4942_v31 = vadd.f32 %v4941_v27, %v10504_v0  ;;  %v5015_v19 = vadd.f32 %v5014_v37, %v10511_v38  ;;  %v4943_v39 = vpop.f32.mrb[191].mxu1  ;;  %v5016_v25 = vpop.f32.mrb[191].mxu0  ;;  %6685 = vmatmul.mubr.bf16.vlgmr.msra.gmra.mrb[248].mxu1 %v5179_v15  ;;  %6750 = vmatmul.mubr.bf16.vlgmr.msra.gmra.mrb[248].mxu0 %v5181_v33  ;;  %v5083_v47 = vmax.f32 %v4938_v11, 0.0  ;;  %v5085_v1 = vmax.f32 %v5011_v2, 0.0 }
0x1020   :  { %v4944_v63 = vadd.f32 %v4943_v39, %v10518_v60  ;;  %v5017_v32 = vadd.f32 %v5016_v25, %v10531_v42  ;;  %v5084_v50 = vmax.f32 %v4940_v45, 0.0  ;;  %v5086_v34 = vmax.f32 %v5013_v51, 0.0 }
0x1021   :  { %v5099_v13 = vmax.f32 %v4942_v31, 0.0  ;;  %v5101_v20 = vmax.f32 %v5015_v19, 0.0 }
0x1022   :  { %v5100_v9 = vmax.f32 %v4944_v63, 0.0  ;;  %v5102_v44 = vmax.f32 %v5017_v32, 0.0 }
0x1023   :  { %v5195_v29 = vpack.c.bf16 %v5099_v13, %v5083_v47  ;;  %v5197_v53 = vpack.c.bf16 %v5101_v20, %v5085_v1 }
0x1024   :  { %v5196_v6 = vpack.c.bf16 %v5100_v9, %v5084_v50  ;;  %v5198_v55 = vpack.c.bf16 %v5102_v44, %v5086_v34  ;;  %v4947_v61 = vpop.f32.mrb[192].mxu1  ;;  %v5020_v57 = vpop.f32.mrb[192].mxu0 }
0x1025   :  { %v4948_v43 = vadd.f32 %v4947_v61, %v10504_v0  ;;  %v5021_v26 = vadd.f32 %v5020_v57, %v10511_v38  ;;  %v4949_v14 = vpop.f32.mrb[193].mxu1  ;;  %v5022_v5 = vpop.f32.mrb[193].mxu0 }
0x1026   :  { %v4950_v3 = vadd.f32 %v4949_v14, %v10518_v60  ;;  %v5023_v35 = vadd.f32 %v5022_v5, %v10531_v42  ;;  %v4951_v59 = vpop.f32.mrb[194].mxu1  ;;  %v5024_v52 = vpop.f32.mrb[194].mxu0  ;;  %6692 = vmatprep.mubr.bf16.mxu1 %v5196_v6  ;;  %6757 = vmatprep.mubr.bf16.mxu0 %v5198_v55 }
0x1027   :  { %v4952_v58 = vadd.f32 %v4951_v59, %v10504_v0  ;;  %v5025_v49 = vadd.f32 %v5024_v52, %v10511_v38  ;;  %v4953_v12 = vpop.f32.mrb[195].mxu1  ;;  %v5026_v4 = vpop.f32.mrb[195].mxu0  ;;  %6693 = vmatmul.mubr.bf16.gmra.mrb[252].mxu1 %v5195_v29  ;;  %6758 = vmatmul.mubr.bf16.gmra.mrb[252].mxu0 %v5197_v53  ;;  %v5115_v46 = vmax.f32 %v4948_v43, 0.0  ;;  %v5117_v54 = vmax.f32 %v5021_v26, 0.0  ;;  %v7188_v26 = vld [vmem:[%s10752_s12] ss:$0 sm:$0xff] }
0x1028   :  { %v4954_v30 = vadd.f32 %v4953_v12, %v10518_v60  ;;  %v5027_v18 = vadd.f32 %v5026_v4, %v10531_v42  ;;  %v5116_v33 = vmax.f32 %v4950_v3, 0.0  ;;  %v5118_v22 = vmax.f32 %v5023_v35, 0.0 }
0x1029   :  { %v5131_v24 = vmax.f32 %v4952_v58, 0.0  ;;  %v5133_v15 = vmax.f32 %v5025_v49, 0.0 }
0x102a   :  { %v5132_v10 = vmax.f32 %v4954_v30, 0.0  ;;  %v5134_v16 = vmax.f32 %v5027_v18, 0.0 }
0x102b   :  { %v5211_v56 = vpack.c.bf16 %v5131_v24, %v5115_v46  ;;  %v5213_v11 = vpack.c.bf16 %v5133_v15, %v5117_v54 }
0x102c   :  { %v5212_v2 = vpack.c.bf16 %v5132_v10, %v5116_v33  ;;  %v5214_v40 = vpack.c.bf16 %v5134_v16, %v5118_v22  ;;  %v4957_v21 = vpop.f32.mrb[196].mxu1  ;;  %v5030_v45 = vpop.f32.mrb[196].mxu0 }
0x102d   :  { %v4958_v51 = vadd.f32 %v4957_v21, %v10504_v0  ;;  %v5031_v27 = vadd.f32 %v5030_v45, %v10511_v38  ;;  %v4959_v37 = vpop.f32.mrb[197].mxu1  ;;  %v5032_v31 = vpop.f32.mrb[197].mxu0 }
0x102e   :  { %v4960_v19 = vadd.f32 %v4959_v37, %v10518_v60  ;;  %v5033_v39 = vadd.f32 %v5032_v31, %v10531_v42  ;;  %v4961_v25 = vpop.f32.mrb[198].mxu1  ;;  %v5034_v63 = vpop.f32.mrb[198].mxu0  ;;  %6700 = vmatprep.mubr.bf16.mxu1 %v5212_v2  ;;  %6765 = vmatprep.mubr.bf16.mxu0 %v5214_v40 }
0x102f   :  { %v4962_v32 = vadd.f32 %v4961_v25, %v10504_v0  ;;  %v5035_v47 = vadd.f32 %v5034_v63, %v10511_v38  ;;  %v4963_v1 = vpop.f32.mrb[199].mxu1  ;;  %v5036_v13 = vpop.f32.mrb[199].mxu0  ;;  %6701 = vmatmul.mubr.bf16.gmra.mrb[0].mxu1 %v5211_v56  ;;  %6766 = vmatmul.mubr.bf16.gmra.mrb[0].mxu0 %v5213_v11  ;;  %v5147_v34 = vmax.f32 %v4958_v51, 0.0  ;;  %v5149_v9 = vmax.f32 %v5031_v27, 0.0 }
0x1030   :  { %v4964_v20 = vadd.f32 %v4963_v1, %v10518_v60  ;;  %v5037_v50 = vadd.f32 %v5036_v13, %v10531_v42  ;;  %v5148_v53 = vmax.f32 %v4960_v19, 0.0  ;;  %v5150_v6 = vmax.f32 %v5033_v39, 0.0 }
0x1031   :  { %v5163_v44 = vmax.f32 %v4962_v32, 0.0  ;;  %v5165_v29 = vmax.f32 %v5035_v47, 0.0 }
0x1032   :  { %v5164_v55 = vmax.f32 %v4964_v20, 0.0  ;;  %v5166_v61 = vmax.f32 %v5037_v50, 0.0 }
0x1033   :  { %v5227_v57 = vpack.c.bf16 %v5163_v44, %v5147_v34  ;;  %v5229_v0 = vpack.c.bf16 %v5165_v29, %v5149_v9 }
0x1034   :  { %v5228_v43 = vpack.c.bf16 %v5164_v55, %v5148_v53  ;;  %v5230_v38 = vpack.c.bf16 %v5166_v61, %v5150_v6 }
0x1036   :  { %6708 = vmatprep.mubr.bf16.mxu1 %v5228_v43  ;;  %6773 = vmatprep.mubr.bf16.mxu0 %v5230_v38 }
0x1037   :  { %6709 = vmatmul.mubr.bf16.gmra.mrb[4].mxu1 %v5227_v57  ;;  %6774 = vmatmul.mubr.bf16.gmra.mrb[4].mxu0 %v5229_v0 }
0x1038   :  { %8202 = vmatprep.mubr.msk.f32.mxu1 %vm8589_vm1, %v8588_v41 }
0x1065   :  { %v7477_v60 = vpop.f32.mrb[200].mxu1  ;;  %v7517_v42 = vpop.f32.mrb[200].mxu0 }
0x1066   :  { %v7478_v14 = vpop.f32.mrb[201].mxu1  ;;  %v7518_v5 = vpop.f32.mrb[201].mxu0 }
0x1067   :  { %v7479_v3 = vadd.f32 %v7478_v14, %v7477_v60  ;;  %v7519_v35 = vadd.f32 %v7518_v5, %v7517_v42  ;;  %v7480_v59 = vpop.f32.mrb[202].mxu1  ;;  %v7520_v52 = vpop.f32.mrb[202].mxu0 }
0x1068   :  { %v7481_v58 = vpop.f32.mrb[203].mxu1  ;;  %v7521_v49 = vpop.f32.mrb[203].mxu0 }
0x1069   :  { %v6297_v12 = vadd.f32 %v7479_v3, %v7188_v26  ;;  %v7482_v4 = vadd.f32 %v7481_v58, %v7480_v59  ;;  %v7522_v30 = vadd.f32 %v7521_v49, %v7520_v52 }
0x106b   :  { %v6362_v18 = vadd.f32 %v7519_v35, %v6297_v12  ;;  %v6300_v46 = vadd.f32 %v7482_v4, %v7188_v26 }
0x106d   :  { %v10594_v41 = vadd.f32 %v7522_v30, %v6300_v46  ;;  %v7483_v54 = vpop.f32.mrb[204].mxu1  ;;  %v7523_v24 = vpop.f32.mrb[204].mxu0 }
0x106e   :  { %v7484_v15 = vpop.f32.mrb[205].mxu1  ;;  %v7524_v33 = vpop.f32.mrb[205].mxu0 }
0x106f   :  { %v7485_v22 = vadd.f32 %v7484_v15, %v7483_v54  ;;  %v7525_v10 = vadd.f32 %v7524_v33, %v7523_v24  ;;  %v7486_v16 = vpop.f32.mrb[206].mxu1  ;;  %v7526_v56 = vpop.f32.mrb[206].mxu0 }
0x1070   :  { %v7487_v11 = vpop.f32.mrb[207].mxu1  ;;  %v7527_v2 = vpop.f32.mrb[207].mxu0 }
0x1071   :  { %v6305_v40 = vadd.f32 %v7485_v22, %v7188_v26  ;;  %v7488_v21 = vadd.f32 %v7487_v11, %v7486_v16  ;;  %v7528_v45 = vadd.f32 %v7527_v2, %v7526_v56 }
0x1073   :  { %v6370_v51 = vadd.f32 %v7525_v10, %v6305_v40  ;;  %v6308_v27 = vadd.f32 %v7488_v21, %v7188_v26 }
0x1075   :  { %v10596_v37 = vadd.f32 %v7528_v45, %v6308_v27 }
0x10a2   :  { %v7489_v31 = vpop.f32.mrb[208].mxu1  ;;  %v7529_v19 = vpop.f32.mrb[208].mxu0 }
0x10a3   :  { %v7490_v39 = vpop.f32.mrb[209].mxu1  ;;  %v7530_v25 = vpop.f32.mrb[209].mxu0 }
0x10a4   :  { %v7491_v63 = vadd.f32 %v7490_v39, %v7489_v31  ;;  %v7531_v32 = vadd.f32 %v7530_v25, %v7529_v19  ;;  %v7492_v47 = vpop.f32.mrb[210].mxu1  ;;  %v7532_v1 = vpop.f32.mrb[210].mxu0 }
0x10a5   :  { %v7493_v13 = vpop.f32.mrb[211].mxu1  ;;  %v7533_v20 = vpop.f32.mrb[211].mxu0 }
0x10a6   :  { %v6313_v50 = vadd.f32 %v7491_v63, %v7188_v26  ;;  %v7494_v34 = vadd.f32 %v7493_v13, %v7492_v47  ;;  %v7534_v9 = vadd.f32 %v7533_v20, %v7532_v1 }
0x10a8   :  { %v6378_v44 = vadd.f32 %v7531_v32, %v6313_v50  ;;  %v6316_v29 = vadd.f32 %v7494_v34, %v7188_v26 }
0x10aa   :  { %v10598_v53 = vadd.f32 %v7534_v9, %v6316_v29  ;;  %v7495_v6 = vpop.f32.mrb[212].mxu1  ;;  %v7535_v55 = vpop.f32.mrb[212].mxu0 }
0x10ab   :  { %v7496_v61 = vpop.f32.mrb[213].mxu1  ;;  %v7536_v57 = vpop.f32.mrb[213].mxu0 }
0x10ac   :  { %v7497_v0 = vadd.f32 %v7496_v61, %v7495_v6  ;;  %v7537_v43 = vadd.f32 %v7536_v57, %v7535_v55  ;;  %v7498_v38 = vpop.f32.mrb[214].mxu1  ;;  %v7538_v60 = vpop.f32.mrb[214].mxu0 }
0x10ad   :  { %v7499_v42 = vpop.f32.mrb[215].mxu1  ;;  %v7539_v14 = vpop.f32.mrb[215].mxu0 }
0x10ae   :  { %v6321_v5 = vadd.f32 %v7497_v0, %v7188_v26  ;;  %v7500_v3 = vadd.f32 %v7499_v42, %v7498_v38  ;;  %v7540_v35 = vadd.f32 %v7539_v14, %v7538_v60 }
0x10b0   :  { %v6386_v59 = vadd.f32 %v7537_v43, %v6321_v5  ;;  %v6324_v52 = vadd.f32 %v7500_v3, %v7188_v26 }
0x10b2   :  { %v10600_v58 = vadd.f32 %v7540_v35, %v6324_v52  ;;  %v7557_v49 = vpop.f32.mrb[216].mxu1  ;;  %v7597_v12 = vpop.f32.mrb[216].mxu0 }
0x10b3   :  { %v7558_v4 = vpop.f32.mrb[217].mxu1  ;;  %v7598_v30 = vpop.f32.mrb[217].mxu0 }
0x10b4   :  { %v7559_v46 = vadd.f32 %v7558_v4, %v7557_v49  ;;  %v7599_v54 = vadd.f32 %v7598_v30, %v7597_v12  ;;  %v7560_v24 = vpop.f32.mrb[218].mxu1  ;;  %v7600_v15 = vpop.f32.mrb[218].mxu0 }
0x10b5   :  { %v7561_v33 = vpop.f32.mrb[219].mxu1  ;;  %v7601_v22 = vpop.f32.mrb[219].mxu0 }
0x10b6   :  { %v6427_v10 = vadd.f32 %v7559_v46, %v6362_v18  ;;  %v7562_v16 = vadd.f32 %v7561_v33, %v7560_v24  ;;  %v7602_v56 = vadd.f32 %v7601_v22, %v7600_v15 }
0x10b8   :  { %v6492_v11 = vadd.f32 %v7599_v54, %v6427_v10  ;;  %v6430_v2 = vadd.f32 %v7562_v16, %v10594_v41 }
0x10ba   :  { %v10603_v40 = vadd.f32 %v7602_v56, %v6430_v2  ;;  %v7563_v26 = vpop.f32.mrb[220].mxu1  ;;  %v7603_v21 = vpop.f32.mrb[220].mxu0 }
0x10bb   :  { %v7564_v45 = vpop.f32.mrb[221].mxu1  ;;  %v7604_v27 = vpop.f32.mrb[221].mxu0 }
0x10bc   :  { %v7565_v31 = vadd.f32 %v7564_v45, %v7563_v26  ;;  %v7605_v19 = vadd.f32 %v7604_v27, %v7603_v21  ;;  %v7566_v39 = vpop.f32.mrb[222].mxu1  ;;  %v7606_v25 = vpop.f32.mrb[222].mxu0 }
0x10bd   :  { %v7567_v63 = vpop.f32.mrb[223].mxu1  ;;  %v7607_v32 = vpop.f32.mrb[223].mxu0 }
0x10be   :  { %v6435_v47 = vadd.f32 %v7565_v31, %v6370_v51  ;;  %v7568_v1 = vadd.f32 %v7567_v63, %v7566_v39  ;;  %v7608_v18 = vadd.f32 %v7607_v32, %v7606_v25 }
0x10c0   :  { %v6500_v13 = vadd.f32 %v7605_v19, %v6435_v47  ;;  %v6438_v20 = vadd.f32 %v7568_v1, %v10596_v37 }
0x10c2   :  { %v10606_v50 = vadd.f32 %v7608_v18, %v6438_v20  ;;  %v7569_v41 = vpop.f32.mrb[224].mxu1  ;;  %v7609_v34 = vpop.f32.mrb[224].mxu0 }
0x10c3   :  { %v7570_v9 = vpop.f32.mrb[225].mxu1  ;;  %v7610_v29 = vpop.f32.mrb[225].mxu0 }
0x10c4   :  { %v7571_v6 = vadd.f32 %v7570_v9, %v7569_v41  ;;  %v7611_v55 = vadd.f32 %v7610_v29, %v7609_v34  ;;  %v7572_v61 = vpop.f32.mrb[226].mxu1  ;;  %v7612_v57 = vpop.f32.mrb[226].mxu0 }
0x10c5   :  { %v7573_v0 = vpop.f32.mrb[227].mxu1  ;;  %v7613_v43 = vpop.f32.mrb[227].mxu0 }
0x10c6   :  { %v6443_v38 = vadd.f32 %v7571_v6, %v6378_v44  ;;  %v7574_v60 = vadd.f32 %v7573_v0, %v7572_v61  ;;  %v7614_v51 = vadd.f32 %v7613_v43, %v7612_v57 }
0x10c8   :  { %v6508_v42 = vadd.f32 %v7611_v55, %v6443_v38  ;;  %v6446_v14 = vadd.f32 %v7574_v60, %v10598_v53 }
0x10ca   :  { %v10609_v5 = vadd.f32 %v7614_v51, %v6446_v14  ;;  %v7575_v37 = vpop.f32.mrb[228].mxu1  ;;  %v7615_v3 = vpop.f32.mrb[228].mxu0 }
0x10cb   :  { %v7576_v35 = vpop.f32.mrb[229].mxu1  ;;  %v7616_v52 = vpop.f32.mrb[229].mxu0 }
0x10cc   :  { %v7577_v49 = vadd.f32 %v7576_v35, %v7575_v37  ;;  %v7617_v12 = vadd.f32 %v7616_v52, %v7615_v3  ;;  %v7578_v4 = vpop.f32.mrb[230].mxu1  ;;  %v7618_v30 = vpop.f32.mrb[230].mxu0 }
0x10cd   :  { %v7579_v46 = vpop.f32.mrb[231].mxu1  ;;  %v7619_v54 = vpop.f32.mrb[231].mxu0 }
0x10ce   :  { %v6451_v24 = vadd.f32 %v7577_v49, %v6386_v59  ;;  %v7580_v15 = vadd.f32 %v7579_v46, %v7578_v4  ;;  %v7620_v44 = vadd.f32 %v7619_v54, %v7618_v30 }
0x10d0   :  { %v6516_v33 = vadd.f32 %v7617_v12, %v6451_v24  ;;  %v6454_v22 = vadd.f32 %v7580_v15, %v10600_v58 }
0x10d2   :  { %v10612_v10 = vadd.f32 %v7620_v44, %v6454_v22  ;;  %v7637_v53 = vpop.f32.mrb[232].mxu1  ;;  %v7677_v16 = vpop.f32.mrb[232].mxu0 }
0x10d3   :  { %v7638_v56 = vpop.f32.mrb[233].mxu1  ;;  %v7678_v2 = vpop.f32.mrb[233].mxu0 }
0x10d4   :  { %v7639_v26 = vadd.f32 %v7638_v56, %v7637_v53  ;;  %v7679_v21 = vadd.f32 %v7678_v2, %v7677_v16  ;;  %v7640_v45 = vpop.f32.mrb[234].mxu1  ;;  %v7680_v27 = vpop.f32.mrb[234].mxu0 }
0x10d5   :  { %v7641_v31 = vpop.f32.mrb[235].mxu1  ;;  %v7681_v19 = vpop.f32.mrb[235].mxu0 }
0x10d6   :  { %v6557_v39 = vadd.f32 %v7639_v26, %v6492_v11  ;;  %v7642_v25 = vadd.f32 %v7641_v31, %v7640_v45  ;;  %v7682_v59 = vadd.f32 %v7681_v19, %v7680_v27 }
0x10d8   :  { %v6622_v63 = vadd.f32 %v7679_v21, %v6557_v39  ;;  %v6560_v32 = vadd.f32 %v7642_v25, %v10603_v40 }
0x10da   :  { %v10615_v47 = vadd.f32 %v7682_v59, %v6560_v32  ;;  %v7643_v58 = vpop.f32.mrb[236].mxu1  ;;  %v7683_v1 = vpop.f32.mrb[236].mxu0 }
0x10db   :  { %v7644_v18 = vpop.f32.mrb[237].mxu1  ;;  %v7684_v20 = vpop.f32.mrb[237].mxu0 }
0x10dc   :  { %v7645_v41 = vadd.f32 %v7644_v18, %v7643_v58  ;;  %v7685_v34 = vadd.f32 %v7684_v20, %v7683_v1  ;;  %v7646_v9 = vpop.f32.mrb[238].mxu1  ;;  %v7686_v29 = vpop.f32.mrb[238].mxu0 }
0x10dd   :  { %v7647_v6 = vpop.f32.mrb[239].mxu1  ;;  %v7687_v55 = vpop.f32.mrb[239].mxu0 }
0x10de   :  { %v6565_v61 = vadd.f32 %v7645_v41, %v6500_v13  ;;  %v7648_v57 = vadd.f32 %v7647_v6, %v7646_v9  ;;  %v7688_v11 = vadd.f32 %v7687_v55, %v7686_v29 }
0x10e0   :  { %v10617_v0 = vadd.f32 %v7685_v34, %v6565_v61  ;;  %v6568_v43 = vadd.f32 %v7648_v57, %v10606_v50 }
0x10e2   :  { %v10620_v40 = vadd.f32 %v7688_v11, %v6568_v43  ;;  %v7649_v38 = vpop.f32.mrb[240].mxu1  ;;  %v7689_v60 = vpop.f32.mrb[240].mxu0 }
0x10e3   :  { %v7650_v51 = vpop.f32.mrb[241].mxu1  ;;  %v7690_v14 = vpop.f32.mrb[241].mxu0 }
0x10e4   :  { %v7651_v37 = vadd.f32 %v7650_v51, %v7649_v38  ;;  %v7691_v3 = vadd.f32 %v7690_v14, %v7689_v60  ;;  %v7652_v35 = vpop.f32.mrb[242].mxu1  ;;  %v7692_v52 = vpop.f32.mrb[242].mxu0 }
0x10e5   :  { %v7653_v49 = vpop.f32.mrb[243].mxu1  ;;  %v7693_v12 = vpop.f32.mrb[243].mxu0 }
0x10e6   :  { %v6573_v4 = vadd.f32 %v7651_v37, %v6508_v42  ;;  %v7654_v13 = vadd.f32 %v7653_v49, %v7652_v35  ;;  %v7694_v30 = vadd.f32 %v7693_v12, %v7692_v52 }
0x10e8   :  { %v10622_v46 = vadd.f32 %v7691_v3, %v6573_v4  ;;  %v6576_v54 = vadd.f32 %v7654_v13, %v10609_v5 }
0x10ea   :  { %v10625_v50 = vadd.f32 %v7694_v30, %v6576_v54  ;;  %v7655_v24 = vpop.f32.mrb[244].mxu1  ;;  %v7695_v15 = vpop.f32.mrb[244].mxu0 }
0x10eb   :  { %v7656_v44 = vpop.f32.mrb[245].mxu1  ;;  %v7696_v22 = vpop.f32.mrb[245].mxu0 }
0x10ec   :  { %v7657_v53 = vadd.f32 %v7656_v44, %v7655_v24  ;;  %v7697_v16 = vadd.f32 %v7696_v22, %v7695_v15  ;;  %v7658_v56 = vpop.f32.mrb[246].mxu1  ;;  %v7698_v2 = vpop.f32.mrb[246].mxu0 }
0x10ed   :  { %v7659_v26 = vpop.f32.mrb[247].mxu1  ;;  %v7699_v21 = vpop.f32.mrb[247].mxu0 }
0x10ee   :  { %v6581_v45 = vadd.f32 %v7657_v53, %v6516_v33  ;;  %v7660_v42 = vadd.f32 %v7659_v26, %v7658_v56  ;;  %v7700_v27 = vadd.f32 %v7699_v21, %v7698_v2 }
0x10f0   :  { %v10627_v31 = vadd.f32 %v7697_v16, %v6581_v45  ;;  %v6584_v19 = vadd.f32 %v7660_v42, %v10612_v10 }
0x10f2   :  { %v10630_v5 = vadd.f32 %v7700_v27, %v6584_v19  ;;  %v7717_v39 = vpop.f32.mrb[248].mxu1  ;;  %v7757_v25 = vpop.f32.mrb[248].mxu0 }
0x10f3   :  { %v7718_v59 = vpop.f32.mrb[249].mxu1  ;;  %v7758_v32 = vpop.f32.mrb[249].mxu0 }
0x10f4   :  { %v7719_v58 = vadd.f32 %v7718_v59, %v7717_v39  ;;  %v7759_v1 = vadd.f32 %v7758_v32, %v7757_v25  ;;  %v7720_v18 = vpop.f32.mrb[250].mxu1  ;;  %v7760_v20 = vpop.f32.mrb[250].mxu0 }
0x10f5   :  { %v7721_v41 = vpop.f32.mrb[251].mxu1  ;;  %v7761_v34 = vpop.f32.mrb[251].mxu0 }
0x10f6   :  { %v6687_v9 = vadd.f32 %v7719_v58, %v6622_v63  ;;  %v7722_v33 = vadd.f32 %v7721_v41, %v7720_v18  ;;  %v7762_v29 = vadd.f32 %v7761_v34, %v7760_v20 }
0x10f8   :  { %v6752_v6 = vadd.f32 %v7759_v1, %v6687_v9  ;;  %v6690_v55 = vadd.f32 %v7722_v33, %v10615_v47 }
0x10fa   :  { %v6755_v61 = vadd.f32 %v7762_v29, %v6690_v55  ;;  %v7723_v10 = vpop.f32.mrb[252].mxu1  ;;  %v7763_v57 = vpop.f32.mrb[252].mxu0  ;;  %v10634_v11 = vadd.f32 %v6752_v6, %v9777_v48 }
0x10fb   :  { %v7724_v43 = vpop.f32.mrb[253].mxu1  ;;  %v7764_v38 = vpop.f32.mrb[253].mxu0 }
0x10fc   :  { %v7725_v60 = vadd.f32 %v7724_v43, %v7723_v10  ;;  %v7765_v51 = vadd.f32 %v7764_v38, %v7763_v57  ;;  %v7726_v14 = vpop.f32.mrb[254].mxu1  ;;  %v7766_v37 = vpop.f32.mrb[254].mxu0  ;;  %v6792_v63 = vsel %vm162_vm0, %v10634_v11, 0.0  ;;  %v10639_v3 = vadd.f32 %v6755_v61, %v9780_v17 }
0x10fd   :  { %v7727_v35 = vpop.f32.mrb[255].mxu1  ;;  %v7767_v47 = vpop.f32.mrb[255].mxu0  ;;  %6793 = vadd.xlane.f32.xlu1 %v6792_v63 }
0x10fe   :  { %v6695_v52 = vadd.f32 %v7725_v60, %v10617_v0  ;;  %v7728_v49 = vadd.f32 %v7727_v35, %v7726_v14  ;;  %v7768_v48 = vadd.f32 %v7767_v47, %v7766_v37  ;;  %v6795_v12 = vsel %vm162_vm0, %v10639_v3, 0.0 }
0x10ff   :  { %6796 = vadd.xlane.f32.xlu0 %v6795_v12 }
0x1100   :  { %v6760_v4 = vadd.f32 %v7765_v51, %v6695_v52  ;;  %v6698_v13 = vadd.f32 %v7728_v49, %v10620_v40 }
0x1102   :  { %v6763_v30 = vadd.f32 %v7768_v48, %v6698_v13  ;;  %v7729_v54 = vpop.f32.mrb[0].mxu1  ;;  %v7769_v24 = vpop.f32.mrb[0].mxu0  ;;  %v10646_v17 = vadd.f32 %v6760_v4, %v9813_v8 }
0x1103   :  { %v7730_v15 = vpop.f32.mrb[1].mxu1  ;;  %v7770_v44 = vpop.f32.mrb[1].mxu0 }
0x1104   :  { %v7731_v22 = vadd.f32 %v7730_v15, %v7729_v54  ;;  %v7771_v53 = vadd.f32 %v7770_v44, %v7769_v24  ;;  %v7732_v0 = vpop.f32.mrb[2].mxu1  ;;  %v7772_v16 = vpop.f32.mrb[2].mxu0  ;;  %v6798_v56 = vsel %vm162_vm0, %v10646_v17, 0.0  ;;  %v6785_v2 = vadd.f32 %v6763_v30, %v9806_v7 }
0x1105   :  { %v7733_v26 = vpop.f32.mrb[3].mxu1  ;;  %v7773_v21 = vpop.f32.mrb[3].mxu0  ;;  %6799 = vadd.xlane.f32.xlu1 %v6798_v56 }
0x1106   :  { %v6703_v40 = vadd.f32 %v7731_v22, %v10622_v46  ;;  %v7734_v45 = vadd.f32 %v7733_v26, %v7732_v0  ;;  %v7774_v42 = vadd.f32 %v7773_v21, %v7772_v16  ;;  %v6801_v8 = vsel %vm162_vm0, %v6785_v2, 0.0 }
0x1107   :  { %6802 = vadd.xlane.f32.xlu0 %v6801_v8 }
0x1108   :  { %v6768_v27 = vadd.f32 %v7771_v53, %v6703_v40  ;;  %v6706_v19 = vadd.f32 %v7734_v45, %v10625_v50 }
0x110a   :  { %v6771_v39 = vadd.f32 %v7774_v42, %v6706_v19  ;;  %v7735_v25 = vpop.f32.mrb[4].mxu1  ;;  %v7775_v59 = vpop.f32.mrb[4].mxu0  ;;  %v6786_v32 = vadd.f32 %v6768_v27, %v9830_v62 }
0x110b   :  { %v7736_v58 = vpop.f32.mrb[5].mxu1  ;;  %v7776_v7 = vpop.f32.mrb[5].mxu0 }
0x110c   :  { %v7737_v1 = vadd.f32 %v7736_v58, %v7735_v25  ;;  %v7777_v18 = vadd.f32 %v7776_v7, %v7775_v59  ;;  %v7738_v20 = vpop.f32.mrb[6].mxu1  ;;  %v7778_v41 = vpop.f32.mrb[6].mxu0  ;;  %v6804_v46 = vsel %vm162_vm0, %v6786_v32, 0.0  ;;  %v6787_v34 = vadd.f32 %v6771_v39, %v9833_v36  ;;  %v6924_v59 = vld [vmem:[%s10753_s15] sm:$0xff]  ;;  %v6926_v7 = vld [vmem:[%s10753_s15 + $0x10] sm:$0xff] }
0x110d   :  { %v7739_v9 = vpop.f32.mrb[7].mxu1  ;;  %v7779_v33 = vpop.f32.mrb[7].mxu0  ;;  %6805 = vadd.xlane.f32.xlu1 %v6804_v46  ;;  %v8604_v25 = vmov 0.0|0.0  }
0x110e   :  { %v6711_v50 = vadd.f32 %v7737_v1, %v10627_v31  ;;  %v7740_v29 = vadd.f32 %v7739_v9, %v7738_v20  ;;  %v7780_v6 = vadd.f32 %v7779_v33, %v7778_v41  ;;  %v6807_v55 = vsel %vm162_vm0, %v6787_v34, 0.0  ;;  %8205 = vmatprep.subr.bf16.mxu1 %v8604_v25  ;;  %v6927_v1 = vld [vmem:[%s10753_s15 + $0x18] sm:$0xff] }
0x110f   :  { %6808 = vadd.xlane.f32.xlu0 %v6807_v55 }
0x1110   :  { %v6776_v62 = vadd.f32 %v7777_v18, %v6711_v50  ;;  %v6714_v61 = vadd.f32 %v7740_v29, %v10630_v5  ;;  %v8209_v18 = vpack.c.bf16 %v6927_v1, %v6926_v7 }
0x1112   :  { %v6779_v10 = vadd.f32 %v7780_v6, %v6714_v61  ;;  %v6788_v57 = vadd.f32 %v6776_v62, %v9853_v28 }
0x1114   :  { %v6810_v43 = vsel %vm162_vm0, %v6788_v57, 0.0  ;;  %v6789_v36 = vadd.f32 %v6779_v10, %v9850_v23 }
0x1115   :  { %6811 = vadd.xlane.f32.xlu1 %v6810_v43 }
0x1116   :  { %v6813_v38 = vsel %vm162_vm0, %v6789_v36, 0.0 }
0x1117   :  { %6814 = vadd.xlane.f32.xlu0 %v6813_v38 }
0x118a   :  { %v6794_v31 = vpop.xlane.xlu1 %6793 }
0x118b   :  { %v6816_v60 = vmul.f32 0.03125, %v6794_v31 }
0x118c   :  { %v6797_v51 = vpop.xlane.xlu0 %6796 }
0x118d   :  { %v10665_v14 = vsub.f32 %v10634_v11, %v6816_v60  ;;  %v6817_v37 = vmul.f32 0.03125, %v6797_v51 }
0x118f   :  { %v10668_v5 = vsub.f32 %v10639_v3, %v6817_v37  ;;  %v6832_v28 = vmul.f32 %v10665_v14, %v10665_v14 }
0x1191   :  { %v6840_v63 = vsel %vm162_vm0, %v6832_v28, 0.0  ;;  %v6833_v23 = vmul.f32 %v10668_v5, %v10668_v5 }
0x1192   :  { %v6800_v35 = vpop.xlane.xlu1 %6799  ;;  %6841 = vadd.xlane.f32.xlu1 %v6840_v63 }
0x1193   :  { %v6818_v47 = vmul.f32 0.03125, %v6800_v35  ;;  %v6843_v52 = vsel %vm162_vm0, %v6833_v23, 0.0 }
0x1194   :  { %v6803_v49 = vpop.xlane.xlu0 %6802  ;;  %6844 = vadd.xlane.f32.xlu0 %v6843_v52 }
0x1195   :  { %v10677_v11 = vsub.f32 %v10646_v17, %v6818_v47  ;;  %v6819_v3 = vmul.f32 0.03125, %v6803_v49  ;;  %v7317_v49 = vld [vmem:[%s10754_s13] ss:$0 sm:$0xff] }
0x1197   :  { %v10679_v48 = vsub.f32 %v6785_v2, %v6819_v3  ;;  %v6834_v12 = vmul.f32 %v10677_v11, %v10677_v11 }
0x1199   :  { %v6846_v4 = vsel %vm162_vm0, %v6834_v12, 0.0  ;;  %v6835_v13 = vmul.f32 %v10679_v48, %v10679_v48 }
0x119a   :  { %v6806_v30 = vpop.xlane.xlu1 %6805  ;;  %6847 = vadd.xlane.f32.xlu1 %v6846_v4 }
0x119b   :  { %v6820_v54 = vmul.f32 0.03125, %v6806_v30  ;;  %v6849_v24 = vsel %vm162_vm0, %v6835_v13, 0.0 }
0x119c   :  { %v6809_v15 = vpop.xlane.xlu0 %6808  ;;  %6850 = vadd.xlane.f32.xlu0 %v6849_v24 }
0x119d   :  { %v10687_v17 = vsub.f32 %v6786_v32, %v6820_v54  ;;  %v6821_v44 = vmul.f32 0.03125, %v6809_v15  ;;  %v6925_v32 = vld [vmem:[%s10753_s15 + $0x8] sm:$0xff] }
0x119e   :  { %v8206_v58 = vpack.c.bf16 %v6925_v32, %v6924_v59 }
0x119f   :  { %v10689_v22 = vsub.f32 %v6787_v34, %v6821_v44  ;;  %v6836_v53 = vmul.f32 %v10687_v17, %v10687_v17 }
0x11a0   :  { %8207 = vmatpush3.bf16.msra.mxu1 %v8206_v58 }
0x11a1   :  { %v6852_v0 = vsel %vm162_vm0, %v6836_v53, 0.0  ;;  %v6837_v16 = vmul.f32 %v10689_v22, %v10689_v22  ;;  %8208 = vmatprep.subr.bf16.mxu1 %v8604_v25 }
0x11a2   :  { %6853 = vadd.xlane.f32.xlu1 %v6852_v0  ;;  %v6812_v56 = vpop.xlane.xlu1 %6811 }
0x11a3   :  { %v6822_v2 = vmul.f32 0.03125, %v6812_v56  ;;  %v6855_v26 = vsel %vm162_vm0, %v6837_v16, 0.0 }
0x11a4   :  { %6856 = vadd.xlane.f32.xlu0 %v6855_v26  ;;  %v6815_v21 = vpop.xlane.xlu0 %6814  ;;  %8210 = vmatpush3.bf16.msra.mxu1 %v8209_v18 }
0x11a5   :  { %v10697_v40 = vsub.f32 %v6788_v57, %v6822_v2  ;;  %v6823_v45 = vmul.f32 0.03125, %v6815_v21 }
0x11a7   :  { %v10699_v42 = vsub.f32 %v6789_v36, %v6823_v45  ;;  %v6838_v8 = vmul.f32 %v10697_v40, %v10697_v40 }
0x11a9   :  { %v6858_v27 = vsel %vm162_vm0, %v6838_v8, 0.0  ;;  %v6839_v19 = vmul.f32 %v10699_v42, %v10699_v42 }
0x11aa   :  { %6859 = vadd.xlane.f32.xlu1 %v6858_v27 }
0x11ab   :  { %v6861_v39 = vsel %vm162_vm0, %v6839_v19, 0.0 }
0x11ac   :  { %6862 = vadd.xlane.f32.xlu0 %v6861_v39 }
0x121f   :  { %v6842_v20 = vpop.xlane.xlu1 %6841 }
0x1220   :  { %v6864_v34 = vmul.f32 0.03125, %v6842_v20 }
0x1221   :  { %v6845_v41 = vpop.xlane.xlu0 %6844 }
0x1222   :  { %v6865_v46 = vmul.f32 0.03125, %v6845_v41  ;;  %v6872_v33 = vadd.f32 1e-05, %v6864_v34 }
0x1224   :  { %v6873_v9 = vadd.f32 1e-05, %v6865_v46 }
0x1226   :  { %8571 = vrsqrt.f32 %v6873_v9 }
0x1227   :  { %v6848_v50 = vpop.xlane.xlu1 %6847  ;;  %8573 = vrsqrt.f32 %v6872_v33 }
0x1228   :  { %v6866_v29 = vmul.f32 0.03125, %v6848_v50 }
0x1229   :  { %v6851_v6 = vpop.xlane.xlu0 %6850 }
0x122a   :  { %v6874_v55 = vadd.f32 1e-05, %v6866_v29  ;;  %v6867_v62 = vmul.f32 0.03125, %v6851_v6 }
0x122c   :  { %8575 = vrsqrt.f32 %v6874_v55  ;;  %v6875_v61 = vadd.f32 1e-05, %v6867_v62 }
0x122e   :  { %8577 = vrsqrt.f32 %v6875_v61 }
0x122f   :  { %v6854_v10 = vpop.xlane.xlu1 %6853 }
0x1230   :  { %v6868_v57 = vmul.f32 0.03125, %v6854_v10  ;;  %v8572_v31 = vpop.eup %8571 }
0x1231   :  { %v6857_v43 = vpop.xlane.xlu0 %6856  ;;  %v8574_v51 = vpop.eup %8573  ;;  %v6889_v28 = vmul.f32 %v8572_v31, %v10668_v5 }
0x1232   :  { %v6876_v36 = vadd.f32 1e-05, %v6868_v57  ;;  %v6869_v38 = vmul.f32 0.03125, %v6857_v43  ;;  %v6888_v47 = vmul.f32 %v8574_v51, %v10665_v14 }
0x1233   :  { %v6903_v12 = vmul.f32 %v7317_v49, %v6889_v28 }
0x1234   :  { %8579 = vrsqrt.f32 %v6876_v36  ;;  %v6877_v60 = vadd.f32 1e-05, %v6869_v38  ;;  %v6902_v5 = vmul.f32 %v7317_v49, %v6888_v47 }
0x1236   :  { %v8576_v37 = vpop.eup %8575  ;;  %8581 = vrsqrt.f32 %v6877_v60 }
0x1237   :  { %v6890_v63 = vmul.f32 %v8576_v37, %v10677_v11  ;;  %v6860_v23 = vpop.xlane.xlu1 %6859  ;;  %v7318_v11 = vld [vmem:[%s10755_s14] ss:$0 sm:$0xff] }
0x1238   :  { %v8578_v35 = vpop.eup %8577  ;;  %v6870_v52 = vmul.f32 0.03125, %v6860_v23  ;;  %v6917_v15 = vadd.f32 %v7318_v11, %v6903_v12  ;;  %v6916_v56 = vadd.f32 %v7318_v11, %v6902_v5 }
0x1239   :  { %v6863_v3 = vpop.xlane.xlu0 %6862  ;;  %v6891_v4 = vmul.f32 %v8578_v35, %v10679_v48  ;;  %v6904_v54 = vmul.f32 %v7317_v49, %v6890_v63 }
0x123a   :  { %v6878_v13 = vadd.f32 1e-05, %v6870_v52  ;;  %v6871_v30 = vmul.f32 0.03125, %v6863_v3  ;;  %v6944_v26 = vrot.slane %v6917_v15, 6  ;;  %v6943_v19 = vrot.slane %v6916_v56, 7 }
0x123b   :  { %v6905_v44 = vmul.f32 %v7317_v49, %v6891_v4  ;;  %v6918_v53 = vadd.f32 %v7318_v11, %v6904_v54 }
0x123c   :  { %8583 = vrsqrt.f32 %v6878_v13  ;;  %v6879_v24 = vadd.f32 1e-05, %v6871_v30  ;;  %v6946_v25 = vsel %vm6945_vm6, %v6944_v26, %v6943_v19 }
0x123d   :  { %v6919_v21 = vadd.f32 %v7318_v11, %v6905_v44  ;;  %v6947_v45 = vrot.slane %v6918_v53, 5 }
0x123e   :  { %v8580_v14 = vpop.eup %8579  ;;  %8585 = vrsqrt.f32 %v6879_v24 }
0x123f   :  { %v6892_v0 = vmul.f32 %v8580_v14, %v10687_v17  ;;  %v6950_v59 = vrot.slane %v6919_v21, 4  ;;  %v6949_v58 = vsel %vm6948_vm7, %v6947_v45, %v6946_v25 }
0x1240   :  { %v8582_v16 = vpop.eup %8581 }
0x1241   :  { %v6906_v48 = vmul.f32 %v7317_v49, %v6892_v0  ;;  %v6893_v2 = vmul.f32 %v8582_v16, %v10689_v22  ;;  %v6952_v20 = vsel %vm6951_vm8, %v6950_v59, %v6949_v58 }
0x1243   :  { %v6920_v8 = vadd.f32 %v7318_v11, %v6906_v48  ;;  %v6907_v27 = vmul.f32 %v7317_v49, %v6893_v2 }
0x1245   :  { %v6921_v32 = vadd.f32 %v7318_v11, %v6907_v27  ;;  %v6953_v17 = vrot.slane %v6920_v8, 3 }
0x1246   :  { %v8584_v39 = vpop.eup %8583 }
0x1247   :  { %v6894_v7 = vmul.f32 %v8584_v39, %v10697_v40  ;;  %v6956_v41 = vrot.slane %v6921_v32, 2  ;;  %v6955_v46 = vsel %vm6954_vm9, %v6953_v17, %v6952_v20  ;;  %v7319_v40 = vld [vmem:[%s10756_s16] ss:$0 sm:$0xff] }
0x1248   :  { %v8586_v1 = vpop.eup %8585 }
0x1249   :  { %v6908_v22 = vmul.f32 %v7317_v49, %v6894_v7  ;;  %v6895_v18 = vmul.f32 %v8586_v1, %v10699_v42  ;;  %v6958_v29 = vsel %vm6957_vm10, %v6956_v41, %v6955_v46 }
0x124b   :  { %v6922_v34 = vadd.f32 %v7318_v11, %v6908_v22  ;;  %v6909_v9 = vmul.f32 %v7317_v49, %v6895_v18 }
0x124d   :  { %v6959_v33 = vrot.slane %v6922_v34, 1  ;;  %v6923_v50 = vadd.f32 %v7318_v11, %v6909_v9 }
0x124f   :  { %v6961_v6 = vsel %vm6960_vm11, %v6959_v33, %v6958_v29 }
0x1250   :  { %v6963_v55 = vsel %vm6962_vm12, %v6923_v50, %v6961_v6 }
0x1251   :  { %8203 = vmatmul.mubr.msk.f32.vlgmr.msra.gmra.mrb[8].mxu1 %vm162_vm0, %v6963_v55 }
0x1324   :  { %v7032_v42 = vpop.f32.mrb[8].mxu1 }
0x1325   :  { %v7033_v62 = vadd.f32 %v7319_v40, %v7032_v42  ;;  %v8204_v61 = vpop.f32.mrb[9].mxu1 }
0x1327   :  { %7037 = vst.msk [vmem:[%s10757_s17] sm:$0xff] %vm7036_vm13, %v7033_v62 }

</bundles_post_ra>
